<compile_context>
chip_gen: v6e
topology: v6e:2x2x1
jax: 0.10.0
libtpu: 0.0.40
codegen_flags: <defaults>
</compile_context>

<pallas_src>
import functools

import numpy as np

import jax
import jax.numpy as jnp
from jax.experimental import pallas as pl
from jax.experimental.pallas import tpu as pltpu

KSIZE = 3
KK = KSIZE * KSIZE
EPS = 1e-5            # nn.BatchNorm2d default eps
NEG_SLOPE = 0.25      # LeakyReLU negative_slope from the module
LANE = 128


def _round_up(x, m):
    return (x + m - 1) // m * m


def _vmem_limit_bytes():
    """Generation-aware VMEM ceiling: ~96 MiB on v5e/v6e (128 MiB physical),
    ~48 MiB on v7x (64 MiB physical)."""
    try:
        cap = int(pltpu.get_tpu_info().vmem_capacity_bytes)
    except Exception:
        cap = 64 * 1024 * 1024            # conservative (v7x-sized) fallback
    return min(cap * 3 // 4, 96 * 1024 * 1024)


# ------------------------------------------------------------------ pass 1: conv + stats
def _conv_stats_kernel(x_ref, halo_ref, w_ref, y_ref, sum_ref, sq_ref, *,
                       mask_last_tile, valid_rows_last):
    # x_ref:    (1, TH,  W+2, Cin)  main rows of the zero-padded NHWC input (compute dtype)
    # halo_ref: (1, 2,   W+2, Cin)  the two padded rows just below the main block
    # w_ref:    (9, Cin, Cp)        per-tap weights, Cp lane-dense
    # y_ref:    (1, TH,  W,   Cp)   conv output tile (compute dtype)
    # sum_ref:  (1, 1, 1, Cp)       per-tile per-channel sum        (BN batch stats, f32)
    # sq_ref:   (1, 1, 1, Cp)       per-tile per-channel sum of squares (f32)
    th = x_ref.shape[1]
    wp = x_ref.shape[2]
    w_out = wp - (KSIZE - 1)

    # (TH+2, W+2, Cin) window: main rows + 2 halo rows (major-axis concat, cheap).
    # TODO(synk): could be removed by DMA-ing the halo into the tail of a shared VMEM
    # scratch; kept because it is one small compute-dtype copy per grid step.
    window = jnp.concatenate([x_ref[0], halo_ref[0]], axis=0)

    # Per-tap accumulation: shifts are applied to the (narrow, compute-dtype) input; each
    # tap is a lane-dense (TH, W, Cin) x (Cin, Cp) MXU dot with f32 accumulation.  Only the
    # kw shift is sublane-misaligned (2 small relayouts per tile instead of 6 relayouts of
    # the 9*Cp-wide f32 slab in the previous taps-on-N formulation).
    acc = None
    for kw in range(KSIZE):
        col = window[:, kw:kw + w_out, :]                 # one W-shift per kw
        for kh in range(KSIZE):
            xs = col[kh:kh + th]                          # leading-dim slice, free
            part = jax.lax.dot_general(
                xs, w_ref[kh * KSIZE + kw],
                dimension_numbers=(((2,), (0,)), ((), ())),
                preferred_element_type=jnp.float32)       # (TH, W, Cp) f32
            acc = part if acc is None else acc + part

    y_ref[0] = acc.astype(y_ref.dtype)

    # Partial BatchNorm statistics.  Rows past the true H only exist in the last H tile
    # (and only when TH does not divide H); every other tile sums unmasked.
    def _unmasked():
        sum_ref[...] = jnp.sum(acc, axis=(0, 1), keepdims=True)[None]
        sq_ref[...] = jnp.sum(acc * acc, axis=(0, 1), keepdims=True)[None]

    if not mask_last_tile:
        _unmasked()
    else:
        is_last = pl.program_id(1) == pl.num_programs(1) - 1

        @pl.when(jnp.logical_not(is_last))
        def _():
            _unmasked()

        @pl.when(is_last)
        def _():
            row = jax.lax.broadcasted_iota(jnp.int32, (th, 1, 1), 0)
            acc_m = jnp.where(row < valid_rows_last, acc, 0.0)
            sum_ref[...] = jnp.sum(acc_m, axis=(0, 1), keepdims=True)[None]
            sq_ref[...] = jnp.sum(acc_m * acc_m, axis=(0, 1), keepdims=True)[None]


# --------------------------------------------------- pass 2: folded BN affine + LeakyReLU
def _bn_lrelu_kernel(y_ref, scale_ref, shift_ref, o_ref):
    y = y_ref[...].astype(jnp.float32)                    # (1, TH2, W, Cp)
    scale = scale_ref[...][:, None, None, :]              # (1, 1, 1, Cp)
    shift = shift_ref[...][:, None, None, :]
    z = y * scale + shift                                 # BN folded into one FMA
    o_ref[...] = jnp.where(z > 0, z, NEG_SLOPE * z).astype(o_ref.dtype)


# --------------------------------------------------------------------------- tile sizing
def _pick_block_h(h, w, cin, cp, in_item, y_item, budget_bytes):
    """Largest even H row tile whose pipeline working set (double-buffered in/out tiles,
    weights, halo, stats, in-kernel f32 accumulator + shifted-slice temps) fits budget."""
    wp = w + 2
    weights = KK * cin * cp * in_item * 2    # constant-index input, still double-buffered
    # TODO(synk): pipeline_mode=pl.Buffered(1) on the weight BlockSpec would halve this.
    h_cap = max(2, _round_up(h, 2))
    for th in (1024, 768, 512, 384, 256, 192, 128, 96, 64, 48, 32, 24, 16, 12, 8, 6, 4, 2):
        if th > h_cap:
            continue
        in_tile = th * wp * cin * in_item
        halo = 2 * wp * cin * in_item
        y_tile = th * w * cp * y_item
        stats = 2 * cp * 4
        window = (th + 2) * wp * cin * in_item            # in-kernel concat temp
        acc = th * w * cp * 4                             # f32 accumulator (+ one partial)
        slices = 2 * th * w * cin * in_item               # shifted input slice temps
        work = (2 * (in_tile + halo + y_tile + stats)
                + weights + window + 2 * acc + slices)
        if work <= budget_bytes:
            return th
    return 2


def _pick_block_h2(h2, w, cp, in_item, out_item, budget_bytes):
    """Largest divisor of h2 whose double-buffered in/out tiles (+ f32 temp) fit budget."""
    per_row = w * cp * (2 * in_item + 2 * out_item + 4)
    best = 1
    for th2 in range(1, h2 + 1):
        if h2 % th2 == 0 and th2 * per_row + 4 * cp * 4 <= budget_bytes:
            best = th2
    return best


# --------------------------------------------------------------------------------- block
@functools.partial(jax.jit, static_argnames=("compute_dtype", "block_h"))
def darknet_conv_block(x_nchw, weight_oihw, bias, gamma, beta, *,
                       compute_dtype=jnp.bfloat16, block_h=None):
    """x_nchw: (N, Cin, H, W); weight_oihw: (Cout, Cin, 3, 3). Returns (N, Cout, H, W)."""
    # The Conv2d bias is cancelled exactly by training-mode BatchNorm mean subtraction,
    # so it is not applied (saves a full VPU pass over the activations).
    # TODO(synk): if this block is ever reused with eval-mode/running-stats BN the bias
    # (and the running statistics) must be applied instead.
    del bias
    n, cin, h, w = x_nchw.shape
    cout = weight_oihw.shape[0]
    cp = _round_up(cout, LANE)               # lane-dense output channels
    out_dtype = x_nchw.dtype

    in_item = np.dtype(compute_dtype).itemsize
    vmem_limit = _vmem_limit_bytes()
    budget = int(vmem_limit * 0.85)

    if block_h is None:
        block_h = _pick_block_h(h, w, cin, cp, in_item, in_item, budget)
    th = int(block_h)
    assert th % 2 == 0, "block_h must be even"
    gh = pl.cdiv(h, th)
    wp = w + 2
    h_pad = (gh + 1) * th                    # >= gh*th + 2; keeps every block in range

    # Layout prologue (fused by XLA): NCHW -> NHWC, cast for the MXU, zero-pad H/W.
    x_nhwc = jnp.transpose(x_nchw, (0, 2, 3, 1)).astype(compute_dtype)
    x_pad = jnp.pad(x_nhwc, ((0, 0), (1, h_pad - 1 - h), (1, 1), (0, 0)))

    # Weights: (Cout, Cin, 3, 3) -> (9, Cin, Cp): tap-major, Cp lane-dense.
    w_taps = jnp.transpose(weight_oihw, (2, 3, 1, 0)).reshape(KK, cin, cout)
    w_taps = jnp.pad(w_taps, ((0, 0), (0, 0), (0, cp - cout))).astype(compute_dtype)

    grid = (n, gh)
    compiler_params = pltpu.CompilerParams(
        dimension_semantics=("parallel", "parallel"),
        vmem_limit_bytes=vmem_limit)

    conv_cost = pl.CostEstimate(
        flops=2 * n * h * w * KK * cin * cout,
        transcendentals=0,
        bytes_accessed=int(x_pad.size * x_pad.dtype.itemsize
                           + w_taps.size * w_taps.dtype.itemsize
                           + n * gh * th * w * cp * in_item
                           + 2 * n * gh * cp * 4))

    valid_rows_last = h - (gh - 1) * th
    mask_last = (h % th) != 0

    conv_out, psum, psq = pl.pallas_call(
        functools.partial(_conv_stats_kernel,
                          mask_last_tile=mask_last,
                          valid_rows_last=valid_rows_last),
        grid=grid,
        in_specs=[
            pl.BlockSpec((1, th, wp, cin), lambda i, j: (i, j, 0, 0)),
            pl.BlockSpec((1, 2, wp, cin), lambda i, j: (i, (j + 1) * (th // 2), 0, 0)),
            pl.BlockSpec((KK, cin, cp), lambda i, j: (0, 0, 0)),
        ],
        out_specs=(
            pl.BlockSpec((1, th, w, cp), lambda i, j: (i, j, 0, 0)),
            pl.BlockSpec((1, 1, 1, cp), lambda i, j: (i, j, 0, 0)),
            pl.BlockSpec((1, 1, 1, cp), lambda i, j: (i, j, 0, 0)),
        ),
        out_shape=(
            jax.ShapeDtypeStruct((n, gh * th, w, cp), compute_dtype),
            jax.ShapeDtypeStruct((n, gh, 1, cp), jnp.float32),
            jax.ShapeDtypeStruct((n, gh, 1, cp), jnp.float32),
        ),
        compiler_params=compiler_params,
        cost_estimate=conv_cost,
    )(x_pad, x_pad, w_taps)

    # Tiny global reduction: combine per-tile (sum, sumsq) with a Chan-style per-tile-M2
    # merge (avoids catastrophic E[x^2]-E[x]^2 cancellation at production sizes), then
    # fold training-mode BatchNorm into a single per-channel scale/shift FMA.
    psum = psum.reshape(n, gh, cp)
    psq = psq.reshape(n, gh, cp)
    rows = np.full((gh,), th, dtype=np.float64)
    rows[-1] = valid_rows_last
    cnt_t = jnp.asarray((rows * w).astype(np.float32))[None, :, None]   # (1, gh, 1)
    total = jnp.float32(n * h * w)

    mean_t = psum / cnt_t                                 # per-tile mean
    m2_t = psq - psum * mean_t                            # per-tile sum of sq. deviations
    mean = jnp.sum(psum, axis=(0, 1)) / total             # (Cp,)
    m2 = (jnp.sum(m2_t, axis=(0, 1))
          + jnp.sum(cnt_t * (mean_t - mean) ** 2, axis=(0, 1)))
    var = jnp.maximum(m2 / total, 0.0)                    # biased var, as BN training mode
    inv = jax.lax.rsqrt(var + EPS)

    gamma_p = jnp.pad(gamma.astype(jnp.float32), (0, cp - cout))
    beta_p = jnp.pad(beta.astype(jnp.float32), (0, cp - cout))
    scale = (gamma_p * inv).reshape(1, cp)
    shift = (beta_p - mean * gamma_p * inv).reshape(1, cp)

    # Pass 2: folded BN affine + LeakyReLU.  Tiled independently of pass 1 (memory-bound:
    # largest row tile that fits); output is already in the caller's dtype, so only one
    # fused crop + NCHW transpose remains in XLA.
    h2 = gh * th
    th2 = _pick_block_h2(h2, w, cp, in_item, np.dtype(out_dtype).itemsize, budget)
    gh2 = h2 // th2
    alias = {0: 0} if np.dtype(compute_dtype) == out_dtype else {}

    out_nhwc = pl.pallas_call(
        _bn_lrelu_kernel,
        grid=(n, gh2),
        in_specs=[
            pl.BlockSpec((1, th2, w, cp), lambda i, j: (i, j, 0, 0)),
            pl.BlockSpec((1, cp), lambda i, j: (0, 0)),
            pl.BlockSpec((1, cp), lambda i, j: (0, 0)),
        ],
        out_specs=pl.BlockSpec((1, th2, w, cp), lambda i, j: (i, j, 0, 0)),
        out_shape=jax.ShapeDtypeStruct((n, h2, w, cp), out_dtype),
        input_output_aliases=alias,
        compiler_params=compiler_params,
    )(conv_out, scale, shift)

    out = out_nhwc[:, :h, :, :cout]                       # crop fuses into the transpose
    return jnp.transpose(out, (0, 3, 1, 2))               # back to NCHW


def _reference(x, weight, bias, gamma, beta):
    # Pure-JAX reference matching the PyTorch module (fresh BN => batch stats, biased var).
    out = jax.lax.conv_general_dilated(
        x, weight, window_strides=(1, 1), padding=((1, 1), (1, 1)),
        dimension_numbers=("NCHW", "OIHW", "NCHW"))
    out = out + bias[None, :, None, None]
    mean = jnp.mean(out, axis=(0, 2, 3), keepdims=True)
    var = jnp.mean((out - mean) ** 2, axis=(0, 2, 3), keepdims=True)
    out = (out - mean) * jax.lax.rsqrt(var + EPS)
    out = out * gamma[None, :, None, None] + beta[None, :, None, None]
    return jnp.where(out > 0, out, NEG_SLOPE * out)


if __name__ == "__main__":
    key = jax.random.PRNGKey(0)
    k_x, k_w, k_b = jax.random.split(key, 3)

    N, CIN, COUT, H, W = 2, 4, 8, 16, 16
    x = jax.random.normal(k_x, (N, CIN, H, W), jnp.float32)
    weight = jax.random.normal(k_w, (COUT, CIN, KSIZE, KSIZE), jnp.float32) * 0.1
    bias = jax.random.normal(k_b, (COUT,), jnp.float32) * 0.1
    gamma = jnp.ones((COUT,), jnp.float32)    # fresh BatchNorm2d weight
    beta = jnp.zeros((COUT,), jnp.float32)    # fresh BatchNorm2d bias

    ref = jax.block_until_ready(_reference(x, weight, bias, gamma, beta))

    # Performance config: bf16 MXU inputs + bf16 inter-pass buffer, auto (VMEM-aware) tile.
    out = jax.block_until_ready(
        darknet_conv_block(x, weight, bias, gamma, beta, compute_dtype=jnp.bfloat16))
    assert out.shape == (N, COUT, H, W)
    err_bf16 = float(jnp.max(jnp.abs(out - ref)))
    assert err_bf16 < 6e-2, f"bf16 path error too large: {err_bf16}"

    # Full-precision configs exercising multi-tile grids, with and without the masked
    # last-tile BN-stats path, for tight numerical checks of the same kernel structure.
    out_f32 = jax.block_until_ready(
        darknet_conv_block(x, weight, bias, gamma, beta,
                           compute_dtype=jnp.float32, block_h=8))
    err_f32 = float(jnp.max(jnp.abs(out_f32 - ref)))
    assert err_f32 < 1e-3, f"f32 path error too large: {err_f32}"

    out_f32m = jax.block_until_ready(
        darknet_conv_block(x, weight, bias, gamma, beta,
                           compute_dtype=jnp.float32, block_h=6))
    err_f32m = float(jnp.max(jnp.abs(out_f32m - ref)))
    assert err_f32m < 1e-3, f"f32 masked-tile path error too large: {err_f32m}"

    print("KERNEL_OK")
</pallas_src>

<mosaic_0001>
module attributes {stable_mosaic.version = 11 : i64} {
  func.func @_conv_stats_kernel(%arg0: i32, %arg1: i32, %arg2: memref<1x16x18x4xbf16, #tpu.memory_space<vmem>>, %arg3: memref<1x2x18x4xbf16, #tpu.memory_space<vmem>>, %arg4: memref<9x4x128xbf16, #tpu.memory_space<vmem>>, %arg5: memref<1x16x16x128xbf16, #tpu.memory_space<vmem>>, %arg6: memref<1x1x1x128xf32, #tpu.memory_space<vmem>>, %arg7: memref<1x1x1x128xf32, #tpu.memory_space<vmem>>) attributes {dimension_semantics = [#tpu.dimension_semantics<parallel>, #tpu.dimension_semantics<parallel>], iteration_bounds = array<i64: 2, 1>, scalar_prefetch = 0 : i64, scratch_operands = 0 : i64, tpu.core_type = #tpu.core_type<tc>, window_params = [{transform_indices = @transform_0, window_bounds = array<i64: 1, 16, 18, 4>}, {transform_indices = @transform_1, window_bounds = array<i64: 1, 2, 18, 4>}, {pipeline_mode = #tpu.pipeline_mode<synchronous>, transform_indices = @transform_2, window_bounds = array<i64: 9, 4, 128>}, {transform_indices = @transform_3, window_bounds = array<i64: 1, 16, 16, 128>}, {transform_indices = @transform_4, window_bounds = array<i64: 1, 1, 1, 128>}, {transform_indices = @transform_5, window_bounds = array<i64: 1, 1, 1, 128>}]} {
    %c0 = arith.constant 0 : index
    %c0_0 = arith.constant 0 : index
    %c0_1 = arith.constant 0 : index
    %c0_2 = arith.constant 0 : index
    %0 = vector.load %arg2[%c0, %c0_0, %c0_1, %c0_2] : memref<1x16x18x4xbf16, #tpu.memory_space<vmem>>, vector<1x16x18x4xbf16>
    %1 = vector.shape_cast %0 : vector<1x16x18x4xbf16> to vector<16x18x4xbf16>
    %c0_3 = arith.constant 0 : index
    %c0_4 = arith.constant 0 : index
    %c0_5 = arith.constant 0 : index
    %c0_6 = arith.constant 0 : index
    %2 = vector.load %arg3[%c0_3, %c0_4, %c0_5, %c0_6] : memref<1x2x18x4xbf16, #tpu.memory_space<vmem>>, vector<1x2x18x4xbf16>
    %3 = vector.shape_cast %2 : vector<1x2x18x4xbf16> to vector<2x18x4xbf16>
    %4 = tpu.concatenate %1, %3 in 0 : vector<16x18x4xbf16>, vector<2x18x4xbf16> -> vector<18x18x4xbf16>
    %5 = vector.extract_strided_slice %4 {offsets = [0, 0, 0], sizes = [18, 16, 4], strides = [1, 1, 1]} : vector<18x18x4xbf16> to vector<18x16x4xbf16>
    %6 = vector.extract_strided_slice %5 {offsets = [0, 0, 0], sizes = [16, 16, 4], strides = [1, 1, 1]} : vector<18x16x4xbf16> to vector<16x16x4xbf16>
    %c0_7 = arith.constant 0 : index
    %c0_8 = arith.constant 0 : index
    %c0_9 = arith.constant 0 : index
    %7 = vector.load %arg4[%c0_7, %c0_8, %c0_9] : memref<9x4x128xbf16, #tpu.memory_space<vmem>>, vector<1x4x128xbf16>
    %8 = vector.shape_cast %7 : vector<1x4x128xbf16> to vector<4x128xbf16>
    %cst = arith.constant dense<0.000000e+00> : vector<16x16x128xf32>
    %9 = tpu.matmul %6, %8, %cst {dimension_numbers = #tpu.dot_dimension_numbers<[2], [0], [0, 1], [1], [0, 0, 0, 1, 1, 1], [], []>} : vector<16x16x4xbf16>, vector<4x128xbf16>, vector<16x16x128xf32> -> vector<16x16x128xf32>
    %10 = vector.extract_strided_slice %5 {offsets = [1, 0, 0], sizes = [16, 16, 4], strides = [1, 1, 1]} : vector<18x16x4xbf16> to vector<16x16x4xbf16>
    %c3 = arith.constant 3 : index
    %c0_10 = arith.constant 0 : index
    %c0_11 = arith.constant 0 : index
    %11 = vector.load %arg4[%c3, %c0_10, %c0_11] : memref<9x4x128xbf16, #tpu.memory_space<vmem>>, vector<1x4x128xbf16>
    %12 = vector.shape_cast %11 : vector<1x4x128xbf16> to vector<4x128xbf16>
    %cst_12 = arith.constant dense<0.000000e+00> : vector<16x16x128xf32>
    %13 = tpu.matmul %10, %12, %cst_12 {dimension_numbers = #tpu.dot_dimension_numbers<[2], [0], [0, 1], [1], [0, 0, 0, 1, 1, 1], [], []>} : vector<16x16x4xbf16>, vector<4x128xbf16>, vector<16x16x128xf32> -> vector<16x16x128xf32>
    %14 = arith.addf %9, %13 : vector<16x16x128xf32>
    %15 = vector.extract_strided_slice %5 {offsets = [2, 0, 0], sizes = [16, 16, 4], strides = [1, 1, 1]} : vector<18x16x4xbf16> to vector<16x16x4xbf16>
    %c6 = arith.constant 6 : index
    %c0_13 = arith.constant 0 : index
    %c0_14 = arith.constant 0 : index
    %16 = vector.load %arg4[%c6, %c0_13, %c0_14] : memref<9x4x128xbf16, #tpu.memory_space<vmem>>, vector<1x4x128xbf16>
    %17 = vector.shape_cast %16 : vector<1x4x128xbf16> to vector<4x128xbf16>
    %cst_15 = arith.constant dense<0.000000e+00> : vector<16x16x128xf32>
    %18 = tpu.matmul %15, %17, %cst_15 {dimension_numbers = #tpu.dot_dimension_numbers<[2], [0], [0, 1], [1], [0, 0, 0, 1, 1, 1], [], []>} : vector<16x16x4xbf16>, vector<4x128xbf16>, vector<16x16x128xf32> -> vector<16x16x128xf32>
    %19 = arith.addf %14, %18 : vector<16x16x128xf32>
    %20 = vector.extract_strided_slice %4 {offsets = [0, 1, 0], sizes = [18, 16, 4], strides = [1, 1, 1]} : vector<18x18x4xbf16> to vector<18x16x4xbf16>
    %21 = vector.extract_strided_slice %20 {offsets = [0, 0, 0], sizes = [16, 16, 4], strides = [1, 1, 1]} : vector<18x16x4xbf16> to vector<16x16x4xbf16>
    %c1 = arith.constant 1 : index
    %c0_16 = arith.constant 0 : index
    %c0_17 = arith.constant 0 : index
    %22 = vector.load %arg4[%c1, %c0_16, %c0_17] : memref<9x4x128xbf16, #tpu.memory_space<vmem>>, vector<1x4x128xbf16>
    %23 = vector.shape_cast %22 : vector<1x4x128xbf16> to vector<4x128xbf16>
    %cst_18 = arith.constant dense<0.000000e+00> : vector<16x16x128xf32>
    %24 = tpu.matmul %21, %23, %cst_18 {dimension_numbers = #tpu.dot_dimension_numbers<[2], [0], [0, 1], [1], [0, 0, 0, 1, 1, 1], [], []>} : vector<16x16x4xbf16>, vector<4x128xbf16>, vector<16x16x128xf32> -> vector<16x16x128xf32>
    %25 = arith.addf %19, %24 : vector<16x16x128xf32>
    %26 = vector.extract_strided_slice %20 {offsets = [1, 0, 0], sizes = [16, 16, 4], strides = [1, 1, 1]} : vector<18x16x4xbf16> to vector<16x16x4xbf16>
    %c4 = arith.constant 4 : index
    %c0_19 = arith.constant 0 : index
    %c0_20 = arith.constant 0 : index
    %27 = vector.load %arg4[%c4, %c0_19, %c0_20] : memref<9x4x128xbf16, #tpu.memory_space<vmem>>, vector<1x4x128xbf16>
    %28 = vector.shape_cast %27 : vector<1x4x128xbf16> to vector<4x128xbf16>
    %cst_21 = arith.constant dense<0.000000e+00> : vector<16x16x128xf32>
    %29 = tpu.matmul %26, %28, %cst_21 {dimension_numbers = #tpu.dot_dimension_numbers<[2], [0], [0, 1], [1], [0, 0, 0, 1, 1, 1], [], []>} : vector<16x16x4xbf16>, vector<4x128xbf16>, vector<16x16x128xf32> -> vector<16x16x128xf32>
    %30 = arith.addf %25, %29 : vector<16x16x128xf32>
    %31 = vector.extract_strided_slice %20 {offsets = [2, 0, 0], sizes = [16, 16, 4], strides = [1, 1, 1]} : vector<18x16x4xbf16> to vector<16x16x4xbf16>
    %c7 = arith.constant 7 : index
    %c0_22 = arith.constant 0 : index
    %c0_23 = arith.constant 0 : index
    %32 = vector.load %arg4[%c7, %c0_22, %c0_23] : memref<9x4x128xbf16, #tpu.memory_space<vmem>>, vector<1x4x128xbf16>
    %33 = vector.shape_cast %32 : vector<1x4x128xbf16> to vector<4x128xbf16>
    %cst_24 = arith.constant dense<0.000000e+00> : vector<16x16x128xf32>
    %34 = tpu.matmul %31, %33, %cst_24 {dimension_numbers = #tpu.dot_dimension_numbers<[2], [0], [0, 1], [1], [0, 0, 0, 1, 1, 1], [], []>} : vector<16x16x4xbf16>, vector<4x128xbf16>, vector<16x16x128xf32> -> vector<16x16x128xf32>
    %35 = arith.addf %30, %34 : vector<16x16x128xf32>
    %36 = vector.extract_strided_slice %4 {offsets = [0, 2, 0], sizes = [18, 16, 4], strides = [1, 1, 1]} : vector<18x18x4xbf16> to vector<18x16x4xbf16>
    %37 = vector.extract_strided_slice %36 {offsets = [0, 0, 0], sizes = [16, 16, 4], strides = [1, 1, 1]} : vector<18x16x4xbf16> to vector<16x16x4xbf16>
    %c2 = arith.constant 2 : index
    %c0_25 = arith.constant 0 : index
    %c0_26 = arith.constant 0 : index
    %38 = vector.load %arg4[%c2, %c0_25, %c0_26] : memref<9x4x128xbf16, #tpu.memory_space<vmem>>, vector<1x4x128xbf16>
    %39 = vector.shape_cast %38 : vector<1x4x128xbf16> to vector<4x128xbf16>
    %cst_27 = arith.constant dense<0.000000e+00> : vector<16x16x128xf32>
    %40 = tpu.matmul %37, %39, %cst_27 {dimension_numbers = #tpu.dot_dimension_numbers<[2], [0], [0, 1], [1], [0, 0, 0, 1, 1, 1], [], []>} : vector<16x16x4xbf16>, vector<4x128xbf16>, vector<16x16x128xf32> -> vector<16x16x128xf32>
    %41 = arith.addf %35, %40 : vector<16x16x128xf32>
    %42 = vector.extract_strided_slice %36 {offsets = [1, 0, 0], sizes = [16, 16, 4], strides = [1, 1, 1]} : vector<18x16x4xbf16> to vector<16x16x4xbf16>
    %c5 = arith.constant 5 : index
    %c0_28 = arith.constant 0 : index
    %c0_29 = arith.constant 0 : index
    %43 = vector.load %arg4[%c5, %c0_28, %c0_29] : memref<9x4x128xbf16, #tpu.memory_space<vmem>>, vector<1x4x128xbf16>
    %44 = vector.shape_cast %43 : vector<1x4x128xbf16> to vector<4x128xbf16>
    %cst_30 = arith.constant dense<0.000000e+00> : vector<16x16x128xf32>
    %45 = tpu.matmul %42, %44, %cst_30 {dimension_numbers = #tpu.dot_dimension_numbers<[2], [0], [0, 1], [1], [0, 0, 0, 1, 1, 1], [], []>} : vector<16x16x4xbf16>, vector<4x128xbf16>, vector<16x16x128xf32> -> vector<16x16x128xf32>
    %46 = arith.addf %41, %45 : vector<16x16x128xf32>
    %47 = vector.extract_strided_slice %36 {offsets = [2, 0, 0], sizes = [16, 16, 4], strides = [1, 1, 1]} : vector<18x16x4xbf16> to vector<16x16x4xbf16>
    %c8 = arith.constant 8 : index
    %c0_31 = arith.constant 0 : index
    %c0_32 = arith.constant 0 : index
    %48 = vector.load %arg4[%c8, %c0_31, %c0_32] : memref<9x4x128xbf16, #tpu.memory_space<vmem>>, vector<1x4x128xbf16>
    %49 = vector.shape_cast %48 : vector<1x4x128xbf16> to vector<4x128xbf16>
    %cst_33 = arith.constant dense<0.000000e+00> : vector<16x16x128xf32>
    %50 = tpu.matmul %47, %49, %cst_33 {dimension_numbers = #tpu.dot_dimension_numbers<[2], [0], [0, 1], [1], [0, 0, 0, 1, 1, 1], [], []>} : vector<16x16x4xbf16>, vector<4x128xbf16>, vector<16x16x128xf32> -> vector<16x16x128xf32>
    %51 = arith.addf %46, %50 : vector<16x16x128xf32>
    %52 = arith.truncf %51 : vector<16x16x128xf32> to vector<16x16x128xbf16>
    %c0_34 = arith.constant 0 : index
    %c0_35 = arith.constant 0 : index
    %c0_36 = arith.constant 0 : index
    %c0_37 = arith.constant 0 : index
    %53 = vector.load %arg5[%c0_34, %c0_35, %c0_36, %c0_37] : memref<1x16x16x128xbf16, #tpu.memory_space<vmem>>, vector<1x16x16x128xbf16>
    %54 = vector.shape_cast %53 : vector<1x16x16x128xbf16> to vector<16x16x128xbf16>
    %55 = vector.shape_cast %52 : vector<16x16x128xbf16> to vector<1x16x16x128xbf16>
    tpu.vector_store %arg5[%c0_34, %c0_35, %c0_36, %c0_37], %55 {strides = array<i32>} : memref<1x16x16x128xbf16, #tpu.memory_space<vmem>>, vector<1x16x16x128xbf16>,
    %cst_38 = arith.constant dense<0.000000e+00> : vector<128xf32>
    %56 = vector.multi_reduction <add>, %51, %cst_38 [0, 1] : vector<16x16x128xf32> to vector<128xf32>
    %57 = vector.shape_cast %56 : vector<128xf32> to vector<1x1x128xf32>
    %58 = vector.shape_cast %57 : vector<1x1x128xf32> to vector<1x1x1x128xf32>
    %c0_39 = arith.constant 0 : index
    %c0_40 = arith.constant 0 : index
    %c0_41 = arith.constant 0 : index
    %c0_42 = arith.constant 0 : index
    %59 = vector.load %arg6[%c0_39, %c0_40, %c0_41, %c0_42] : memref<1x1x1x128xf32, #tpu.memory_space<vmem>>, vector<1x1x1x128xf32>
    tpu.vector_store %arg6[%c0_39, %c0_40, %c0_41, %c0_42], %58 {strides = array<i32>} : memref<1x1x1x128xf32, #tpu.memory_space<vmem>>, vector<1x1x1x128xf32>,
    %60 = arith.mulf %51, %51 : vector<16x16x128xf32>
    %cst_43 = arith.constant dense<0.000000e+00> : vector<128xf32>
    %61 = vector.multi_reduction <add>, %60, %cst_43 [0, 1] : vector<16x16x128xf32> to vector<128xf32>
    %62 = vector.shape_cast %61 : vector<128xf32> to vector<1x1x128xf32>
    %63 = vector.shape_cast %62 : vector<1x1x128xf32> to vector<1x1x1x128xf32>
    %c0_44 = arith.constant 0 : index
    %c0_45 = arith.constant 0 : index
    %c0_46 = arith.constant 0 : index
    %c0_47 = arith.constant 0 : index
    %64 = vector.load %arg7[%c0_44, %c0_45, %c0_46, %c0_47] : memref<1x1x1x128xf32, #tpu.memory_space<vmem>>, vector<1x1x1x128xf32>
    tpu.vector_store %arg7[%c0_44, %c0_45, %c0_46, %c0_47], %63 {strides = array<i32>} : memref<1x1x1x128xf32, #tpu.memory_space<vmem>>, vector<1x1x1x128xf32>,
    return
  }
  func.func @transform_0(%arg0: i32, %arg1: i32) -> (i32, i32, i32, i32) {
    %c0_i32 = arith.constant 0 : i32
    %c0_i32_0 = arith.constant 0 : i32
    %c0_i32_1 = arith.constant 0 : i32
    return %arg0, %arg1, %c0_i32, %c0_i32_0 : i32, i32, i32, i32
  }
  func.func @transform_1(%arg0: i32, %arg1: i32) -> (i32, i32, i32, i32) {
    %c1_i32 = arith.constant 1 : i32
    %0 = arith.addi %arg1, %c1_i32 : i32
    %c8_i32 = arith.constant 8 : i32
    %1 = arith.muli %0, %c8_i32 : i32
    %c0_i32 = arith.constant 0 : i32
    %c0_i32_0 = arith.constant 0 : i32
    %c0_i32_1 = arith.constant 0 : i32
    return %arg0, %1, %c0_i32, %c0_i32_0 : i32, i32, i32, i32
  }
  func.func @transform_2(%arg0: i32, %arg1: i32) -> (i32, i32, i32) {
    %c0_i32 = arith.constant 0 : i32
    %c0_i32_0 = arith.constant 0 : i32
    %c0_i32_1 = arith.constant 0 : i32
    %c0_i32_2 = arith.constant 0 : i32
    return %c0_i32, %c0_i32_0, %c0_i32_1 : i32, i32, i32
  }
  func.func @transform_3(%arg0: i32, %arg1: i32) -> (i32, i32, i32, i32) {
    %c0_i32 = arith.constant 0 : i32
    %c0_i32_0 = arith.constant 0 : i32
    %c0_i32_1 = arith.constant 0 : i32
    return %arg0, %arg1, %c0_i32, %c0_i32_0 : i32, i32, i32, i32
  }
  func.func @transform_4(%arg0: i32, %arg1: i32) -> (i32, i32, i32, i32) {
    %c0_i32 = arith.constant 0 : i32
    %c0_i32_0 = arith.constant 0 : i32
    %c0_i32_1 = arith.constant 0 : i32
    return %arg0, %arg1, %c0_i32, %c0_i32_0 : i32, i32, i32, i32
  }
  func.func @transform_5(%arg0: i32, %arg1: i32) -> (i32, i32, i32, i32) {
    %c0_i32 = arith.constant 0 : i32
    %c0_i32_0 = arith.constant 0 : i32
    %c0_i32_1 = arith.constant 0 : i32
    return %arg0, %arg1, %c0_i32, %c0_i32_0 : i32, i32, i32, i32
  }
}

module attributes {stable_mosaic.version = 11 : i64} {
  func.func @_bn_lrelu_kernel(%arg0: i32, %arg1: i32, %arg2: memref<1x16x16x128xbf16, #tpu.memory_space<vmem>>, %arg3: memref<1x128xf32, #tpu.memory_space<vmem>>, %arg4: memref<1x128xf32, #tpu.memory_space<vmem>>, %arg5: memref<1x16x16x128xf32, #tpu.memory_space<vmem>>) attributes {dimension_semantics = [#tpu.dimension_semantics<parallel>, #tpu.dimension_semantics<parallel>], iteration_bounds = array<i64: 2, 1>, scalar_prefetch = 0 : i64, scratch_operands = 0 : i64, tpu.core_type = #tpu.core_type<tc>, window_params = [{transform_indices = @transform_0, window_bounds = array<i64: 1, 16, 16, 128>}, {pipeline_mode = #tpu.pipeline_mode<synchronous>, transform_indices = @transform_1, window_bounds = array<i64: 1, 128>}, {pipeline_mode = #tpu.pipeline_mode<synchronous>, transform_indices = @transform_2, window_bounds = array<i64: 1, 128>}, {transform_indices = @transform_3, window_bounds = array<i64: 1, 16, 16, 128>}]} {
    %c0 = arith.constant 0 : index
    %c0_0 = arith.constant 0 : index
    %c0_1 = arith.constant 0 : index
    %c0_2 = arith.constant 0 : index
    %0 = vector.load %arg2[%c0, %c0_0, %c0_1, %c0_2] : memref<1x16x16x128xbf16, #tpu.memory_space<vmem>>, vector<1x16x16x128xbf16>
    %1 = arith.extf %0 : vector<1x16x16x128xbf16> to vector<1x16x16x128xf32>
    %c0_3 = arith.constant 0 : index
    %c0_4 = arith.constant 0 : index
    %2 = vector.load %arg3[%c0_3, %c0_4] : memref<1x128xf32, #tpu.memory_space<vmem>>, vector<1x128xf32>
    %3 = vector.shape_cast %2 : vector<1x128xf32> to vector<1x1x1x128xf32>
    %c0_5 = arith.constant 0 : index
    %c0_6 = arith.constant 0 : index
    %4 = vector.load %arg4[%c0_5, %c0_6] : memref<1x128xf32, #tpu.memory_space<vmem>>, vector<1x128xf32>
    %5 = vector.shape_cast %4 : vector<1x128xf32> to vector<1x1x1x128xf32>
    %6 = vector.broadcast %3 : vector<1x1x1x128xf32> to vector<1x16x16x128xf32>
    %7 = arith.mulf %1, %6 : vector<1x16x16x128xf32>
    %8 = vector.broadcast %5 : vector<1x1x1x128xf32> to vector<1x16x16x128xf32>
    %9 = arith.addf %7, %8 : vector<1x16x16x128xf32>
    %cst = arith.constant 0.000000e+00 : f32
    %10 = vector.broadcast %cst : f32 to vector<1x16x16x128xf32>
    %11 = arith.cmpf ogt, %9, %10 : vector<1x16x16x128xf32>
    %cst_7 = arith.constant 2.500000e-01 : f32
    %12 = vector.broadcast %cst_7 : f32 to vector<1x16x16x128xf32>
    %13 = arith.mulf %12, %9 : vector<1x16x16x128xf32>
    %14 = arith.select %11, %9, %13 : vector<1x16x16x128xi1>, vector<1x16x16x128xf32>
    %c0_8 = arith.constant 0 : index
    %c0_9 = arith.constant 0 : index
    %c0_10 = arith.constant 0 : index
    %c0_11 = arith.constant 0 : index
    %15 = vector.load %arg5[%c0_8, %c0_9, %c0_10, %c0_11] : memref<1x16x16x128xf32, #tpu.memory_space<vmem>>, vector<1x16x16x128xf32>
    tpu.vector_store %arg5[%c0_8, %c0_9, %c0_10, %c0_11], %14 {strides = array<i32>} : memref<1x16x16x128xf32, #tpu.memory_space<vmem>>, vector<1x16x16x128xf32>,
    return
  }
  func.func @transform_0(%arg0: i32, %arg1: i32) -> (i32, i32, i32, i32) {
    %c0_i32 = arith.constant 0 : i32
    %c0_i32_0 = arith.constant 0 : i32
    %c0_i32_1 = arith.constant 0 : i32
    return %arg0, %arg1, %c0_i32, %c0_i32_0 : i32, i32, i32, i32
  }
  func.func @transform_1(%arg0: i32, %arg1: i32) -> (i32, i32) {
    %c0_i32 = arith.constant 0 : i32
    %c0_i32_0 = arith.constant 0 : i32
    %c0_i32_1 = arith.constant 0 : i32
    return %c0_i32, %c0_i32_0 : i32, i32
  }
  func.func @transform_2(%arg0: i32, %arg1: i32) -> (i32, i32) {
    %c0_i32 = arith.constant 0 : i32
    %c0_i32_0 = arith.constant 0 : i32
    %c0_i32_1 = arith.constant 0 : i32
    return %c0_i32, %c0_i32_0 : i32, i32
  }
  func.func @transform_3(%arg0: i32, %arg1: i32) -> (i32, i32, i32, i32) {
    %c0_i32 = arith.constant 0 : i32
    %c0_i32_0 = arith.constant 0 : i32
    %c0_i32_1 = arith.constant 0 : i32
    return %arg0, %arg1, %c0_i32, %c0_i32_0 : i32, i32, i32, i32
  }
}

</mosaic_0001>

<bundles_post_ra>
// kernel: darknet_conv_block.3
= control target key start
LH: loop header
LB: loop body
LE: loop exit
PB: predicated region body
PF: predicated region fallthrough
CT: control target
= control target key end

     0   :  { %s743_s12 = smov 0   ;;  %s745_s13 = smov 0   ;;  %s906_s0 = inlined_call_operand.vmem [shape: bf16[2,16,16,128], index: 0, kind: input, shape index: {}]   ;;  %s907_s1 = inlined_call_operand.vmem [shape: f32[1,128], index: 1, kind: input, shape index: {}]   ;;  %s908_s2 = inlined_call_operand.vmem [shape: f32[1,128], index: 2, kind: input, shape index: {}]   ;;  %s909_s3 = inlined_call_operand.vmem [shape: f32[2,16,16,128], index: 3, kind: output, shape index: {}]  }
   0x1   :  { %s747_s14 = smov 0  }
   0x2 LB: > { %s25_s15 = sadd.s32 1, %s717_s13  ;;  %p585_p0 = scmp.ge.s32.totalorder %s721_s14, 1  ;;  %s721_s14 = sphi %s747_s14, %s13_s14   ;;  %s717_s13 = sphi %s745_s13, %s911_s13   ;;  %s713_s12 = sphi %s743_s12, %s910_s12  }
   0x3   : > { %p27_p1 = scmp.ge.s32.totalorder %s25_s15, 2  ;;  %p159_p2 = scmp.lt.s32.totalorder %s721_s14, 3 }
   0x5   : > { %s913_s15 = smov (%p27_p1, %s25_s15), 0  ;;  %p160_p3 = pnand %p585_p0, %p159_p2 }
   0x6   : > { %p194_p4 = scmp.lt.s32.totalorder (!%p160_p3), %s713_s12, 1 }
   0x7   : > { %163 = sbr.rel (%p160_p3) target bundleno = 70 (0x46), region = 32 }
   0xc   : > { %s915_s12 = smov (!%p194_p4, %s713_s12), 1  ;;  %v772_v0 = vld [vmem:[%s907_s1] ss:$0 sm:$0xff] }
   0xd   : > { %s594_s16 = sshll.u32 %s915_s12, 7  ;;  %v781_v9 = vld [vmem:[%s908_s2] ss:$0 sm:$0xff]  ;;  %s595_s24 = sshll.u32 %s915_s12, 8 }
   0xe   : > { %s767_s19 = scalar_lea.vmem %s906_s0, %s594_s16  ;;  %s803_s27 = scalar_lea.vmem %s909_s3, %s595_s24 }
   0xf   : > { %v597_v1 = vld [vmem:[%s767_s19] sm:$0xff]   ;;  %v660_v2 = vld [vmem:[%s767_s19 + $0x8] sm:$0xff]   ;;  %v661_v3 = vld [vmem:[%s767_s19 + $0x10] sm:$0xff]  }
  0x10   : > { %v598_v4 = vunpack.c.l.bf16 %v597_v1  ;;  %v599_v5 = vunpack.c.h.bf16 %v597_v1  ;;  %v602_v6 = vunpack.c.l.bf16 %v660_v2  ;;  %v603_v7 = vunpack.c.h.bf16 %v660_v2  ;;  %v662_v8 = vld [vmem:[%s767_s19 + $0x18] sm:$0xff]   ;;  %v663_v37 = vld [vmem:[%s767_s19 + $0x20] sm:$0xff]   ;;  %v664_v41 = vld [vmem:[%s767_s19 + $0x28] sm:$0xff]  }
  0x11   : > { %v606_v10 = vunpack.c.l.bf16 %v661_v3  ;;  %v607_v11 = vunpack.c.h.bf16 %v661_v3  ;;  %v610_v12 = vunpack.c.l.bf16 %v662_v8  ;;  %v611_v13 = vunpack.c.h.bf16 %v662_v8  ;;  %v665_v42 = vld [vmem:[%s767_s19 + $0x30] sm:$0xff]   ;;  %v666_v49 = vld [vmem:[%s767_s19 + $0x38] sm:$0xff]  }
  0x12   : > { %v287_v14 = vmul.f32 %v598_v4, %v772_v0  ;;  %v288_v15 = vmul.f32 %v599_v5, %v772_v0  ;;  %v289_v16 = vmul.f32 %v602_v6, %v772_v0  ;;  %v290_v17 = vmul.f32 %v603_v7, %v772_v0 }
  0x13   : > { %v291_v18 = vmul.f32 %v606_v10, %v772_v0  ;;  %v292_v19 = vmul.f32 %v607_v11, %v772_v0  ;;  %v293_v20 = vmul.f32 %v610_v12, %v772_v0  ;;  %v294_v21 = vmul.f32 %v611_v13, %v772_v0  ;;  %v667_v12 = vld [vmem:[%s767_s19 + $0x40] sm:$0xff]  }
  0x14   : > { %v325_v22 = vadd.f32 %v781_v9, %v287_v14  ;;  %v326_v23 = vadd.f32 %v781_v9, %v288_v15  ;;  %v327_v24 = vadd.f32 %v781_v9, %v289_v16  ;;  %v328_v25 = vadd.f32 %v781_v9, %v290_v17 }
  0x15   : > { %v329_v26 = vadd.f32 %v781_v9, %v291_v18  ;;  %v330_v27 = vadd.f32 %v781_v9, %v292_v19  ;;  %v331_v28 = vadd.f32 %v781_v9, %v293_v20  ;;  %v332_v29 = vadd.f32 %v781_v9, %v294_v21  ;;  %v668_v20 = vld [vmem:[%s767_s19 + $0x48] sm:$0xff]  }
  0x16   : > { %vm357_vm0 = vcmp.gt.f32.partialorder %v325_v22, 0.0  ;;  %v389_v30 = vmul.f32 0.25, %v325_v22  ;;  %vm358_vm1 = vcmp.gt.f32.partialorder %v326_v23, 0.0  ;;  %v390_v31 = vmul.f32 0.25, %v326_v23 }
  0x17   : > { %vm359_vm2 = vcmp.gt.f32.partialorder %v327_v24, 0.0  ;;  %v391_v32 = vmul.f32 0.25, %v327_v24  ;;  %vm360_vm3 = vcmp.gt.f32.partialorder %v328_v25, 0.0  ;;  %v392_v33 = vmul.f32 0.25, %v328_v25 }
  0x18   : > { %v421_v34 = vsel %vm357_vm0, %v325_v22, %v389_v30  ;;  %v422_v35 = vsel %vm358_vm1, %v326_v23, %v390_v31  ;;  %vm361_vm4 = vcmp.gt.f32.partialorder %v329_v26, 0.0  ;;  %v393_v36 = vmul.f32 0.25, %v329_v26 }
  0x19   : > { %453 = vst [vmem:[%s803_s27] sm:$0xff] %v421_v34  ;;  %454 = vst [vmem:[%s803_s27 + $0x8] sm:$0xff] %v422_v35  ;;  %v423_v38 = vsel %vm359_vm2, %v327_v24, %v391_v32  ;;  %v424_v39 = vsel %vm360_vm3, %v328_v25, %v392_v33  ;;  %vm362_vm5 = vcmp.gt.f32.partialorder %v330_v27, 0.0  ;;  %v394_v40 = vmul.f32 0.25, %v330_v27  ;;  %v669_v25 = vld [vmem:[%s767_s19 + $0x50] sm:$0xff]  }
  0x1a   : > { %455 = vst [vmem:[%s803_s27 + $0x10] sm:$0xff] %v423_v38  ;;  %456 = vst [vmem:[%s803_s27 + $0x18] sm:$0xff] %v424_v39  ;;  %v425_v43 = vsel %vm361_vm4, %v329_v26, %v393_v36  ;;  %vm363_vm6 = vcmp.gt.f32.partialorder %v331_v28, 0.0  ;;  %v395_v44 = vmul.f32 0.25, %v331_v28  ;;  %vm364_vm7 = vcmp.gt.f32.partialorder %v332_v29, 0.0 }
  0x1b   : > { %457 = vst [vmem:[%s803_s27 + $0x20] sm:$0xff] %v425_v43  ;;  %v426_v45 = vsel %vm362_vm5, %v330_v27, %v394_v40  ;;  %v396_v46 = vmul.f32 0.25, %v332_v29  ;;  %v614_v47 = vunpack.c.l.bf16 %v663_v37  ;;  %v615_v48 = vunpack.c.h.bf16 %v663_v37  ;;  %v670_v43 = vld [vmem:[%s767_s19 + $0x58] sm:$0xff]  }
  0x1c   : > { %458 = vst [vmem:[%s803_s27 + $0x28] sm:$0xff] %v426_v45  ;;  %v427_v50 = vsel %vm363_vm6, %v331_v28, %v395_v44  ;;  %v618_v51 = vunpack.c.l.bf16 %v664_v41  ;;  %v619_v52 = vunpack.c.h.bf16 %v664_v41  ;;  %v622_v53 = vunpack.c.l.bf16 %v665_v42 }
  0x1d   : > { %459 = vst [vmem:[%s803_s27 + $0x30] sm:$0xff] %v427_v50  ;;  %v428_v54 = vsel %vm364_vm7, %v332_v29, %v396_v46  ;;  %v295_v55 = vmul.f32 %v614_v47, %v772_v0  ;;  %v296_v56 = vmul.f32 %v615_v48, %v772_v0  ;;  %v623_v57 = vunpack.c.h.bf16 %v665_v42 }
  0x1e   : > { %460 = vst [vmem:[%s803_s27 + $0x38] sm:$0xff] %v428_v54  ;;  %v297_v58 = vmul.f32 %v618_v51, %v772_v0  ;;  %v298_v59 = vmul.f32 %v619_v52, %v772_v0  ;;  %v299_v60 = vmul.f32 %v622_v53, %v772_v0  ;;  %v626_v61 = vunpack.c.l.bf16 %v666_v49  ;;  %v671_v54 = vld [vmem:[%s767_s19 + $0x60] sm:$0xff]  }
  0x1f   : > { %v333_v62 = vadd.f32 %v781_v9, %v295_v55  ;;  %v334_v63 = vadd.f32 %v781_v9, %v296_v56  ;;  %v300_v1 = vmul.f32 %v623_v57, %v772_v0  ;;  %v627_v2 = vunpack.c.h.bf16 %v666_v49 }
  0x20   : > { %v335_v3 = vadd.f32 %v781_v9, %v297_v58  ;;  %v336_v4 = vadd.f32 %v781_v9, %v298_v59  ;;  %v337_v5 = vadd.f32 %v781_v9, %v299_v60  ;;  %v301_v6 = vmul.f32 %v626_v61, %v772_v0 }
  0x21   : > { %vm365_vm8 = vcmp.gt.f32.partialorder %v333_v62, 0.0  ;;  %v397_v7 = vmul.f32 0.25, %v333_v62  ;;  %vm366_vm9 = vcmp.gt.f32.partialorder %v334_v63, 0.0  ;;  %v398_v8 = vmul.f32 0.25, %v334_v63 }
  0x22   : > { %vm367_vm10 = vcmp.gt.f32.partialorder %v335_v3, 0.0  ;;  %v399_v10 = vmul.f32 0.25, %v335_v3  ;;  %vm368_vm11 = vcmp.gt.f32.partialorder %v336_v4, 0.0  ;;  %v400_v11 = vmul.f32 0.25, %v336_v4 }
  0x23   : > { %v429_v13 = vsel %vm365_vm8, %v333_v62, %v397_v7  ;;  %v430_v14 = vsel %vm366_vm9, %v334_v63, %v398_v8  ;;  %vm369_vm12 = vcmp.gt.f32.partialorder %v337_v5, 0.0  ;;  %v401_v15 = vmul.f32 0.25, %v337_v5 }
  0x24   : > { %461 = vst [vmem:[%s803_s27 + $0x40] sm:$0xff] %v429_v13  ;;  %462 = vst [vmem:[%s803_s27 + $0x48] sm:$0xff] %v430_v14  ;;  %v431_v16 = vsel %vm367_vm10, %v335_v3, %v399_v10  ;;  %v432_v17 = vsel %vm368_vm11, %v336_v4, %v400_v11  ;;  %v338_v18 = vadd.f32 %v781_v9, %v300_v1  ;;  %v630_v23 = vunpack.c.l.bf16 %v667_v12  ;;  %v672_v1 = vld [vmem:[%s767_s19 + $0x68] sm:$0xff]  }
  0x25   : > { %v339_v19 = vadd.f32 %v781_v9, %v301_v6  ;;  %463 = vst [vmem:[%s803_s27 + $0x50] sm:$0xff] %v431_v16  ;;  %464 = vst [vmem:[%s803_s27 + $0x58] sm:$0xff] %v432_v17  ;;  %v433_v21 = vsel %vm369_vm12, %v337_v5, %v401_v15  ;;  %v302_v22 = vmul.f32 %v627_v2, %v772_v0  ;;  %v631_v24 = vunpack.c.h.bf16 %v667_v12  ;;  %v673_v2 = vld [vmem:[%s767_s19 + $0x70] sm:$0xff]  }
  0x26   : > { %465 = vst [vmem:[%s803_s27 + $0x60] sm:$0xff] %v433_v21  ;;  %vm370_vm13 = vcmp.gt.f32.partialorder %v338_v18, 0.0  ;;  %v402_v26 = vmul.f32 0.25, %v338_v18  ;;  %v303_v29 = vmul.f32 %v630_v23, %v772_v0  ;;  %v634_v31 = vunpack.c.l.bf16 %v668_v20  ;;  %v674_v21 = vld [vmem:[%s767_s19 + $0x78] sm:$0xff]  }
  0x27   : > { %vm371_vm14 = vcmp.gt.f32.partialorder %v339_v19, 0.0  ;;  %v403_v27 = vmul.f32 0.25, %v339_v19  ;;  %v340_v28 = vadd.f32 %v781_v9, %v302_v22  ;;  %v304_v30 = vmul.f32 %v631_v24, %v772_v0 }
  0x28   : > { %v434_v32 = vsel %vm370_vm13, %v338_v18, %v402_v26  ;;  %v635_v34 = vunpack.c.h.bf16 %v668_v20  ;;  %v638_v35 = vunpack.c.l.bf16 %v669_v25  ;;  %v341_v37 = vadd.f32 %v781_v9, %v303_v29 }
  0x29   : > { %v435_v33 = vsel %vm371_vm14, %v339_v19, %v403_v27  ;;  %466 = vst [vmem:[%s803_s27 + $0x68] sm:$0xff] %v434_v32  ;;  %vm372_vm15 = vcmp.gt.f32.partialorder %v340_v28, 0.0  ;;  %v404_v36 = vmul.f32 0.25, %v340_v28  ;;  %v342_v38 = vadd.f32 %v781_v9, %v304_v30 }
  0x2a   : > { %467 = vst [vmem:[%s803_s27 + $0x70] sm:$0xff] %v435_v33  ;;  %v305_v39 = vmul.f32 %v634_v31, %v772_v0  ;;  %v306_v40 = vmul.f32 %v635_v34, %v772_v0  ;;  %v307_v41 = vmul.f32 %v638_v35, %v772_v0  ;;  %v639_v42 = vunpack.c.h.bf16 %v669_v25 }
  0x2b   : > { %v436_v44 = vsel %vm372_vm15, %v340_v28, %v404_v36  ;;  %vm373_vm0 = vcmp.gt.f32.partialorder %v341_v37, 0.0  ;;  %v405_v45 = vmul.f32 0.25, %v341_v37  ;;  %vm374_vm1 = vcmp.gt.f32.partialorder %v342_v38, 0.0 }
  0x2c   : > { %468 = vst [vmem:[%s803_s27 + $0x78] sm:$0xff] %v436_v44  ;;  %v406_v46 = vmul.f32 0.25, %v342_v38  ;;  %v343_v47 = vadd.f32 %v781_v9, %v305_v39  ;;  %v344_v48 = vadd.f32 %v781_v9, %v306_v40  ;;  %v345_v49 = vadd.f32 %v781_v9, %v307_v41 }
  0x2d   : > { %v437_v50 = vsel %vm373_vm0, %v341_v37, %v405_v45  ;;  %v308_v51 = vmul.f32 %v639_v42, %v772_v0  ;;  %v642_v52 = vunpack.c.l.bf16 %v670_v43  ;;  %v643_v53 = vunpack.c.h.bf16 %v670_v43 }
  0x2e   : > { %469 = vst [vmem:[%s803_s27 + $0x80] sm:$0xff] %v437_v50  ;;  %v438_v55 = vsel %vm374_vm1, %v342_v38, %v406_v46  ;;  %vm375_vm2 = vcmp.gt.f32.partialorder %v343_v47, 0.0  ;;  %v407_v56 = vmul.f32 0.25, %v343_v47  ;;  %vm376_vm3 = vcmp.gt.f32.partialorder %v344_v48, 0.0 }
  0x2f   : > { %470 = vst [vmem:[%s803_s27 + $0x88] sm:$0xff] %v438_v55  ;;  %v408_v57 = vmul.f32 0.25, %v344_v48  ;;  %vm377_vm4 = vcmp.gt.f32.partialorder %v345_v49, 0.0  ;;  %v409_v58 = vmul.f32 0.25, %v345_v49  ;;  %v346_v59 = vadd.f32 %v781_v9, %v308_v51 }
  0x30   : > { %v439_v60 = vsel %vm375_vm2, %v343_v47, %v407_v56  ;;  %v309_v61 = vmul.f32 %v642_v52, %v772_v0  ;;  %v310_v62 = vmul.f32 %v643_v53, %v772_v0  ;;  %v646_v63 = vunpack.c.l.bf16 %v671_v54 }
  0x31   : > { %471 = vst [vmem:[%s803_s27 + $0x90] sm:$0xff] %v439_v60  ;;  %v440_v3 = vsel %vm376_vm3, %v344_v48, %v408_v57  ;;  %v441_v4 = vsel %vm377_vm4, %v345_v49, %v409_v58  ;;  %vm378_vm5 = vcmp.gt.f32.partialorder %v346_v59, 0.0  ;;  %v410_v5 = vmul.f32 0.25, %v346_v59 }
  0x32   : > { %472 = vst [vmem:[%s803_s27 + $0x98] sm:$0xff] %v440_v3  ;;  %473 = vst [vmem:[%s803_s27 + $0xa0] sm:$0xff] %v441_v4  ;;  %v347_v6 = vadd.f32 %v781_v9, %v309_v61  ;;  %v348_v7 = vadd.f32 %v781_v9, %v310_v62  ;;  %v311_v8 = vmul.f32 %v646_v63, %v772_v0  ;;  %v647_v10 = vunpack.c.h.bf16 %v671_v54 }
  0x33   : > { %v442_v11 = vsel %vm378_vm5, %v346_v59, %v410_v5  ;;  %v650_v12 = vunpack.c.l.bf16 %v672_v1  ;;  %v651_v13 = vunpack.c.h.bf16 %v672_v1  ;;  %v654_v14 = vunpack.c.l.bf16 %v673_v2 }
  0x34   : > { %474 = vst [vmem:[%s803_s27 + $0xa8] sm:$0xff] %v442_v11  ;;  %vm379_vm6 = vcmp.gt.f32.partialorder %v347_v6, 0.0  ;;  %v411_v15 = vmul.f32 0.25, %v347_v6  ;;  %vm380_vm7 = vcmp.gt.f32.partialorder %v348_v7, 0.0  ;;  %v412_v16 = vmul.f32 0.25, %v348_v7 }
  0x35   : > { %v349_v17 = vadd.f32 %v781_v9, %v311_v8  ;;  %v312_v18 = vmul.f32 %v647_v10, %v772_v0  ;;  %v313_v19 = vmul.f32 %v650_v12, %v772_v0  ;;  %v314_v20 = vmul.f32 %v651_v13, %v772_v0 }
  0x36   : > { %v443_v22 = vsel %vm379_vm6, %v347_v6, %v411_v15  ;;  %v444_v23 = vsel %vm380_vm7, %v348_v7, %v412_v16  ;;  %v315_v24 = vmul.f32 %v654_v14, %v772_v0  ;;  %v655_v25 = vunpack.c.h.bf16 %v673_v2 }
  0x37   : > { %475 = vst [vmem:[%s803_s27 + $0xb0] sm:$0xff] %v443_v22  ;;  %476 = vst [vmem:[%s803_s27 + $0xb8] sm:$0xff] %v444_v23  ;;  %vm381_vm8 = vcmp.gt.f32.partialorder %v349_v17, 0.0  ;;  %v413_v26 = vmul.f32 0.25, %v349_v17  ;;  %v350_v27 = vadd.f32 %v781_v9, %v312_v18  ;;  %v351_v28 = vadd.f32 %v781_v9, %v313_v19 }
  0x38   : > { %v352_v29 = vadd.f32 %v781_v9, %v314_v20  ;;  %v353_v30 = vadd.f32 %v781_v9, %v315_v24  ;;  %v316_v31 = vmul.f32 %v655_v25, %v772_v0  ;;  %v658_v32 = vunpack.c.l.bf16 %v674_v21 }
  0x39   : > { %v445_v33 = vsel %vm381_vm8, %v349_v17, %v413_v26  ;;  %vm382_vm9 = vcmp.gt.f32.partialorder %v350_v27, 0.0  ;;  %v414_v34 = vmul.f32 0.25, %v350_v27  ;;  %vm383_vm10 = vcmp.gt.f32.partialorder %v351_v28, 0.0 }
  0x3a   : > { %477 = vst [vmem:[%s803_s27 + $0xc0] sm:$0xff] %v445_v33  ;;  %v415_v35 = vmul.f32 0.25, %v351_v28  ;;  %vm384_vm11 = vcmp.gt.f32.partialorder %v352_v29, 0.0  ;;  %v416_v36 = vmul.f32 0.25, %v352_v29  ;;  %vm385_vm12 = vcmp.gt.f32.partialorder %v353_v30, 0.0 }
  0x3b   : > { %v446_v37 = vsel %vm382_vm9, %v350_v27, %v414_v34  ;;  %v417_v38 = vmul.f32 0.25, %v353_v30  ;;  %v354_v39 = vadd.f32 %v781_v9, %v316_v31  ;;  %v317_v40 = vmul.f32 %v658_v32, %v772_v0 }
  0x3c   : > { %478 = vst [vmem:[%s803_s27 + $0xc8] sm:$0xff] %v446_v37  ;;  %v447_v41 = vsel %vm383_vm10, %v351_v28, %v415_v35  ;;  %v448_v42 = vsel %vm384_vm11, %v352_v29, %v416_v36  ;;  %v659_v43 = vunpack.c.h.bf16 %v674_v21 }
  0x3d   : > { %479 = vst [vmem:[%s803_s27 + $0xd0] sm:$0xff] %v447_v41  ;;  %480 = vst [vmem:[%s803_s27 + $0xd8] sm:$0xff] %v448_v42  ;;  %v449_v44 = vsel %vm385_vm12, %v353_v30, %v417_v38  ;;  %vm386_vm13 = vcmp.gt.f32.partialorder %v354_v39, 0.0  ;;  %v418_v45 = vmul.f32 0.25, %v354_v39  ;;  %v355_v46 = vadd.f32 %v781_v9, %v317_v40 }
  0x3e   : > { %481 = vst [vmem:[%s803_s27 + $0xe0] sm:$0xff] %v449_v44  ;;  %v318_v47 = vmul.f32 %v659_v43, %v772_v0 }
  0x3f   : > { %v450_v48 = vsel %vm386_vm13, %v354_v39, %v418_v45  ;;  %vm387_vm14 = vcmp.gt.f32.partialorder %v355_v46, 0.0  ;;  %v419_v49 = vmul.f32 0.25, %v355_v46 }
  0x40   : > { %482 = vst [vmem:[%s803_s27 + $0xe8] sm:$0xff] %v450_v48  ;;  %v356_v50 = vadd.f32 %v781_v9, %v318_v47 }
  0x41   : > { %v451_v51 = vsel %vm387_vm14, %v355_v46, %v419_v49 }
  0x42   : > { %483 = vst [vmem:[%s803_s27 + $0xf0] sm:$0xff] %v451_v51  ;;  %vm388_vm15 = vcmp.gt.f32.partialorder %v356_v50, 0.0  ;;  %v420_v52 = vmul.f32 0.25, %v356_v50 }
  0x44   : > { %v452_v53 = vsel %vm388_vm15, %v356_v50, %v420_v52 }
  0x45   : > { %484 = vst [vmem:[%s803_s27 + $0xf8] sm:$0xff] %v452_v53 }
  0x46 PF: > { %s13_s14 = sadd.s32 1, %s721_s14   ;;  %s910_s12 = smov %s717_s13 }
  0x47   : > { %p10_p5 = scmp.ge.s32.totalorder %s13_s14, 4   ;;  %s911_s13 = smov %s913_s15 }
  0x49   :  { %12 = sbr.rel (!%p10_p5) target bundleno = 2 (0x2), region = 62 }

// kernel: darknet_conv_block.2
= control target key start
LH: loop header
LB: loop body
LE: loop exit
PB: predicated region body
PF: predicated region fallthrough
CT: control target
= control target key end

     0   :  { %s4507_s18 = smov 0   ;;  %s4509_s19 = smov 0   ;;  %s6038_s0 = inlined_call_operand.vmem [shape: bf16[2,32,18,4], index: 0, kind: input, shape index: {}, may-alias: {0,1}]   ;;  %s6039_s1 = inlined_call_operand.vmem [shape: bf16[2,32,18,4], index: 1, kind: input, shape index: {}, may-alias: {0,1}]   ;;  %s6040_s2 = inlined_call_operand.vmem [shape: bf16[9,4,128], index: 2, kind: input, shape index: {}]   ;;  %s6041_s3 = inlined_call_operand.vmem [shape: bf16[2,16,16,128], index: 3, kind: output, shape index: {0}]   ;;  %s6042_s4 = inlined_call_operand.vmem [shape: f32[2,1,1,128], index: 4, kind: output, shape index: {1}]   ;;  %s6043_s5 = inlined_call_operand.vmem [shape: f32[2,1,1,128], index: 5, kind: output, shape index: {2}]  }
   0x1   :  { %s4511_s20 = smov 0  }
   0x2 LB: > { %s28_s21 = sadd.s32 1, %s4471_s19  ;;  %p3530_p0 = scmp.ge.s32.totalorder %s4475_s20, 1  ;;  %s4475_s20 = sphi %s4511_s20, %s16_s20   ;;  %s4471_s19 = sphi %s4509_s19, %s6170_s19   ;;  %s4467_s18 = sphi %s4507_s18, %s6169_s18  }
   0x3   : > { %p30_p1 = scmp.ge.s32.totalorder %s28_s21, 2  ;;  %p244_p2 = scmp.lt.s32.totalorder %s4475_s20, 3 }
   0x5   : > { %s6172_s21 = smov (%p30_p1, %s28_s21), 0  ;;  %p245_p3 = pnand %p3530_p0, %p244_p2 }
   0x7   : > { %248 = sbr.rel (%p245_p3) target bundleno = 530 (0x212), region = 32 }
   0xc   : > { %v3535_v0 = vld [vmem:[%s6040_s2 + $0x6] sm:$0x3]  ;;  %vm542_vm0 = vcmask 1041408   ;;  %p307_p4 = scmp.lt.s32.totalorder %s4467_s18, 1  ;;  %v410_v2 = vld [vmem:[%s6040_s2] sm:$0x3] }
   0xd   : > { %4385 = vmatprep.subr.msk.bf16.mxu1 %vm542_vm0, %v3535_v0  ;;  %4384 = vmatprep.subr.msk.bf16.mxu0 %vm542_vm0, %v3535_v0  ;;  %v544_v1 = vsel %vm542_vm0, %v3535_v0, 0  ;;  %v3585_v3 = vld [vmem:[%s6040_s2 + $0xc] sm:$0x3]  ;;  %vm2240_vm1 = vcmask 1042432   ;;  %vm2241_vm2 = vcmask 1046532   ;;  %vm493_vm3 = vcmask 31744  }
   0xe   : > { %4383 = vmatpush3.bf16.msra.mxu1 %v544_v1  ;;  %4077 = vmatpush3.bf16.msra.mxu0 %v544_v1  ;;  %s6174_s18 = smov (!%p307_p4, %s4467_s18), 1  ;;  %vm4559_vm4 = vmor %vm2240_vm1, %vm2241_vm2  ;;  %v890_v23 = vsel %vm542_vm0, %v3585_v3, 0  ;;  %v4607_v26 = vld [vmem:[%s6040_s2 + $0x8] sm:$0x3]  ;;  %v716_v28 = vsel %vm542_vm0, %v410_v2, 0 }
   0xf   : > { %4386 = vmatprep.subr.msk.bf16.mxu1 %vm542_vm0, %v410_v2  ;;  %4387 = vmatprep.subr.msk.bf16.mxu0 %vm542_vm0, %v3585_v3  ;;  %s4394_s28 = smul.u32 384, %s6174_s18  ;;  %v4628_v32 = vld [vmem:[%s6040_s2 + $0x2] sm:$0x3]  ;;  %vm1087_vm5 = vsmask.f32 3328  ;;  %s3795_s27 = sshll.u32 %s6174_s18, 7 }
  0x10   : > { %vm1088_vm6 = vsmask.f32 7440  ;;  %s5939_s30 = scalar_lea.vmem %s6041_s3, %s3795_s27  ;;  %s348_s8 = scalar_lea.vmem %s6042_s4, %s6174_s18 }
  0x11   : > { %s4547_s6 = scalar_lea.vmem %s6038_s0, %s4394_s28  ;;  %vm4683_vm7 = vmor %vm1087_vm5, %vm1088_vm6  ;;  %s3794_s11 = sadd.s32 192, %s4394_s28 }
  0x12   : > { %v359_v4 = vld [vmem:[%s4547_s6 + $0xc] sm:$0xf]  ;;  %v4551_v5 = vld [vmem:[%s4547_s6 + $0x10] sm:$0xf]  ;;  %v4582_v16 = vld [vmem:[%s4547_s6 + $0x18] sm:$0xf]  ;;  %s4749_s14 = scalar_lea.vmem %s6039_s1, %s3794_s11  ;;  %s354_s11 = scalar_lea.vmem %s6043_s5, %s6174_s18 }
  0x13   : > { %v4554_v6 = vld [vmem:[%s4547_s6 + $0x6c] sm:$0xf]  ;;  %v4557_v7 = vcombine.low %v359_v4, %v4551_v5  ;;  %v4564_v9 = vld [vmem:[%s4547_s6 + $0x70] sm:$0xf]  ;;  %v3674_v10 = vrot.slane %v359_v4, 9  ;;  %v6044_v11 = vrot.slane %v4551_v5, 5 }
  0x14   : > { %v4569_v12 = vcombine.low %v4554_v6, %v4564_v9  ;;  %v1115_v13 = vshrl.u32 %v359_v4, 16  ;;  %v1118_v14 = vshll.u32 %v359_v4, 16  ;;  %6068 = vst [vmem:[#allocation2_spill] sm:$0xff] %v4582_v16  ;;  %v4585_v17 = vld [vmem:[%s4547_s6 + $0x1c] sm:$0xf]  ;;  %v1124_v39 = vshll.u32 %v4551_v5, 16 }
  0x15   : > { %4078 = vmatprep.mubr.msk.bf16.mxu0 %vm493_vm3, %v4557_v7  ;;  %v4577_v15 = vsel %vm4559_vm4, %v3674_v10, %v6044_v11  ;;  %6069 = vst [vmem:[#allocation3_spill] sm:$0xff] %v4585_v17  ;;  %v4588_v18 = vld [vmem:[%s4547_s6 + $0x78] sm:$0xf]  ;;  %v4591_v19 = vld [vmem:[%s4547_s6 + $0x7c] sm:$0xf]  ;;  %v4595_v22 = vcombine.low %v4582_v16, %v4585_v17  ;;  %v1128_v51 = vshrl.u32 %v4551_v5, 16 }
  0x16   : > { %4094 = vmatprep.mubr.msk.bf16.mxu1 %vm493_vm3, %v4569_v12  ;;  %v1117_v20 = vrot.slane %v1115_v13, 4  ;;  %v1120_v21 = vrot.slane %v1118_v14, 5  ;;  %v4599_v24 = vld [vmem:[%s4547_s6 + $0x24] sm:$0xf]  ;;  %v4602_v25 = vld [vmem:[%s4547_s6 + $0x28] sm:$0xf]  ;;  %v4613_v27 = vcombine.low %v4588_v18, %v4591_v19 }
  0x17   : > { %6070 = vst [vmem:[#allocation4_spill] sm:$0xff] %v4599_v24  ;;  %6071 = vst [vmem:[#allocation5_spill] sm:$0xff] %v4602_v25  ;;  %4079 = vmatmul.mubr.msk.bf16.vlgmr.msra.gmra.mxu0 %vm493_vm3, %v4595_v22  ;;  %v4617_v29 = vld [vmem:[%s4547_s6 + $0x84] sm:$0xf]  ;;  %v4620_v30 = vld [vmem:[%s4547_s6 + $0x88] sm:$0xf]  ;;  %v4634_v34 = vcombine.low %v4599_v24, %v4602_v25 }
  0x18   : > { %4145 = vmatpush3.bf16.msra.mxu0 %v890_v23  ;;  %v4623_v31 = vld [vmem:[%s4547_s6 + $0x30] sm:$0xf]  ;;  %v1121_v33 = vor.u32 %v1120_v21, %v1117_v20  ;;  %4095 = vmatmul.mubr.msk.bf16.vlgmr.msra.gmra.mxu1 %vm493_vm3, %v4613_v27  ;;  %v4637_v35 = vld [vmem:[%s4547_s6 + $0x34] sm:$0xf]  ;;  %v4643_v36 = vcombine.low %v4617_v29, %v4620_v30  ;;  %v4659_v41 = vld [vmem:[%s4547_s6 + $0x3c] sm:$0xf] }
  0x19   : > { %6072 = vst [vmem:[#allocation6_spill] sm:$0xff] %v4623_v31  ;;  %6073 = vst [vmem:[#allocation7_spill] sm:$0xff] %v4637_v35  ;;  %4389 = vmatprep.subr.msk.bf16.mxu0 %vm542_vm0, %v4607_v26  ;;  %4111 = vmatpush3.bf16.msra.mxu1 %v716_v28  ;;  %v4646_v37 = vld [vmem:[%s4547_s6 + $0x90] sm:$0xf]  ;;  %v4649_v38 = vld [vmem:[%s4547_s6 + $0x94] sm:$0xf]  ;;  %v4656_v40 = vcombine.low %v4623_v31, %v4637_v35 }
  0x1a   : > { %4082 = vmatprep.mubr.msk.bf16.mxu0 %vm493_vm3, %v4634_v34  ;;  %6074 = vst [vmem:[#allocation8_spill] sm:$0xff] %v4659_v41  ;;  %v4662_v42 = vld [vmem:[%s4547_s6 + $0x40] sm:$0xf]  ;;  %4388 = vmatprep.subr.msk.bf16.mxu1 %vm542_vm0, %v4628_v32  ;;  %v4669_v43 = vld [vmem:[%s4547_s6 + $0x9c] sm:$0xf]  ;;  %v1122_v44 = vrot.slane %v1121_v33, 4  ;;  %v4673_v45 = vcombine.low %v4646_v37, %v4649_v38 }
  0x1b   : > { %6075 = vst [vmem:[#allocation9_spill] sm:$0xff] %v4662_v42  ;;  %4098 = vmatprep.mubr.msk.bf16.mxu1 %vm493_vm3, %v4643_v36  ;;  %v4676_v46 = vld [vmem:[%s4547_s6 + $0xa0] sm:$0xf]  ;;  %v4680_v47 = vcombine.low %v4659_v41, %v4662_v42  ;;  %v1126_v49 = vrot.slane %v1124_v39, 5  ;;  %v4697_v52 = vld [vmem:[%s4547_s6 + $0x48] sm:$0xf] }
  0x1c   : > { %v4691_v50 = vcombine.low %v4669_v43, %v4676_v46  ;;  %v4700_v53 = vld [vmem:[%s4547_s6 + $0x4c] sm:$0xf]  ;;  %v4705_v54 = vld [vmem:[%s4547_s6 + $0xa8] sm:$0xf]  ;;  %v4715_v57 = vld [vmem:[%s4547_s6 + $0x54] sm:$0xf] }
  0x1d   : > { %v1127_v55 = vsel %vm4683_vm7, %v1122_v44, %v1126_v49  ;;  %v4712_v56 = vld [vmem:[%s4547_s6 + $0xac] sm:$0xf]  ;;  %6078 = vst [vmem:[#allocation10_spill] sm:$0xff] %v4715_v57  ;;  %v4718_v58 = vld [vmem:[%s4547_s6 + $0x58] sm:$0xf]  ;;  %v4722_v59 = vcombine.low %v4697_v52, %v4700_v53  ;;  %v1130_v61 = vrot.slane %v1128_v51, 4 }
  0x1e   : > { %v4725_v60 = vld [vmem:[%s4547_s6 + $0xb4] sm:$0xf]  ;;  %v4729_v62 = vcombine.low %v4715_v57, %v4718_v58  ;;  %v4732_v63 = vld [vmem:[%s4547_s6 + $0xb8] sm:$0xf]  ;;  %v4738_v0 = vcombine.low %v4705_v54, %v4712_v56  ;;  %v4754_v3 = vld [vmem:[%s4547_s6 + $0x60] sm:$0xf] }
  0x1f   : > { %4083 = vmatmul.mubr.msk.bf16.gmra.mxu0 %vm493_vm3, %v4656_v40  ;;  %6079 = vst [vmem:[#allocation11_spill] sm:$0xff] %v4732_v63  ;;  %v4742_v1 = vcombine.low %v4725_v60, %v4732_v63  ;;  %v1131_v2 = vor.u32 %v1130_v61, %v1126_v49  ;;  %v4757_v4 = vld [vmem:[%s4547_s6 + $0x64] sm:$0xf]  ;;  %v4764_v10 = vld [vmem:[%s4749_s14] sm:$0xf]  ;;  %v1310_v11 = vshll.u32 %v4554_v6, 16 }
  0x20   : > { %4086 = vmatprep.mubr.msk.bf16.mxu0 %vm493_vm3, %v4680_v47  ;;  %4099 = vmatmul.mubr.msk.bf16.gmra.mxu1 %vm493_vm3, %v4673_v45  ;;  %6080 = vst [vmem:[#allocation12_spill] sm:$0xff] %v4764_v10  ;;  %v4767_v13 = vld [vmem:[%s4749_s14 + $0x4] sm:$0xf]  ;;  %v3543_v14 = vcombine.low %v4754_v3, %v4757_v4  ;;  %v4772_v20 = vld [vmem:[%s4547_s6] sm:$0xf] }
  0x21   : > { %4102 = vmatprep.mubr.msk.bf16.mxu1 %vm493_vm3, %v4691_v50  ;;  %6081 = vst [vmem:[#allocation13_spill] sm:$0xff] %v4767_v13  ;;  %v4775_v21 = vld [vmem:[%s4547_s6 + $0x4] sm:$0xf]  ;;  %v4778_v23 = vld [vmem:[%s4547_s6 + $0x14] sm:$0x1]  ;;  %v1132_v28 = vrot.slane %v1131_v2, 4  ;;  %v4783_v39 = vcombine.low %v4764_v10, %v4767_v13 }
  0x22   : > { %v1134_v33 = vshll.u32 %v4778_v23, 16  ;;  %v3568_v44 = vcombine.low %v4772_v20, %v4775_v21  ;;  %v1799_v2 = vsel %vm542_vm0, %v4607_v26, 0  ;;  %v3672_v13 = vld [vmem:[%s6040_s2 + $0x4] sm:$0x3]  ;;  %v4815_v26 = vld [vmem:[%s6040_s2 + $0xe] sm:$0x3] }
  0x24   : > { %v1136_v49 = vrot.slane %v1134_v33, 5  ;;  %v1307_v33 = vshrl.u32 %v4554_v6, 16 }
  0x26   : > { %v1137_v51 = vsel %vm4683_vm7, %v1132_v28, %v1136_v49  ;;  %v1316_v28 = vshll.u32 %v4564_v9, 16  ;;  %v1320_v49 = vshrl.u32 %v4564_v9, 16 }
  0x27   : > { %4087 = vmatmul.mubr.msk.bf16.gmra.mxu0 %vm493_vm3, %v4722_v59  ;;  %v4794_v61 = vcombine.low %v1127_v55, %v1137_v51  ;;  %v1571_v55 = vsel %vm542_vm0, %v4628_v32, 0  ;;  %v1312_v51 = vrot.slane %v1310_v11, 5 }
  0x28   : > { %4090 = vmatprep.mubr.msk.bf16.mxu0 %vm493_vm3, %v4729_v62  ;;  %4103 = vmatmul.mubr.msk.bf16.gmra.mxu1 %vm493_vm3, %v4738_v0  ;;  %v1318_v32 = vrot.slane %v1316_v28, 5 }
  0x29   : > { %4106 = vmatprep.mubr.msk.bf16.mxu1 %vm493_vm3, %v4742_v1 }
  0x2f   : > { %4091 = vmatmul.mubr.msk.bf16.gmra.mxu0 %vm493_vm3, %v3543_v14 }
  0x30   : > { %4146 = vmatprep.mubr.msk.bf16.mxu0 %vm493_vm3, %v4595_v22  ;;  %4107 = vmatmul.mubr.msk.bf16.gmra.mxu1 %vm493_vm3, %v4783_v39 }
  0x31   : > { %4112 = vmatprep.mubr.msk.bf16.mxu1 %vm493_vm3, %v3568_v44  ;;  %v1309_v44 = vrot.slane %v1307_v33, 4 }
  0x33   : > { %v1313_v10 = vor.u32 %v1312_v51, %v1309_v44  ;;  %v1152_v44 = vshrl.u32 %v4585_v17, 16  ;;  %v1091_v51 = vshrl.u32 %v4772_v20, 16 }
  0x35   : > { %v1314_v11 = vrot.slane %v1313_v10, 4  ;;  %v1148_v10 = vshll.u32 %v4585_v17, 16 }
  0x37   : > { %4147 = vmatmul.mubr.msk.bf16.vlgmr.msra.gmra.mxu0 %vm493_vm3, %v4634_v34  ;;  %v1319_v28 = vsel %vm4683_vm7, %v1314_v11, %v1318_v32  ;;  %v2255_v11 = vrot.slane %v4778_v23, 5  ;;  %v1176_v23 = vshrl.u32 %v4602_v25, 16 }
  0x38   : > { %4213 = vmatpush3.bf16.msra.mxu0 %v1799_v2  ;;  %4150 = vmatprep.mubr.msk.bf16.mxu0 %vm493_vm3, %v4656_v40  ;;  %v1322_v2 = vrot.slane %v1320_v49, 4 }
  0x39   : > { %4113 = vmatmul.mubr.msk.bf16.vlgmr.msra.gmra.mxu1 %vm493_vm3, %v4557_v7  ;;  %4391 = vmatprep.subr.msk.bf16.mxu0 %vm542_vm0, %v3672_v13  ;;  %v4829_v7 = vld [vmem:[%s4547_s6 + $0x74] sm:$0x1] }
  0x3a   : > { %4179 = vmatpush3.bf16.msra.mxu1 %v1571_v55  ;;  %4116 = vmatprep.mubr.msk.bf16.mxu1 %vm493_vm3, %v4595_v22  ;;  %v1323_v63 = vor.u32 %v1322_v2, %v1318_v32  ;;  %v1326_v33 = vshll.u32 %v4829_v7, 16  ;;  %v1094_v32 = vshll.u32 %v4772_v20, 16  ;;  %v1104_v2 = vshrl.u32 %v4775_v21, 16 }
  0x3b   : > { %4390 = vmatprep.subr.msk.bf16.mxu1 %vm542_vm0, %v4815_v26 }
  0x3c   : > { %v1324_v22 = vrot.slane %v1323_v63, 4  ;;  %v1328_v49 = vrot.slane %v1326_v33, 5  ;;  %v1142_v63 = vshll.u32 %v4582_v16, 16  ;;  %v4877_v33 = vsel %vm542_vm0, %v3672_v13, 0 }
  0x3d   : > { %v1096_v17 = vrot.slane %v1094_v32, 5  ;;  %v1106_v13 = vrot.slane %v1104_v2, 4  ;;  %v1187_v2 = vshrl.u32 %v4623_v31, 16 }
  0x3e   : > { %v1329_v55 = vsel %vm4683_vm7, %v1324_v22, %v1328_v49  ;;  %v4880_v49 = vrot.slane %v1148_v10, 5 }
  0x3f   : > { %4151 = vmatmul.mubr.msk.bf16.gmra.mxu0 %vm493_vm3, %v4680_v47 }
  0x40   : > { %4154 = vmatprep.mubr.msk.bf16.mxu0 %vm493_vm3, %v4722_v59 }
  0x41   : > { %4117 = vmatmul.mubr.msk.bf16.gmra.mxu1 %vm493_vm3, %v4634_v34  ;;  %v4843_v34 = vcombine.low %v1319_v28, %v1329_v55  ;;  %v1154_v55 = vrot.slane %v1152_v44, 4  ;;  %v2308_v44 = vrot.slane %v4564_v9, 5 }
  0x42   : > { %4120 = vmatprep.mubr.msk.bf16.mxu1 %vm493_vm3, %v4656_v40  ;;  %v1139_v40 = vshrl.u32 %v4582_v16, 16  ;;  %v1093_v16 = vrot.slane %v1091_v51, 4 }
  0x43   : > { %v1155_v32 = vor.u32 %v1154_v55, %v4880_v49  ;;  %v4919_v55 = vld [vmem:[%s4547_s6 + $0x20] sm:$0x1] }
  0x47   : > { %4155 = vmatmul.mubr.msk.bf16.gmra.mxu0 %vm493_vm3, %v4729_v62 }
  0x48   : > { %4158 = vmatprep.mubr.msk.bf16.mxu0 %vm493_vm3, %v3543_v14 }
  0x49   : > { %4121 = vmatmul.mubr.msk.bf16.gmra.mxu1 %vm493_vm3, %v4680_v47  ;;  %v1141_v47 = vrot.slane %v1139_v40, 4  ;;  %v1163_v40 = vshrl.u32 %v4599_v24, 16 }
  0x4a   : > { %4124 = vmatprep.mubr.msk.bf16.mxu1 %vm493_vm3, %v4722_v59  ;;  %v1144_v59 = vrot.slane %v1142_v63, 5  ;;  %v358_v63 = vld [vmem:[%s4547_s6 + $0x8] sm:$0x1] }
  0x4b   : > { %v2248_v22 = vrot.slane %v358_v63, 5 }
  0x4c   : > { %v1145_v28 = vor.u32 %v1144_v59, %v1141_v47  ;;  %v1172_v59 = vshll.u32 %v4602_v25, 16 }
  0x4e   : > { %v4899_v51 = vrot.slane %v1145_v28, 4  ;;  %v1200_v28 = vshrl.u32 %v4637_v35, 16 }
  0x4f   : > { %4159 = vmatmul.mubr.msk.bf16.gmra.mxu0 %vm493_vm3, %v4569_v12 }
  0x50   : > { %4162 = vmatprep.mubr.msk.bf16.mxu0 %vm493_vm3, %v4613_v27 }
  0x51   : > { %4125 = vmatmul.mubr.msk.bf16.gmra.mxu1 %vm493_vm3, %v4729_v62  ;;  %v6082_v62 = vrot.slane %v4551_v5, 5  ;;  %v1100_v5 = vshll.u32 %v4775_v21, 16 }
  0x52   : > { %4128 = vmatprep.mubr.msk.bf16.mxu1 %vm493_vm3, %v3543_v14 }
  0x53   : > { %v2254_v14 = vrot.slane %v6082_v62, 4  ;;  %v2245_v62 = vrot.slane %v4775_v21, 5  ;;  %v4891_v47 = vrot.slane %v1100_v5, 5 }
  0x55   : > { %v2247_v21 = vrot.slane %v2245_v62, 4 }
  0x57   : > { %4163 = vmatmul.mubr.msk.bf16.gmra.mxu0 %vm493_vm3, %v4643_v36  ;;  %v4912_v9 = vsel %vm4559_vm4, %v2247_v21, %v2248_v22  ;;  %v4925_v22 = vld [vmem:[%s4547_s6 + $0x2c] sm:$0x1]  ;;  %v4929_v21 = vrot.slane %v1155_v32, 4 }
  0x58   : > { %4166 = vmatprep.mubr.msk.bf16.mxu0 %vm493_vm3, %v4673_v45  ;;  %6085 = vst [vmem:[#allocation16_spill] sm:$0xff] %v4912_v9  ;;  %6086 = vst [vmem:[#allocation17_spill] sm:$0xff] %v4925_v22  ;;  %v1182_v32 = vshll.u32 %v4925_v22, 16  ;;  %v4970_v9 = vld [vmem:[%s4547_s6 + $0x38] sm:$0x1] }
  0x59   : > { %4129 = vmatmul.mubr.msk.bf16.gmra.mxu1 %vm493_vm3, %v4569_v12  ;;  %v3673_v12 = vrot.slane %v4772_v20, 9  ;;  %v2256_v20 = vsel %vm4559_vm4, %v2254_v14, %v2255_v11  ;;  %v1165_v11 = vrot.slane %v1163_v40, 4  ;;  %v1107_v40 = vor.u32 %v1106_v13, %v4891_v47 }
  0x5a   : > { %4132 = vmatprep.mubr.msk.bf16.mxu1 %vm493_vm3, %v4613_v27  ;;  %v1166_v27 = vshll.u32 %v4599_v24, 16  ;;  %v4905_v14 = vcombine.low %v4577_v15, %v2256_v20  ;;  %v1097_v15 = vor.u32 %v1096_v17, %v1093_v16  ;;  %v1178_v20 = vrot.slane %v1176_v23, 4 }
  0x5b   : > { %v4896_v10 = vsel %vm4559_vm4, %v3673_v12, %v2245_v62  ;;  %v1190_v12 = vshll.u32 %v4623_v31, 16  ;;  %v4927_v62 = vrot.slane %v1172_v59, 5  ;;  %v1214_v16 = vshll.u32 %v4659_v41, 16  ;;  %v4938_v31 = vld [vmem:[%s4749_s14 + $0xc] sm:$0xf] }
  0x5c   : > { %6083 = vst [vmem:[#allocation14_spill] sm:$0xff] %v4896_v10  ;;  %6084 = vst [vmem:[#allocation15_spill] sm:$0xff] %v4905_v14  ;;  %v1168_v5 = vrot.slane %v1166_v27, 5  ;;  %v1110_v27 = vshll.u32 %v358_v63, 16  ;;  %v1224_v17 = vshrl.u32 %v4662_v42, 16  ;;  %v1158_v13 = vshll.u32 %v4919_v55, 16 }
  0x5d   : > { %v4941_v59 = vld [vmem:[%s4749_s14 + $0x10] sm:$0xf]  ;;  %v1098_v23 = vrot.slane %v1097_v15, 4  ;;  %v1248_v24 = vshrl.u32 %v4700_v53, 16  ;;  %v1179_v14 = vor.u32 %v1178_v20, %v4927_v62  ;;  %v1196_v15 = vshll.u32 %v4637_v35, 16 }
  0x5e   : > { %v1169_v63 = vor.u32 %v1168_v5, %v1165_v11  ;;  %v1112_v25 = vrot.slane %v1110_v27, 5  ;;  %v1262_v11 = vshll.u32 %v4715_v57, 16  ;;  %v1151_v5 = vsel %vm4683_vm7, %v4899_v51, %v4880_v49 }
  0x5f   : > { %4167 = vmatmul.mubr.msk.bf16.gmra.mxu0 %vm493_vm3, %v4691_v50  ;;  %v1160_v27 = vrot.slane %v1158_v13, 5  ;;  %v1184_v49 = vrot.slane %v1182_v32, 5  ;;  %v1189_v51 = vrot.slane %v1187_v2, 4  ;;  %v1192_v22 = vrot.slane %v1190_v12, 5 }
  0x60   : > { %4170 = vmatprep.mubr.msk.bf16.mxu0 %vm493_vm3, %v4738_v0  ;;  %v1170_v20 = vrot.slane %v1169_v63, 4  ;;  %v1180_v35 = vrot.slane %v1179_v14, 4  ;;  %v1202_v13 = vrot.slane %v1200_v28, 4  ;;  %v1216_v10 = vrot.slane %v1214_v16, 5 }
  0x61   : > { %4133 = vmatmul.mubr.msk.bf16.gmra.mxu1 %vm493_vm3, %v4643_v36  ;;  %v1259_v36 = vshrl.u32 %v4715_v57, 16  ;;  %v1220_v57 = vshll.u32 %v4662_v42, 16  ;;  %v4972_v42 = vrot.slane %v1196_v15, 5  ;;  %v1272_v2 = vshrl.u32 %v4718_v58, 16 }
  0x62   : > { %4136 = vmatprep.mubr.msk.bf16.mxu1 %vm493_vm3, %v4673_v45  ;;  %v1211_v45 = vshrl.u32 %v4659_v41, 16  ;;  %v1108_v41 = vrot.slane %v1107_v40, 4  ;;  %v3586_v40 = vcombine.low %v4938_v31, %v4941_v59  ;;  %v1283_v12 = vshrl.u32 %v4754_v3, 16 }
  0x63   : > { %v1193_v32 = vor.u32 %v1192_v22, %v1189_v51  ;;  %v1206_v28 = vshll.u32 %v4970_v9, 16  ;;  %v2311_v16 = vrot.slane %v4829_v7, 5  ;;  %v1244_v22 = vshll.u32 %v4700_v53, 16 }
  0x64   : > { %v1213_v63 = vrot.slane %v1211_v45, 4  ;;  %v4984_v45 = vld [vmem:[%s4547_s6 + $0x44] sm:$0x1]  ;;  %v1185_v7 = vsel %vm4683_vm7, %v1180_v35, %v1184_v49  ;;  %v6089_v49 = vshrl.u32 %v4697_v52, 16 }
  0x66   : > { %v1217_v15 = vor.u32 %v1216_v10, %v1213_v63  ;;  %v1194_v10 = vrot.slane %v1193_v32, 4  ;;  %v1237_v51 = vrot.slane %v6089_v49, 4  ;;  %v5019_v63 = vrot.slane %v1244_v22, 5 }
  0x67   : > { %4171 = vmatmul.mubr.msk.bf16.gmra.mxu0 %vm493_vm3, %v4742_v1  ;;  %v2027_v22 = vsel %vm542_vm0, %v4815_v26, 0  ;;  %v1331_v49 = vshrl.u32 %v4588_v18, 16 }
  0x68   : > { %4174 = vmatprep.mubr.msk.bf16.mxu0 %vm493_vm3, %v4783_v39  ;;  %v1103_v39 = vsel %vm4683_vm7, %v1098_v23, %v4891_v47  ;;  %v2310_v23 = vrot.slane %v2308_v44, 4 }
  0x69   : > { %4137 = vmatmul.mubr.msk.bf16.gmra.mxu1 %vm493_vm3, %v4691_v50  ;;  %v1113_v50 = vsel %vm4683_vm7, %v1108_v41, %v1112_v25  ;;  %v4980_v25 = vrot.slane %v1220_v57, 5  ;;  %v1226_v41 = vrot.slane %v1224_v17, 4  ;;  %v1175_v57 = vsel %vm4683_vm7, %v1170_v20, %v4927_v62 }
  0x6a   : > { %4140 = vmatprep.mubr.msk.bf16.mxu1 %vm493_vm3, %v4738_v0  ;;  %v6087_v0 = vrot.slane %v4554_v6, 9  ;;  %v3604_v14 = vcombine.low %v1103_v39, %v1113_v50  ;;  %v1286_v6 = vshll.u32 %v4754_v3, 16  ;;  %v1203_v17 = vor.u32 %v1202_v13, %v4972_v42 }
  0x6b   : > { %v1227_v62 = vor.u32 %v1226_v41, %v4980_v25  ;;  %v1208_v39 = vrot.slane %v1206_v28, 5  ;;  %v6090_v50 = vshll.u32 %v4697_v52, 16  ;;  %v5022_v41 = vld [vmem:[%s4547_s6 + $0x50] sm:$0x1]  ;;  %v5025_v28 = vld [vmem:[%s4547_s6 + $0x5c] sm:$0x1] }
  0x6c   : > { %v2309_v47 = vsel %vm4559_vm4, %v6087_v0, %v2308_v44  ;;  %v1161_v44 = vsel %vm4683_vm7, %v4929_v21, %v1160_v27  ;;  %v1230_v21 = vshll.u32 %v4984_v45, 16  ;;  %v1268_v27 = vshll.u32 %v4718_v58, 16 }
  0x6d   : > { %v5011_v35 = vcombine.low %v1151_v5, %v1161_v44  ;;  %v1240_v13 = vrot.slane %v6090_v50, 5  ;;  %v1250_v0 = vrot.slane %v1248_v24, 4  ;;  %v1264_v5 = vrot.slane %v1262_v11, 5 }
  0x6e   : > { %v1232_v32 = vrot.slane %v1230_v21, 5  ;;  %v5027_v44 = vrot.slane %v1268_v27, 5  ;;  %v1292_v24 = vshll.u32 %v4757_v4, 16  ;;  %v1254_v26 = vshll.u32 %v5022_v41, 16  ;;  %v5057_v21 = vld [vmem:[%s6040_s2 + $0xa] sm:$0x3] }
  0x6f   : > { %4175 = vmatmul.mubr.msk.bf16.gmra.mxu0 %vm493_vm3, %v3586_v40  ;;  %v2312_v40 = vsel %vm4559_vm4, %v2310_v23, %v2311_v16  ;;  %v1218_v23 = vrot.slane %v1217_v15, 4  ;;  %v1228_v16 = vrot.slane %v1227_v62, 4  ;;  %v1241_v11 = vor.u32 %v1240_v13, %v1237_v51 }
  0x70   : > { %4214 = vmatprep.mubr.msk.bf16.mxu0 %vm493_vm3, %v4794_v61  ;;  %v5008_v20 = vcombine.low %v2309_v47, %v2312_v40  ;;  %v1204_v47 = vrot.slane %v1203_v17, 4  ;;  %v5036_v17 = vld [vmem:[%s6040_s2 + $0x10] sm:$0x3]  ;;  %v5072_v51 = vrot.slane %v1292_v24, 5 }
  0x71   : > { %4141 = vmatmul.mubr.msk.bf16.gmra.mxu1 %vm493_vm3, %v4742_v1  ;;  %v5015_v1 = vcombine.low %v1175_v57, %v1185_v7  ;;  %v1274_v57 = vrot.slane %v1272_v2, 4  ;;  %v1296_v7 = vshrl.u32 %v4757_v4, 16  ;;  %v1251_v2 = vor.u32 %v1250_v0, %v5019_v63 }
  0x72   : > { %6088 = vst [vmem:[#allocation18_spill] sm:$0xff] %v5008_v20  ;;  %4180 = vmatprep.mubr.msk.bf16.mxu1 %vm493_vm3, %v3604_v14  ;;  %v1261_v14 = vrot.slane %v1259_v36, 4  ;;  %v1199_v36 = vsel %vm4683_vm7, %v1194_v10, %v4972_v42  ;;  %v1209_v15 = vsel %vm4683_vm7, %v1204_v47, %v1208_v39  ;;  %v1223_v40 = vsel %vm4683_vm7, %v1218_v23, %v4980_v25  ;;  %v5065_v10 = vld [vmem:[%s4547_s6 + $0x68] sm:$0x1] }
  0x73   : > { %v1278_v42 = vshll.u32 %v5025_v28, 16  ;;  %v1275_v27 = vor.u32 %v1274_v57, %v5027_v44  ;;  %v1285_v39 = vrot.slane %v1283_v12, 4  ;;  %v1288_v25 = vrot.slane %v1286_v6, 5 }
  0x74   : > { %v1265_v62 = vor.u32 %v1264_v5, %v1261_v14  ;;  %v5074_v50 = vcombine.low %v1199_v36, %v1209_v15  ;;  %v1242_v13 = vrot.slane %v1241_v11, 4  ;;  %v1252_v0 = vrot.slane %v1251_v2, 4 }
  0x75   : > { %v1256_v47 = vrot.slane %v1254_v26, 5  ;;  %v1334_v12 = vshll.u32 %v4588_v18, 16  ;;  %v1302_v14 = vshll.u32 %v5065_v10, 16  ;;  %v1344_v5 = vshrl.u32 %v4591_v19, 16 }
  0x76   : > { %v1266_v23 = vrot.slane %v1265_v62, 4  ;;  %v1289_v57 = vor.u32 %v1288_v25, %v1285_v39  ;;  %v1340_v36 = vshll.u32 %v4591_v19, 16  ;;  %v1368_v18 = vshrl.u32 %v4620_v30, 16 }
  0x77   : > { %4215 = vmatmul.mubr.msk.bf16.vlgmr.msra.gmra.mxu0 %vm493_vm3, %v5011_v35  ;;  %v1247_v11 = vsel %vm4683_vm7, %v1242_v13, %v5019_v63  ;;  %v1257_v2 = vsel %vm4683_vm7, %v1252_v0, %v1256_v47  ;;  %v1333_v26 = vrot.slane %v1331_v49, 4  ;;  %v1364_v15 = vshll.u32 %v4620_v30, 16 }
  0x78   : > { %4281 = vmatpush3.bf16.msra.mxu0 %v4877_v33  ;;  %4218 = vmatprep.mubr.msk.bf16.mxu0 %vm493_vm3, %v5015_v1  ;;  %v1233_v33 = vsel %vm4683_vm7, %v1228_v16, %v1232_v32  ;;  %v1276_v16 = vrot.slane %v1275_v27, 4  ;;  %v1280_v32 = vrot.slane %v1278_v42, 5  ;;  %v1271_v19 = vsel %vm4683_vm7, %v1266_v23, %v5027_v44  ;;  %v5108_v27 = vld [vmem:[%s4547_s6 + $0x80] sm:$0x1] }
  0x79   : > { %4181 = vmatmul.mubr.msk.bf16.vlgmr.msra.gmra.mxu1 %vm493_vm3, %v4794_v61  ;;  %4393 = vmatprep.subr.msk.bf16.mxu0 %vm542_vm0, %v5036_v17  ;;  %v1298_v61 = vrot.slane %v1296_v7, 4  ;;  %v5079_v6 = vcombine.low %v1223_v40, %v1233_v33  ;;  %v1355_v7 = vshrl.u32 %v4617_v29, 16  ;;  %v1290_v40 = vrot.slane %v1289_v57, 4 }
  0x7a   : > { %4247 = vmatpush3.bf16.msra.mxu1 %v2027_v22  ;;  %4184 = vmatprep.mubr.msk.bf16.mxu1 %vm493_vm3, %v5011_v35  ;;  %v1358_v22 = vshll.u32 %v4617_v29, 16  ;;  %v1304_v29 = vrot.slane %v1302_v14, 5  ;;  %v1281_v63 = vsel %vm4683_vm7, %v1276_v16, %v1280_v32  ;;  %v1336_v62 = vrot.slane %v1334_v12, 5 }
  0x7b   : > { %4392 = vmatprep.subr.msk.bf16.mxu1 %vm542_vm0, %v5057_v21  ;;  %v1299_v24 = vor.u32 %v1298_v61, %v5072_v51  ;;  %v1346_v42 = vrot.slane %v1344_v5, 4  ;;  %v5110_v44 = vrot.slane %v1340_v36, 5  ;;  %v1357_v39 = vrot.slane %v1355_v7, 4  ;;  %v5117_v61 = vld [vmem:[%s4547_s6 + $0x8c] sm:$0x1] }
  0x7c   : > { %v1360_v25 = vrot.slane %v1358_v22, 5  ;;  %v5112_v30 = vcombine.low %v1247_v11, %v1257_v2  ;;  %v5114_v49 = vcombine.low %v1271_v19, %v1281_v63  ;;  %v5119_v13 = vrot.slane %v1364_v15, 5 }
  0x7d   : > { %v1300_v33 = vrot.slane %v1299_v24, 4  ;;  %v1370_v0 = vrot.slane %v1368_v18, 4  ;;  %v1379_v47 = vshrl.u32 %v4646_v37, 16  ;;  %v1382_v12 = vshll.u32 %v4646_v37, 16 }
  0x7e   : > { %v1337_v23 = vor.u32 %v1336_v62, %v1333_v26  ;;  %v1350_v14 = vshll.u32 %v5108_v27, 16  ;;  %v1295_v5 = vsel %vm4683_vm7, %v1290_v40, %v5072_v51  ;;  %v1347_v32 = vor.u32 %v1346_v42, %v5110_v44  ;;  %v5149_v40 = vld [vmem:[%s4547_s6 + $0x98] sm:$0x1] }
  0x7f   : > { %4219 = vmatmul.mubr.msk.bf16.gmra.mxu0 %vm493_vm3, %v5074_v50  ;;  %v1305_v16 = vsel %vm4683_vm7, %v1300_v33, %v1304_v29  ;;  %v1361_v57 = vor.u32 %v1360_v25, %v1357_v39  ;;  %v1392_v7 = vshrl.u32 %v4649_v38, 16  ;;  %v1403_v22 = vshrl.u32 %v4669_v43, 16  ;;  %v5154_v39 = vld [vmem:[%s4547_s6 + $0xa4] sm:$0x1] }
  0x80   : > { %4222 = vmatprep.mubr.msk.bf16.mxu0 %vm493_vm3, %v5079_v6  ;;  %v1374_v37 = vshll.u32 %v5117_v61, 16  ;;  %v1388_v24 = vshll.u32 %v4649_v38, 16  ;;  %v1406_v51 = vshll.u32 %v4669_v43, 16  ;;  %v1416_v36 = vshrl.u32 %v4676_v46, 16  ;;  %6091 = vst [vmem:[#allocation19_spill] sm:$0xff] %v5154_v39 }
  0x81   : > { %4185 = vmatmul.mubr.msk.bf16.gmra.mxu1 %vm493_vm3, %v5015_v1  ;;  %v1371_v18 = vor.u32 %v1370_v0, %v5119_v13  ;;  %v1412_v11 = vshll.u32 %v4676_v46, 16  ;;  %v5144_v2 = vcombine.low %v1295_v5, %v1305_v16  ;;  %v1338_v19 = vrot.slane %v1337_v23, 4 }
  0x82   : > { %4188 = vmatprep.mubr.msk.bf16.mxu1 %vm493_vm3, %v5074_v50  ;;  %v1352_v38 = vrot.slane %v1350_v14, 5  ;;  %v1348_v43 = vrot.slane %v1347_v32, 4  ;;  %v1362_v29 = vrot.slane %v1361_v57, 4  ;;  %v1381_v26 = vrot.slane %v1379_v47, 4 }
  0x83   : > { %v1384_v15 = vrot.slane %v1382_v12, 5  ;;  %v1376_v63 = vrot.slane %v1374_v37, 5  ;;  %v5151_v62 = vrot.slane %v1388_v24, 5  ;;  %v1394_v46 = vrot.slane %v1392_v7, 4 }
  0x84   : > { %v1405_v42 = vrot.slane %v1403_v22, 4  ;;  %v1372_v33 = vrot.slane %v1371_v18, 4  ;;  %v1408_v25 = vrot.slane %v1406_v51, 5  ;;  %v1414_v0 = vrot.slane %v1412_v11, 5 }
  0x85   : > { %v1418_v23 = vrot.slane %v1416_v36, 4  ;;  %v1427_v14 = vshrl.u32 %v4705_v54, 16  ;;  %v1430_v5 = vshll.u32 %v4705_v54, 16  ;;  %v1440_v47 = vshrl.u32 %v4712_v56, 16 }
  0x86   : > { %v1343_v12 = vsel %vm4683_vm7, %v1338_v19, %v5110_v44  ;;  %v1385_v16 = vor.u32 %v1384_v15, %v1381_v26  ;;  %v1398_v32 = vshll.u32 %v5149_v40, 16  ;;  %v1353_v57 = vsel %vm4683_vm7, %v1348_v43, %v1352_v38 }
  0x87   : > { %4223 = vmatmul.mubr.msk.bf16.gmra.mxu0 %vm493_vm3, %v5112_v30  ;;  %v1367_v7 = vsel %vm4683_vm7, %v1362_v29, %v5119_v13  ;;  %v1395_v54 = vor.u32 %v1394_v46, %v5151_v62  ;;  %v1422_v22 = vshll.u32 %v5154_v39, 16  ;;  %v1377_v44 = vsel %vm4683_vm7, %v1372_v33, %v1376_v63  ;;  %v6092_v13 = vld [vmem:[#allocation11_spill] sm:$0xff]  ;;  %v5190_v33 = vld [vmem:[%s4547_s6 + $0xb0] sm:$0x1] }
  0x88   : > { %4226 = vmatprep.mubr.msk.bf16.mxu0 %vm493_vm3, %v5114_v49  ;;  %v1409_v37 = vor.u32 %v1408_v25, %v1405_v42  ;;  %v1419_v24 = vor.u32 %v1418_v23, %v1414_v0  ;;  %v1436_v51 = vshll.u32 %v4712_v56, 16  ;;  %v1451_v36 = vshrl.u32 %v4725_v60, 16 }
  0x89   : > { %4189 = vmatmul.mubr.msk.bf16.gmra.mxu1 %vm493_vm3, %v5079_v6  ;;  %v1454_v18 = vshll.u32 %v4725_v60, 16  ;;  %v1464_v11 = vshrl.u32 %v6092_v13, 16  ;;  %v1460_v19 = vshll.u32 %v6092_v13, 16  ;;  %v5185_v38 = vcombine.low %v1343_v12, %v1353_v57  ;;  %v6093_v57 = vld [vmem:[#allocation12_spill] sm:$0xff] }
  0x8a   : > { %4192 = vmatprep.mubr.msk.bf16.mxu1 %vm493_vm3, %v5112_v30  ;;  %v1386_v43 = vrot.slane %v1385_v16, 4  ;;  %v1400_v29 = vrot.slane %v1398_v32, 5  ;;  %v1429_v56 = vrot.slane %v1427_v14, 4  ;;  %v5187_v26 = vcombine.low %v1367_v7, %v1377_v44  ;;  %v6094_v32 = vld [vmem:[#allocation13_spill] sm:$0xff] }
  0x8b   : > { %v1396_v15 = vrot.slane %v1395_v54, 4  ;;  %v1424_v60 = vrot.slane %v1422_v22, 5  ;;  %v1432_v63 = vrot.slane %v1430_v5, 5  ;;  %v1410_v46 = vrot.slane %v1409_v37, 4  ;;  %v5196_v44 = vld [vmem:[%s4547_s6 + $0xbc] sm:$0x1] }
  0x8c   : > { %v1420_v42 = vrot.slane %v1419_v24, 4  ;;  %v1438_v25 = vrot.slane %v1436_v51, 5  ;;  %v1442_v23 = vrot.slane %v1440_v47, 4  ;;  %v1453_v13 = vrot.slane %v1451_v36, 4 }
  0x8d   : > { %v1456_v39 = vrot.slane %v1454_v18, 5  ;;  %v1462_v20 = vrot.slane %v1460_v19, 5  ;;  %v1466_v12 = vrot.slane %v1464_v11, 4  ;;  %v1769_v16 = vshrl.u32 %v6093_v57, 16 }
  0x8e   : > { %v1772_v14 = vshll.u32 %v6093_v57, 16  ;;  %v1782_v7 = vshrl.u32 %v6094_v32, 16  ;;  %v1391_v5 = vsel %vm4683_vm7, %v1386_v43, %v5151_v62  ;;  %v1401_v47 = vsel %vm4683_vm7, %v1396_v15, %v1400_v29 }
  0x8f   : > { %4227 = vmatmul.mubr.msk.bf16.gmra.mxu0 %vm493_vm3, %v5144_v2  ;;  %v1433_v54 = vor.u32 %v1432_v63, %v1429_v56  ;;  %v1446_v22 = vshll.u32 %v5190_v33, 16  ;;  %v1415_v37 = vsel %vm4683_vm7, %v1410_v46, %v1414_v0  ;;  %v1425_v24 = vsel %vm4683_vm7, %v1420_v42, %v1424_v60 }
  0x90   : > { %4230 = vmatprep.mubr.msk.bf16.mxu0 %vm493_vm3, %v4843_v34  ;;  %v1443_v51 = vor.u32 %v1442_v23, %v1438_v25  ;;  %v1778_v36 = vshll.u32 %v6094_v32, 16  ;;  %v1457_v62 = vor.u32 %v1456_v39, %v1453_v13  ;;  %v1467_v18 = vor.u32 %v1466_v12, %v1462_v20  ;;  %v5223_v13 = vld [vmem:[%s4749_s14 + $0x8] sm:$0x1] }
  0x91   : > { %4193 = vmatmul.mubr.msk.bf16.gmra.mxu1 %vm493_vm3, %v5114_v49  ;;  %v1470_v11 = vshll.u32 %v5196_v44, 16  ;;  %v5218_v19 = vcombine.low %v1391_v5, %v1401_v47  ;;  %v5220_v0 = vcombine.low %v1415_v37, %v1425_v24  ;;  %v1434_v43 = vrot.slane %v1433_v54, 4 }
  0x92   : > { %4196 = vmatprep.mubr.msk.bf16.mxu1 %vm493_vm3, %v5144_v2  ;;  %v1448_v29 = vrot.slane %v1446_v22, 5  ;;  %v1771_v56 = vrot.slane %v1769_v16, 4  ;;  %v1444_v15 = vrot.slane %v1443_v51, 4  ;;  %v1774_v60 = vrot.slane %v1772_v14, 5 }
  0x93   : > { %v1780_v63 = vrot.slane %v1778_v36, 5  ;;  %v1784_v46 = vrot.slane %v1782_v7, 4  ;;  %v1458_v42 = vrot.slane %v1457_v62, 4  ;;  %v1468_v39 = vrot.slane %v1467_v18, 4  ;;  %v6095_v36 = vld [vmem:[#allocation3_spill] sm:$0xff] }
  0x94   : > { %v1472_v23 = vrot.slane %v1470_v11, 5  ;;  %v1439_v12 = vsel %vm4683_vm7, %v1434_v43, %v1438_v25  ;;  %v1449_v57 = vsel %vm4683_vm7, %v1444_v15, %v1448_v29  ;;  %v1775_v16 = vor.u32 %v1774_v60, %v1771_v56  ;;  %v5259_v18 = vld [vmem:[%s4749_s14 + $0x14] sm:$0x1]  ;;  %v6096_v15 = vld [vmem:[#allocation2_spill] sm:$0xff] }
  0x95   : > { %v1785_v14 = vor.u32 %v1784_v46, %v1780_v63  ;;  %v1788_v32 = vshll.u32 %v5223_v13, 16  ;;  %v1463_v7 = vsel %vm4683_vm7, %v1458_v42, %v1462_v20  ;;  %v5242_v5 = vcombine.low %v1439_v12, %v1449_v57  ;;  %v6097_v12 = vld [vmem:[#allocation14_spill] sm:$0xff]  ;;  %v6098_v57 = vld [vmem:[#allocation16_spill] sm:$0xff] }
  0x96   : > { %v1473_v25 = vsel %vm4683_vm7, %v1468_v39, %v1472_v23  ;;  %v1776_v54 = vrot.slane %v1775_v16, 4  ;;  %v2864_v24 = vrot.slane %v4941_v59, 5  ;;  %v2259_v62 = vrot.slane %v6095_v36, 5 }
  0x97   : > { %4231 = vmatmul.mubr.msk.bf16.gmra.mxu0 %vm493_vm3, %v5185_v38  ;;  %v5244_v47 = vcombine.low %v1463_v7, %v1473_v25  ;;  %v1786_v22 = vrot.slane %v1785_v14, 4  ;;  %v1790_v37 = vrot.slane %v1788_v32, 5  ;;  %v3741_v11 = vrot.slane %v4938_v31, 9  ;;  %v6101_v25 = vld [vmem:[#allocation7_spill] sm:$0xff] }
  0x98   : > { %4234 = vmatprep.mubr.msk.bf16.mxu0 %vm493_vm3, %v5187_v26  ;;  %v1781_v20 = vsel %vm4683_vm7, %v1776_v54, %v1780_v63  ;;  %v2867_v43 = vrot.slane %v5259_v18, 5  ;;  %v2866_v56 = vrot.slane %v2864_v24, 4  ;;  %v3675_v60 = vrot.slane %v6096_v15, 9 }
  0x99   : > { %4197 = vmatmul.mubr.msk.bf16.gmra.mxu1 %vm493_vm3, %v4843_v34  ;;  %v1791_v51 = vsel %vm4683_vm7, %v1786_v22, %v1790_v37  ;;  %v2261_v63 = vrot.slane %v2259_v62, 4  ;;  %v2262_v46 = vrot.slane %v4919_v55, 5  ;;  %v5271_v42 = vsel %vm4559_vm4, %v3741_v11, %v2864_v24  ;;  %v6100_v55 = vld [vmem:[#allocation5_spill] sm:$0xff]  ;;  %v6102_v37 = vld [vmem:[#allocation4_spill] sm:$0xff] }
  0x9a   : > { %4200 = vmatprep.mubr.msk.bf16.mxu1 %vm493_vm3, %v5185_v38  ;;  %v5265_v29 = vcombine.low %v1781_v20, %v1791_v51  ;;  %v5275_v39 = vsel %vm4559_vm4, %v2866_v56, %v2867_v43  ;;  %v6099_v16 = vcombine.low %v6097_v12, %v6098_v57  ;;  %v2266_v14 = vrot.slane %v6100_v55, 5  ;;  %v6103_v51 = vld [vmem:[#allocation17_spill] sm:$0xff]  ;;  %v6104_v43 = vld [vmem:[#allocation6_spill] sm:$0xff] }
  0x9b   : > { %v3742_v23 = vcombine.low %v5271_v42, %v5275_v39  ;;  %v2260_v32 = vsel %vm4559_vm4, %v3675_v60, %v2259_v62  ;;  %v2263_v7 = vsel %vm4559_vm4, %v2261_v63, %v2262_v46  ;;  %v2273_v54 = vrot.slane %v6101_v25, 5  ;;  %v6105_v60 = vld [vmem:[#allocation15_spill] sm:$0xff]  ;;  %v6106_v46 = vld [vmem:[#allocation9_spill] sm:$0xff] }
  0x9c   : > { %v5295_v22 = vcombine.low %v2260_v32, %v2263_v7  ;;  %v3676_v24 = vrot.slane %v6102_v37, 9  ;;  %v2268_v20 = vrot.slane %v2266_v14, 4  ;;  %v2269_v36 = vrot.slane %v6103_v51, 5 }
  0x9d   : > { %v2876_v11 = vsel %vm542_vm0, %v5036_v17, 0  ;;  %v3677_v62 = vrot.slane %v6104_v43, 9  ;;  %v2275_v56 = vrot.slane %v2273_v54, 4  ;;  %v2276_v15 = vrot.slane %v4970_v9, 5 }
  0x9e   : > { %v2267_v63 = vsel %vm4559_vm4, %v3676_v24, %v2266_v14  ;;  %v2270_v17 = vsel %vm4559_vm4, %v2268_v20, %v2269_v36  ;;  %v2280_v12 = vrot.slane %v6106_v46, 5  ;;  %v2287_v57 = vrot.slane %v4700_v53, 5  ;;  %v6107_v14 = vld [vmem:[#allocation8_spill] sm:$0xff] }
  0x9f   : > { %4235 = vmatmul.mubr.msk.bf16.gmra.mxu0 %vm493_vm3, %v5218_v19  ;;  %v2274_v9 = vsel %vm4559_vm4, %v3677_v62, %v2273_v54  ;;  %v3678_v32 = vrot.slane %v6107_v14, 9  ;;  %v3679_v25 = vrot.slane %v4697_v52, 9  ;;  %v2290_v37 = vrot.slane %v5022_v41, 5  ;;  %v4442_v14 = vld [vmem:[%s4547_s6 + $0x94] sm:$0xf] }
  0xa0   : > { %4238 = vmatprep.mubr.msk.bf16.mxu0 %vm493_vm3, %v5220_v0  ;;  %v2282_v7 = vrot.slane %v2280_v12, 4  ;;  %v2289_v54 = vrot.slane %v2287_v57, 4  ;;  %v2294_v24 = vrot.slane %v4718_v58, 5  ;;  %v2301_v41 = vrot.slane %v4757_v4, 5  ;;  %v6108_v58 = vld [vmem:[#allocation10_spill] sm:$0xff] }
  0xa1   : > { %4201 = vmatmul.mubr.msk.bf16.gmra.mxu1 %vm493_vm3, %v5187_v26  ;;  %v2281_v53 = vsel %vm4559_vm4, %v3678_v32, %v2280_v12  ;;  %v2288_v52 = vsel %vm4559_vm4, %v3679_v25, %v2287_v57  ;;  %v3680_v36 = vrot.slane %v6108_v58, 9  ;;  %v3681_v43 = vrot.slane %v4754_v3, 9 }
  0xa2   : > { %4204 = vmatprep.mubr.msk.bf16.mxu1 %vm493_vm3, %v5218_v19  ;;  %v2303_v62 = vrot.slane %v2301_v41, 4  ;;  %v2318_v12 = vrot.slane %v5108_v27, 5  ;;  %v2329_v27 = vrot.slane %v4442_v14, 5 }
  0xa3   : > { %v2295_v4 = vsel %vm4559_vm4, %v3680_v36, %v2294_v24  ;;  %v2302_v3 = vsel %vm4559_vm4, %v3681_v43, %v2301_v41 }
  0xa7   : > { %4239 = vmatmul.mubr.msk.bf16.gmra.mxu0 %vm493_vm3, %v5242_v5 }
  0xa8   : > { %4242 = vmatprep.mubr.msk.bf16.mxu0 %vm493_vm3, %v5244_v47 }
  0xa9   : > { %4205 = vmatmul.mubr.msk.bf16.gmra.mxu1 %vm493_vm3, %v5220_v0 }
  0xaa   : > { %4208 = vmatprep.mubr.msk.bf16.mxu1 %vm493_vm3, %v5242_v5 }
  0xaf   : > { %4243 = vmatmul.mubr.msk.bf16.gmra.mxu0 %vm493_vm3, %v5265_v29 }
  0xb0   : > { %4282 = vmatprep.mubr.msk.bf16.mxu0 %vm493_vm3, %v6099_v16  ;;  %v5323_v16 = vcombine.low %v2267_v63, %v2270_v17  ;;  %v4440_v17 = vld [vmem:[%s4547_s6 + $0x78] sm:$0xf] }
  0xb1   : > { %4209 = vmatmul.mubr.msk.bf16.gmra.mxu1 %vm493_vm3, %v5244_v47  ;;  %v3683_v46 = vrot.slane %v4440_v17, 9 }
  0xb2   : > { %4248 = vmatprep.mubr.msk.bf16.mxu1 %vm493_vm3, %v5011_v35  ;;  %v2664_v35 = vsel %vm542_vm0, %v5057_v21, 0  ;;  %v2277_v21 = vsel %vm4559_vm4, %v2275_v56, %v2276_v15  ;;  %v2304_v56 = vrot.slane %v5065_v10, 5  ;;  %v4439_v10 = vld [vmem:[%s4547_s6 + $0x7c] sm:$0xf] }
  0xb3   : > { %v5325_v55 = vcombine.low %v2274_v9, %v2277_v21  ;;  %v2315_v15 = vrot.slane %v4439_v10, 5  ;;  %v4441_v9 = vld [vmem:[%s4547_s6 + $0x88] sm:$0xf] }
  0xb4   : > { %v2322_v21 = vrot.slane %v4441_v9, 5 }
  0xb6   : > { %v2324_v25 = vrot.slane %v2322_v21, 4 }
  0xb7   : > { %4283 = vmatmul.mubr.msk.bf16.vlgmr.msra.gmra.mxu0 %vm493_vm3, %v6105_v60 }
  0xb8   : > { %4349 = vmatpush3.bf16.msra.mxu0 %v2876_v11  ;;  %4286 = vmatprep.mubr.msk.bf16.mxu0 %vm493_vm3, %v5295_v22  ;;  %v2296_v11 = vrot.slane %v2294_v24, 4 }
  0xb9   : > { %4249 = vmatmul.mubr.msk.bf16.vlgmr.msra.gmra.mxu1 %vm493_vm3, %v5015_v1  ;;  %v2283_v1 = vrot.slane %v4984_v45, 5  ;;  %v2291_v45 = vsel %vm4559_vm4, %v2289_v54, %v2290_v37  ;;  %v2325_v54 = vrot.slane %v5117_v61, 5 }
  0xba   : > { %4315 = vmatpush3.bf16.msra.mxu1 %v2664_v35  ;;  %4252 = vmatprep.mubr.msk.bf16.mxu1 %vm493_vm3, %v5074_v50  ;;  %v5351_v51 = vcombine.low %v2288_v52, %v2291_v45  ;;  %v6109_v52 = vld [vmem:[#allocation18_spill] sm:$0xff] }
  0xbb   : > { %v2284_v50 = vsel %vm4559_vm4, %v2282_v7, %v2283_v1  ;;  %v4443_v7 = vld [vmem:[%s4547_s6 + $0x84] sm:$0xf]  ;;  %v2326_v61 = vsel %vm4559_vm4, %v2324_v25, %v2325_v54  ;;  %v4445_v45 = vld [vmem:[%s4547_s6 + $0xa0] sm:$0xf] }
  0xbc   : > { %v5349_v20 = vcombine.low %v2281_v53, %v2284_v50  ;;  %v3684_v1 = vrot.slane %v4443_v7, 9  ;;  %v2331_v53 = vrot.slane %v2329_v27, 4  ;;  %v2332_v50 = vrot.slane %v5149_v40, 5 }
  0xbd   : > { %v2336_v41 = vrot.slane %v4445_v45, 5 }
  0xbf   : > { %4287 = vmatmul.mubr.msk.bf16.gmra.mxu0 %vm493_vm3, %v5323_v16 }
  0xc0   : > { %4290 = vmatprep.mubr.msk.bf16.mxu0 %vm493_vm3, %v5325_v55 }
  0xc1   : > { %4253 = vmatmul.mubr.msk.bf16.gmra.mxu1 %vm493_vm3, %v5079_v6  ;;  %v2297_v6 = vrot.slane %v5025_v28, 5  ;;  %v2305_v28 = vsel %vm4559_vm4, %v2303_v62, %v2304_v56  ;;  %v1997_v62 = vshrl.u32 %v4938_v31, 16  ;;  %v2000_v56 = vshll.u32 %v4938_v31, 16 }
  0xc2   : > { %4256 = vmatprep.mubr.msk.bf16.mxu1 %vm493_vm3, %v5112_v30  ;;  %v5376_v63 = vcombine.low %v2302_v3, %v2305_v28 }
  0xc3   : > { %v2298_v30 = vsel %vm4559_vm4, %v2296_v11, %v2297_v6  ;;  %v2333_v11 = vsel %vm4559_vm4, %v2331_v53, %v2332_v50  ;;  %v4446_v6 = vld [vmem:[%s4547_s6 + $0xac] sm:$0xf]  ;;  %v2002_v14 = vrot.slane %v2000_v56, 5  ;;  %v4450_v56 = vld [vmem:[%s4547_s6 + $0xb4] sm:$0xf] }
  0xc4   : > { %v5374_v35 = vcombine.low %v2295_v4, %v2298_v30  ;;  %v2343_v43 = vrot.slane %v4446_v6, 5  ;;  %v2010_v4 = vshrl.u32 %v4941_v59, 16 }
  0xc6   : > { %v2012_v7 = vrot.slane %v2010_v4, 4 }
  0xc7   : > { %4291 = vmatmul.mubr.msk.bf16.gmra.mxu0 %vm493_vm3, %v5349_v20 }
  0xc8   : > { %4294 = vmatprep.mubr.msk.bf16.mxu0 %vm493_vm3, %v5351_v51 }
  0xc9   : > { %4257 = vmatmul.mubr.msk.bf16.gmra.mxu1 %vm493_vm3, %v5114_v49  ;;  %v2317_v49 = vrot.slane %v2315_v15, 4 }
  0xca   : > { %4260 = vmatprep.mubr.msk.bf16.mxu1 %vm493_vm3, %v5144_v2  ;;  %v2316_v2 = vsel %vm4559_vm4, %v3683_v46, %v2315_v15  ;;  %v4447_v15 = vld [vmem:[%s4547_s6 + $0x9c] sm:$0xf]  ;;  %v2338_v46 = vrot.slane %v2336_v41, 4 }
  0xcb   : > { %v2319_v57 = vsel %vm4559_vm4, %v2317_v49, %v2318_v12  ;;  %v3686_v17 = vrot.slane %v4447_v15, 9  ;;  %v6110_v49 = vld [vmem:[#allocation19_spill] sm:$0xff] }
  0xcc   : > { %v5394_v32 = vcombine.low %v2316_v2, %v2319_v57  ;;  %v2339_v31 = vrot.slane %v6110_v49, 5  ;;  %v2346_v2 = vrot.slane %v5190_v33, 5  ;;  %v1999_v57 = vrot.slane %v1997_v62, 4 }
  0xcd   : > { %v2337_v54 = vsel %vm4559_vm4, %v3686_v17, %v2336_v41 }
  0xce   : > { %v2340_v33 = vsel %vm4559_vm4, %v2338_v46, %v2339_v31  ;;  %v2003_v45 = vor.u32 %v2002_v14, %v1999_v57 }
  0xcf   : > { %4295 = vmatmul.mubr.msk.bf16.gmra.mxu0 %vm493_vm3, %v5374_v35 }
  0xd0   : > { %4298 = vmatprep.mubr.msk.bf16.mxu0 %vm493_vm3, %v5376_v63  ;;  %v2004_v17 = vrot.slane %v2003_v45, 4 }
  0xd1   : > { %4261 = vmatmul.mubr.msk.bf16.gmra.mxu1 %vm493_vm3, %v4843_v34  ;;  %v4444_v34 = vld [vmem:[%s4547_s6 + $0x90] sm:$0xf] }
  0xd2   : > { %4264 = vmatprep.mubr.msk.bf16.mxu1 %vm493_vm3, %v5185_v38  ;;  %v3685_v37 = vrot.slane %v4444_v34, 9  ;;  %v2323_v38 = vsel %vm4559_vm4, %v3684_v1, %v2322_v21  ;;  %v2345_v21 = vrot.slane %v2343_v43, 4  ;;  %v4449_v34 = vld [vmem:[%s4547_s6 + $0xb8] sm:$0xf] }
  0xd3   : > { %v5432_v28 = vcombine.low %v2323_v38, %v2326_v61 }
  0xd4   : > { %v2330_v36 = vsel %vm4559_vm4, %v3685_v37, %v2329_v27  ;;  %v2350_v37 = vrot.slane %v4449_v34, 5  ;;  %v2347_v61 = vsel %vm4559_vm4, %v2345_v21, %v2346_v2 }
  0xd5   : > { %v5434_v10 = vcombine.low %v2330_v36, %v2333_v11  ;;  %v2016_v36 = vshll.u32 %v5259_v18, 16 }
  0xd6   : > { %v2352_v4 = vrot.slane %v2350_v37, 4 }
  0xd7   : > { %v5400_v24 = vpop.f32.mrf.mxu0  ;;  %4299 = vmatmul.mubr.msk.bf16.gmra.mxu0 %vm493_vm3, %v6109_v52  ;;  %v2018_v18 = vrot.slane %v2016_v36, 5 }
  0xd8   : > { %4302 = vmatprep.mubr.msk.bf16.mxu0 %vm493_vm3, %v5394_v32  ;;  %v5411_v58 = vpop.f32.mrf.mxu1 }
  0xd9   : > { %4265 = vmatmul.mubr.msk.bf16.gmra.mxu1 %vm493_vm3, %v5187_v26  ;;  %v5415_v40 = vpop.f32.mrf.mxu0  ;;  %v2006_v26 = vshll.u32 %v4941_v59, 16 }
  0xda   : > { %4268 = vmatprep.mubr.msk.bf16.mxu1 %vm493_vm3, %v5218_v19  ;;  %v5428_v30 = vpop.f32.mrf.mxu1  ;;  %v4448_v19 = vld [vmem:[%s4547_s6 + $0xa8] sm:$0xf] }
  0xdb   : > { %v5430_v3 = vpop.f32.mrf.mxu0  ;;  %v3687_v59 = vrot.slane %v4448_v19, 9  ;;  %v2008_v27 = vrot.slane %v2006_v26, 5  ;;  %v2353_v26 = vrot.slane %v5196_v44, 5 }
  0xdc   : > { %v5438_v12 = vpop.f32.mrf.mxu1 }
  0xdd   : > { %v5440_v9 = vpop.f32.mrf.mxu0  ;;  %v2344_v38 = vsel %vm4559_vm4, %v3687_v59, %v2343_v43  ;;  %v2013_v41 = vor.u32 %v2012_v7, %v2008_v27  ;;  %v3688_v43 = vrot.slane %v4450_v56, 9  ;;  %v2354_v19 = vsel %vm4559_vm4, %v2352_v4, %v2353_v26 }
  0xde   : > { %v5444_v1 = vpop.f32.mrf.mxu1  ;;  %v5476_v62 = vcombine.low %v2344_v38, %v2347_v61  ;;  %v2009_v2 = vsel %vm4683_vm7, %v2004_v17, %v2008_v27 }
  0xdf   : > { %v5446_v25 = vpop.f32.mrf.mxu0  ;;  %4303 = vmatmul.mubr.msk.bf16.gmra.mxu0 %vm493_vm3, %v5432_v28  ;;  %v2014_v46 = vrot.slane %v2013_v41, 4  ;;  %v2351_v44 = vsel %vm4559_vm4, %v3688_v43, %v2350_v37 }
  0xe0   : > { %4306 = vmatprep.mubr.msk.bf16.mxu0 %vm493_vm3, %v5434_v10  ;;  %v5457_v53 = vpop.f32.mrf.mxu1 }
  0xe1   : > { %4269 = vmatmul.mubr.msk.bf16.gmra.mxu1 %vm493_vm3, %v5220_v0  ;;  %v5461_v50 = vpop.f32.mrf.mxu0  ;;  %v5474_v0 = vcombine.low %v2337_v54, %v2340_v33  ;;  %v2019_v57 = vsel %vm4683_vm7, %v2014_v46, %v2018_v18  ;;  %v5512_v54 = vcombine.low %v2351_v44, %v2354_v19 }
  0xe2   : > { %4272 = vmatprep.mubr.msk.bf16.mxu1 %vm493_vm3, %v5242_v5  ;;  %v5470_v11 = vpop.f32.mrf.mxu1  ;;  %v3655_v34 = vcombine.low %v2009_v2, %v2019_v57 }
  0xe3   : > { %v5472_v6 = vpop.f32.mrf.mxu0 }
  0xe4   : > { %v5480_v15 = vpop.f32.mrf.mxu1 }
  0xe5   : > { %v5482_v5 = vpop.f32.mrf.mxu0 }
  0xe6   : > { %v5484_v49 = vpop.f32.mrf.mxu1 }
  0xe7   : > { %v5486_v31 = vpop.f32.mrf.mxu0  ;;  %4307 = vmatmul.mubr.msk.bf16.gmra.mxu0 %vm493_vm3, %v5474_v0 }
  0xe8   : > { %4310 = vmatprep.mubr.msk.bf16.mxu0 %vm493_vm3, %v5476_v62  ;;  %v5496_v59 = vpop.f32.mrf.mxu1 }
  0xe9   : > { %4273 = vmatmul.mubr.msk.bf16.gmra.mxu1 %vm493_vm3, %v5244_v47  ;;  %v5500_v21 = vpop.f32.mrf.mxu0 }
  0xea   : > { %4276 = vmatprep.mubr.msk.bf16.mxu1 %vm493_vm3, %v5265_v29  ;;  %v5508_v14 = vpop.f32.mrf.mxu1 }
  0xeb   : > { %v5510_v7 = vpop.f32.mrf.mxu0 }
  0xec   : > { %v5514_v33 = vpop.f32.mrf.mxu1 }
  0xed   : > { %v5516_v47 = vpop.f32.mrf.mxu0 }
  0xee   : > { %v5518_v37 = vpop.f32.mrf.mxu1 }
  0xef   : > { %v5520_v29 = vpop.f32.mrf.mxu0  ;;  %4311 = vmatmul.mubr.msk.bf16.gmra.mxu0 %vm493_vm3, %v5512_v54 }
  0xf0   : > { %4350 = vmatprep.mubr.msk.bf16.mxu0 %vm493_vm3, %v5295_v22  ;;  %v5526_v48 = vpop.f32.mrf.mxu1 }
  0xf1   : > { %4277 = vmatmul.mubr.msk.bf16.gmra.mxu1 %vm493_vm3, %v3655_v34  ;;  %v5529_v27 = vpop.f32.mrf.mxu0 }
  0xf2   : > { %4316 = vmatprep.mubr.msk.bf16.mxu1 %vm493_vm3, %v6105_v60  ;;  %v5533_v38 = vpop.f32.mrf.mxu1 }
  0xf3   : > { %v5535_v61 = vpop.f32.mrf.mxu0 }
  0xf4   : > { %v5537_v45 = vpop.f32.mrf.mxu1 }
  0xf5   : > { %v5539_v41 = vpop.f32.mrf.mxu0 }
  0xf6   : > { %v5541_v36 = vpop.f32.mrf.mxu1 }
  0xf7   : > { %v4148_v56 = vpop.f32.mrf.mxu0  ;;  %4351 = vmatmul.mubr.msk.bf16.vlgmr.msra.gmra.mxu0 %vm493_vm3, %v5323_v16 }
  0xf8   : > { %4354 = vmatprep.mubr.msk.bf16.mxu0 %vm493_vm3, %v5325_v55 }
  0xf9   : > { %v4114_v43 = vpop.f32.mrf.mxu1  ;;  %4317 = vmatmul.mubr.msk.bf16.vlgmr.msra.gmra.mxu1 %vm493_vm3, %v5295_v22  ;;  %v926_v60 = vpop.f32.mrf.mxu0 }
  0xfa   : > { %v761_v4 = vadd.f32 %v4114_v43, %v5400_v24  ;;  %4320 = vmatprep.mubr.msk.bf16.mxu1 %vm493_vm3, %v5323_v16 }
  0xfb   : > { %v752_v26 = vpop.f32.mrf.mxu1  ;;  %v4149_v17 = vpop.f32.mrf.mxu0 }
  0xfc   : > { %v5552_v46 = vadd.f32 %v4148_v56, %v761_v4  ;;  %v753_v18 = vadd.f32 %v752_v26, %v5415_v40 }
  0xfd   : > { %v4115_v44 = vpop.f32.mrf.mxu1  ;;  %v929_v19 = vpop.f32.mrf.mxu0 }
  0xfe   : > { %v5555_v2 = vadd.f32 %v926_v60, %v753_v18  ;;  %v764_v57 = vadd.f32 %v4115_v44, %v5430_v3 }
  0xff   : > { %v755_v34 = vpop.f32.mrf.mxu1  ;;  %v4152_v22 = vpop.f32.mrf.mxu0  ;;  %4355 = vmatmul.mubr.msk.bf16.gmra.mxu0 %vm493_vm3, %v5349_v20 }
 0x100   : > { %v5560_v24 = vadd.f32 %v4149_v17, %v764_v57  ;;  %v756_v16 = vadd.f32 %v755_v34, %v5440_v9  ;;  %4358 = vmatprep.mubr.msk.bf16.mxu0 %vm493_vm3, %v5351_v51 }
 0x101   : > { %v4118_v56 = vpop.f32.mrf.mxu1  ;;  %4321 = vmatmul.mubr.msk.bf16.gmra.mxu1 %vm493_vm3, %v5325_v55  ;;  %v942_v40 = vpop.f32.mrf.mxu0 }
 0x102   : > { %v5567_v43 = vadd.f32 %v929_v19, %v756_v16  ;;  %v777_v3 = vadd.f32 %v4118_v56, %v5446_v25  ;;  %4324 = vmatprep.mubr.msk.bf16.mxu1 %vm493_vm3, %v5349_v20 }
 0x103   : > { %v768_v60 = vpop.f32.mrf.mxu1  ;;  %v4153_v4 = vpop.f32.mrf.mxu0 }
 0x104   : > { %v5572_v26 = vadd.f32 %v4152_v22, %v777_v3  ;;  %v769_v9 = vadd.f32 %v768_v60, %v5461_v50 }
 0x105   : > { %v4119_v17 = vpop.f32.mrf.mxu1  ;;  %v945_v18 = vpop.f32.mrf.mxu0 }
 0x106   : > { %v5575_v44 = vadd.f32 %v942_v40, %v769_v9  ;;  %v780_v55 = vadd.f32 %v4119_v17, %v5472_v6 }
 0x107   : > { %v771_v57 = vpop.f32.mrf.mxu1  ;;  %v4156_v19 = vpop.f32.mrf.mxu0  ;;  %4359 = vmatmul.mubr.msk.bf16.gmra.mxu0 %vm493_vm3, %v5374_v35 }
 0x108   : > { %v5580_v25 = vadd.f32 %v4153_v4, %v780_v55  ;;  %v772_v20 = vadd.f32 %v771_v57, %v5482_v5  ;;  %4362 = vmatprep.mubr.msk.bf16.mxu0 %vm493_vm3, %v5376_v63 }
 0x109   : > { %v4122_v34 = vpop.f32.mrf.mxu1  ;;  %4325 = vmatmul.mubr.msk.bf16.gmra.mxu1 %vm493_vm3, %v5351_v51  ;;  %v958_v50 = vpop.f32.mrf.mxu0 }
 0x10a   : > { %v5587_v22 = vadd.f32 %v945_v18, %v772_v20  ;;  %v793_v6 = vadd.f32 %v4122_v34, %v5486_v31  ;;  %4328 = vmatprep.mubr.msk.bf16.mxu1 %vm493_vm3, %v5374_v35 }
 0x10b   : > { %v784_v16 = vpop.f32.mrf.mxu1  ;;  %v4157_v56 = vpop.f32.mrf.mxu0 }
 0x10c   : > { %v5592_v40 = vadd.f32 %v4156_v19, %v793_v6  ;;  %v785_v5 = vadd.f32 %v784_v16, %v5500_v21 }
 0x10d   : > { %v4123_v3 = vpop.f32.mrf.mxu1  ;;  %v961_v60 = vpop.f32.mrf.mxu0 }
 0x10e   : > { %v5595_v4 = vadd.f32 %v958_v50, %v785_v5  ;;  %v796_v51 = vadd.f32 %v4123_v3, %v5510_v7  ;;  %v4451_v3 = vld [vmem:[%s4749_s14 + $0x4] sm:$0xf] }
 0x10f   : > { %v787_v9 = vpop.f32.mrf.mxu1  ;;  %v4160_v17 = vpop.f32.mrf.mxu0  ;;  %4363 = vmatmul.mubr.msk.bf16.gmra.mxu0 %vm493_vm3, %v6109_v52 }
 0x110   : > { %v5600_v31 = vadd.f32 %v4157_v56, %v796_v51  ;;  %v788_v35 = vadd.f32 %v787_v9, %v5516_v47  ;;  %4366 = vmatprep.mubr.msk.bf16.mxu0 %vm493_vm3, %v5394_v32 }
 0x111   : > { %v4126_v18 = vpop.f32.mrf.mxu1  ;;  %4329 = vmatmul.mubr.msk.bf16.gmra.mxu1 %vm493_vm3, %v5376_v63  ;;  %v974_v21 = vpop.f32.mrf.mxu0 }
 0x112   : > { %v5607_v55 = vadd.f32 %v961_v60, %v788_v35  ;;  %v809_v7 = vadd.f32 %v4126_v18, %v5520_v29  ;;  %4332 = vmatprep.mubr.msk.bf16.mxu1 %vm493_vm3, %v6109_v52 }
 0x113   : > { %v800_v57 = vpop.f32.mrf.mxu1  ;;  %v4161_v19 = vpop.f32.mrf.mxu0 }
 0x114   : > { %v5612_v20 = vadd.f32 %v4160_v17, %v809_v7  ;;  %v801_v47 = vadd.f32 %v800_v57, %v5529_v27  ;;  %v4452_v7 = vld [vmem:[%s4749_s14] sm:$0xf] }
 0x115   : > { %v4127_v34 = vpop.f32.mrf.mxu1  ;;  %v977_v50 = vpop.f32.mrf.mxu0 }
 0x116   : > { %v5615_v6 = vadd.f32 %v974_v21, %v801_v47  ;;  %v812_v63 = vadd.f32 %v4127_v34, %v5535_v61  ;;  %v2652_v61 = vrot.slane %v4451_v3, 5 }
 0x117   : > { %v803_v16 = vpop.f32.mrf.mxu1  ;;  %v4164_v56 = vpop.f32.mrf.mxu0  ;;  %4367 = vmatmul.mubr.msk.bf16.gmra.mxu0 %vm493_vm3, %v5432_v28 }
 0x118   : > { %v5620_v29 = vadd.f32 %v4161_v19, %v812_v63  ;;  %v804_v52 = vadd.f32 %v803_v16, %v5539_v41  ;;  %4370 = vmatprep.mubr.msk.bf16.mxu0 %vm493_vm3, %v5434_v10  ;;  %v2654_v57 = vrot.slane %v2652_v61, 4  ;;  %v2655_v19 = vrot.slane %v5223_v13, 5 }
 0x119   : > { %v4130_v27 = vpop.f32.mrf.mxu1  ;;  %4333 = vmatmul.mubr.msk.bf16.gmra.mxu1 %vm493_vm3, %v5394_v32  ;;  %v990_v5 = vpop.f32.mrf.mxu0  ;;  %v3722_v32 = vrot.slane %v4452_v7, 9 }
 0x11a   : > { %v5628_v60 = vadd.f32 %v977_v50, %v804_v52  ;;  %v825_v51 = vadd.f32 %v4130_v27, %v5411_v58  ;;  %4336 = vmatprep.mubr.msk.bf16.mxu1 %vm493_vm3, %v5432_v28  ;;  %v2656_v16 = vsel %vm4559_vm4, %v2654_v57, %v2655_v19 }
 0x11b   : > { %v816_v9 = vpop.f32.mrf.mxu1  ;;  %v4165_v41 = vpop.f32.mrf.mxu0 }
 0x11c   : > { %v5633_v17 = vadd.f32 %v4164_v56, %v825_v51  ;;  %v817_v35 = vadd.f32 %v816_v9, %v5428_v30 }
 0x11d   : > { %v4131_v18 = vpop.f32.mrf.mxu1  ;;  %v993_v21 = vpop.f32.mrf.mxu0 }
 0x11e   : > { %v5638_v47 = vadd.f32 %v990_v5, %v817_v35  ;;  %v828_v58 = vadd.f32 %v4131_v18, %v5438_v12  ;;  %v2653_v12 = vsel %vm4559_vm4, %v3722_v32, %v2652_v61 }
 0x11f   : > { %v819_v34 = vpop.f32.mrf.mxu1  ;;  %v4168_v50 = vpop.f32.mrf.mxu0  ;;  %4371 = vmatmul.mubr.msk.bf16.gmra.mxu0 %vm493_vm3, %v5474_v0  ;;  %v3723_v3 = vcombine.low %v2653_v12, %v2656_v16 }
 0x120   : > { %v5643_v28 = vadd.f32 %v4165_v41, %v828_v58  ;;  %v820_v30 = vadd.f32 %v819_v34, %v5444_v1  ;;  %4374 = vmatprep.mubr.msk.bf16.mxu0 %vm493_vm3, %v5476_v62 }
 0x121   : > { %v4134_v63 = vpop.f32.mrf.mxu1  ;;  %4337 = vmatmul.mubr.msk.bf16.gmra.mxu1 %vm493_vm3, %v5434_v10  ;;  %v1006_v13 = vpop.f32.mrf.mxu0 }
 0x122   : > { %v5654_v56 = vadd.f32 %v993_v21, %v820_v30  ;;  %v841_v52 = vadd.f32 %v4134_v63, %v5457_v53  ;;  %4340 = vmatprep.mubr.msk.bf16.mxu1 %vm493_vm3, %v5474_v0 }
 0x123   : > { %v832_v1 = vpop.f32.mrf.mxu1  ;;  %v4169_v27 = vpop.f32.mrf.mxu0 }
 0x124   : > { %v5659_v5 = vadd.f32 %v4168_v50, %v841_v52  ;;  %v833_v10 = vadd.f32 %v832_v1, %v5470_v11 }
 0x125   : > { %v4135_v51 = vpop.f32.mrf.mxu1  ;;  %v1009_v9 = vpop.f32.mrf.mxu0 }
 0x126   : > { %v5662_v61 = vadd.f32 %v1006_v13, %v833_v10  ;;  %v844_v8 = vadd.f32 %v4135_v51, %v5480_v15 }
 0x127   : > { %v835_v41 = vpop.f32.mrf.mxu1  ;;  %v4172_v35 = vpop.f32.mrf.mxu0  ;;  %4375 = vmatmul.mubr.msk.bf16.gmra.mxu0 %vm493_vm3, %v5512_v54 }
 0x128   : > { %v5667_v53 = vadd.f32 %v4169_v27, %v844_v8  ;;  %v836_v0 = vadd.f32 %v835_v41, %v5484_v49  ;;  %4378 = vmatprep.mubr.msk.bf16.mxu0 %vm493_vm3, %v3723_v3 }
 0x129   : > { %v4138_v18 = vpop.f32.mrf.mxu1  ;;  %4341 = vmatmul.mubr.msk.bf16.gmra.mxu1 %vm493_vm3, %v5476_v62  ;;  %v1022_v11 = vpop.f32.mrf.mxu0 }
 0x12a   : > { %v5673_v21 = vadd.f32 %v1009_v9, %v836_v0  ;;  %v857_v15 = vadd.f32 %v4138_v18, %v5496_v59  ;;  %4344 = vmatprep.mubr.msk.bf16.mxu1 %vm493_vm3, %v5512_v54 }
 0x12b   : > { %v848_v7 = vpop.f32.mrf.mxu1  ;;  %v4173_v32 = vpop.f32.mrf.mxu0 }
 0x12c   : > { %v5678_v57 = vadd.f32 %v4172_v35, %v857_v15  ;;  %v849_v49 = vadd.f32 %v848_v7, %v5508_v14 }
 0x12d   : > { %v4139_v19 = vpop.f32.mrf.mxu1  ;;  %v1025_v58 = vpop.f32.mrf.mxu0 }
 0x12e   : > { %v5681_v34 = vadd.f32 %v1022_v11, %v849_v49  ;;  %v860_v62 = vadd.f32 %v4139_v19, %v5514_v33 }
 0x12f   : > { %v851_v50 = vpop.f32.mrf.mxu1  ;;  %v4176_v30 = vpop.f32.mrf.mxu0  ;;  %4379 = vmatmul.mubr.msk.bf16.gmra.mxu0 %vm493_vm3, %v3742_v23 }
 0x130   : > { %v5688_v59 = vadd.f32 %v4173_v32, %v860_v62  ;;  %v852_v54 = vadd.f32 %v851_v50, %v5518_v37 }
 0x131   : > { %v4142_v63 = vpop.f32.mrf.mxu1  ;;  %4345 = vmatmul.mubr.msk.bf16.gmra.mxu1 %vm493_vm3, %v3723_v3  ;;  %v1038_v14 = vpop.f32.mrf.mxu0 }
 0x132   : > { %v5692_v13 = vadd.f32 %v1025_v58, %v852_v54  ;;  %v873_v12 = vadd.f32 %v4142_v63, %v5526_v48 }
 0x133   : > { %v864_v33 = vpop.f32.mrf.mxu1  ;;  %v4177_v16 = vpop.f32.mrf.mxu0 }
 0x134   : > { %v5695_v52 = vadd.f32 %v4176_v30, %v873_v12  ;;  %v865_v42 = vadd.f32 %v864_v33, %v5533_v38 }
 0x135   : > { %v4143_v39 = vpop.f32.mrf.mxu1  ;;  %v1041_v23 = vpop.f32.mrf.mxu0 }
 0x136   : > { %v5698_v1 = vadd.f32 %v1038_v14, %v865_v42  ;;  %v876_v37 = vadd.f32 %v4143_v39, %v5537_v45 }
 0x137   : > { %v867_v27 = vpop.f32.mrf.mxu1  ;;  %v4216_v10 = vpop.f32.mrf.mxu0 }
 0x138   : > { %v5701_v3 = vadd.f32 %v4177_v16, %v876_v37  ;;  %v868_v51 = vadd.f32 %v867_v27, %v5541_v36 }
 0x139   : > { %v4182_v9 = vpop.f32.mrf.mxu1  ;;  %v1835_v48 = vpop.f32.mrf.mxu0 }
 0x13a   : > { %v5704_v8 = vadd.f32 %v1041_v23, %v868_v51  ;;  %v1736_v41 = vadd.f32 %v4182_v9, %v5552_v46 }
 0x13b   : > { %v1607_v35 = vpop.f32.mrf.mxu1  ;;  %v4217_v38 = vpop.f32.mrf.mxu0 }
 0x13c   : > { %v5707_v0 = vadd.f32 %v4216_v10, %v1736_v41  ;;  %v1734_v18 = vadd.f32 %v1607_v35, %v5555_v2 }
 0x13d   : > { %v4183_v11 = vpop.f32.mrf.mxu1  ;;  %v1838_v45 = vpop.f32.mrf.mxu0 }
 0x13e   : > { %v5710_v15 = vadd.f32 %v1835_v48, %v1734_v18  ;;  %v1737_v7 = vadd.f32 %v4183_v11, %v5560_v24 }
 0x13f   : > { %v1610_v32 = vpop.f32.mrf.mxu1  ;;  %v4220_v36 = vpop.f32.mrf.mxu0 }
 0x140   : > { %v5713_v49 = vadd.f32 %v4217_v38, %v1737_v7  ;;  %v1735_v19 = vadd.f32 %v1610_v32, %v5567_v43 }
 0x141   : > { %v4186_v58 = vpop.f32.mrf.mxu1  ;;  %v1851_v46 = vpop.f32.mrf.mxu0 }
 0x142   : > { %v5716_v62 = vadd.f32 %v1838_v45, %v1735_v19  ;;  %v1740_v50 = vadd.f32 %v4186_v58, %v5572_v26 }
 0x143   : > { %v1623_v30 = vpop.f32.mrf.mxu1  ;;  %v4221_v2 = vpop.f32.mrf.mxu0 }
 0x144   : > { %v5719_v54 = vadd.f32 %v4220_v36, %v1740_v50  ;;  %v1738_v63 = vadd.f32 %v1623_v30, %v5575_v44 }
 0x145   : > { %v4187_v14 = vpop.f32.mrf.mxu1  ;;  %v1854_v24 = vpop.f32.mrf.mxu0 }
 0x146   : > { %v5722_v12 = vadd.f32 %v1851_v46, %v1738_v63  ;;  %v1741_v33 = vadd.f32 %v4187_v14, %v5580_v25 }
 0x147   : > { %v1626_v16 = vpop.f32.mrf.mxu1  ;;  %v4224_v43 = vpop.f32.mrf.mxu0 }
 0x148   : > { %v5725_v42 = vadd.f32 %v4221_v2, %v1741_v33  ;;  %v1739_v39 = vadd.f32 %v1626_v16, %v5587_v22 }
 0x149   : > { %v4190_v23 = vpop.f32.mrf.mxu1  ;;  %v1867_v26 = vpop.f32.mrf.mxu0 }
 0x14a   : > { %v5728_v37 = vadd.f32 %v1854_v24, %v1739_v39  ;;  %v1744_v27 = vadd.f32 %v4190_v23, %v5592_v40 }
 0x14b   : > { %v1639_v10 = vpop.f32.mrf.mxu1  ;;  %v4225_v44 = vpop.f32.mrf.mxu0 }
 0x14c   : > { %v5731_v51 = vadd.f32 %v4224_v43, %v1744_v27  ;;  %v1742_v9 = vadd.f32 %v1639_v10, %v5595_v4 }
 0x14d   : > { %v4191_v48 = vpop.f32.mrf.mxu1  ;;  %v1870_v25 = vpop.f32.mrf.mxu0 }
 0x14e   : > { %v5734_v41 = vadd.f32 %v1867_v26, %v1742_v9  ;;  %v1745_v35 = vadd.f32 %v4191_v48, %v5600_v31 }
 0x14f   : > { %v1642_v38 = vpop.f32.mrf.mxu1  ;;  %v4228_v22 = vpop.f32.mrf.mxu0 }
 0x150   : > { %v5737_v18 = vadd.f32 %v4225_v44, %v1745_v35  ;;  %v1743_v11 = vadd.f32 %v1642_v38, %v5607_v55 }
 0x151   : > { %v4194_v45 = vpop.f32.mrf.mxu1  ;;  %v1883_v40 = vpop.f32.mrf.mxu0 }
 0x152   : > { %v5740_v7 = vadd.f32 %v1870_v25, %v1743_v11  ;;  %v1748_v32 = vadd.f32 %v4194_v45, %v5612_v20 }
 0x153   : > { %v1655_v36 = vpop.f32.mrf.mxu1  ;;  %v4229_v4 = vpop.f32.mrf.mxu0 }
 0x154   : > { %v5743_v19 = vadd.f32 %v4228_v22, %v1748_v32  ;;  %v1746_v58 = vadd.f32 %v1655_v36, %v5615_v6 }
 0x155   : > { %v4195_v46 = vpop.f32.mrf.mxu1  ;;  %v1886_v31 = vpop.f32.mrf.mxu0 }
 0x156   : > { %v5746_v50 = vadd.f32 %v1883_v40, %v1746_v58  ;;  %v1749_v30 = vadd.f32 %v4195_v46, %v5620_v29 }
 0x157   : > { %v1658_v2 = vpop.f32.mrf.mxu1  ;;  %v4232_v55 = vpop.f32.mrf.mxu0 }
 0x158   : > { %v5749_v63 = vadd.f32 %v4229_v4, %v1749_v30  ;;  %v1747_v14 = vadd.f32 %v1658_v2, %v5628_v60 }
 0x159   : > { %v4198_v24 = vpop.f32.mrf.mxu1  ;;  %v1899_v20 = vpop.f32.mrf.mxu0 }
 0x15a   : > { %v5752_v33 = vadd.f32 %v1886_v31, %v1747_v14  ;;  %v1752_v16 = vadd.f32 %v4198_v24, %v5633_v17 }
 0x15b   : > { %v1671_v43 = vpop.f32.mrf.mxu1  ;;  %v4233_v6 = vpop.f32.mrf.mxu0 }
 0x15c   : > { %v5755_v39 = vadd.f32 %v4232_v55, %v1752_v16  ;;  %v1750_v23 = vadd.f32 %v1671_v43, %v5638_v47 }
 0x15d   : > { %v4199_v26 = vpop.f32.mrf.mxu1  ;;  %v1902_v29 = vpop.f32.mrf.mxu0 }
 0x15e   : > { %v5758_v27 = vadd.f32 %v1899_v20, %v1750_v23  ;;  %v1753_v10 = vadd.f32 %v4199_v26, %v5643_v28 }
 0x15f   : > { %v1674_v44 = vpop.f32.mrf.mxu1  ;;  %v4236_v60 = vpop.f32.mrf.mxu0 }
 0x160   : > { %v5761_v9 = vadd.f32 %v4233_v6, %v1753_v10  ;;  %v1751_v48 = vadd.f32 %v1674_v44, %v5654_v56 }
 0x161   : > { %v4202_v25 = vpop.f32.mrf.mxu1  ;;  %v1915_v17 = vpop.f32.mrf.mxu0 }
 0x162   : > { %v5764_v35 = vadd.f32 %v1902_v29, %v1751_v48  ;;  %v1756_v38 = vadd.f32 %v4202_v25, %v5659_v5 }
 0x163   : > { %v1687_v22 = vpop.f32.mrf.mxu1  ;;  %v4237_v47 = vpop.f32.mrf.mxu0 }
 0x164   : > { %v5767_v11 = vadd.f32 %v4236_v60, %v1756_v38  ;;  %v1754_v45 = vadd.f32 %v1687_v22, %v5662_v61 }
 0x165   : > { %v4203_v40 = vpop.f32.mrf.mxu1  ;;  %v1918_v28 = vpop.f32.mrf.mxu0 }
 0x166   : > { %v5770_v32 = vadd.f32 %v1915_v17, %v1754_v45  ;;  %v1757_v36 = vadd.f32 %v4203_v40, %v5667_v53 }
 0x167   : > { %v1690_v4 = vpop.f32.mrf.mxu1  ;;  %v4240_v56 = vpop.f32.mrf.mxu0 }
 0x168   : > { %6111 = vst [vmem:[#allocation11_spill] sm:$0xff] %v5770_v32  ;;  %v5773_v58 = vadd.f32 %v4237_v47, %v1757_v36  ;;  %v1755_v46 = vadd.f32 %v1690_v4, %v5673_v21 }
 0x169   : > { %v4206_v31 = vpop.f32.mrf.mxu1  ;;  %v1931_v5 = vpop.f32.mrf.mxu0 }
 0x16a   : > { %6112 = vst [vmem:[#allocation12_spill] sm:$0xff] %v5773_v58  ;;  %v5776_v30 = vadd.f32 %v1918_v28, %v1755_v46  ;;  %v1760_v2 = vadd.f32 %v4206_v31, %v5678_v57 }
 0x16b   : > { %v1703_v55 = vpop.f32.mrf.mxu1  ;;  %v4241_v61 = vpop.f32.mrf.mxu0 }
 0x16c   : > { %6113 = vst [vmem:[#allocation13_spill] sm:$0xff] %v5776_v30  ;;  %v5779_v14 = vadd.f32 %v4240_v56, %v1760_v2  ;;  %v1758_v24 = vadd.f32 %v1703_v55, %v5681_v34 }
 0x16d   : > { %v4207_v20 = vpop.f32.mrf.mxu1  ;;  %v1934_v53 = vpop.f32.mrf.mxu0 }
 0x16e   : > { %v5782_v16 = vadd.f32 %v1931_v5, %v1758_v24  ;;  %v1761_v43 = vadd.f32 %v4207_v20, %v5688_v59 }
 0x16f   : > { %v1706_v6 = vpop.f32.mrf.mxu1  ;;  %v4244_v21 = vpop.f32.mrf.mxu0 }
 0x170   : > { %6114 = vst [vmem:[#allocation3_spill] sm:$0xff] %v5782_v16  ;;  %v5785_v23 = vadd.f32 %v4241_v61, %v1761_v43  ;;  %v1759_v26 = vadd.f32 %v1706_v6, %v5692_v13 }
 0x171   : > { %v4210_v29 = vpop.f32.mrf.mxu1  ;;  %v1947_v57 = vpop.f32.mrf.mxu0 }
 0x172   : > { %6115 = vst [vmem:[#allocation2_spill] sm:$0xff] %v5785_v23  ;;  %v5788_v10 = vadd.f32 %v1934_v53, %v1759_v26  ;;  %v1764_v44 = vadd.f32 %v4210_v29, %v5695_v52 }
 0x173   : > { %v1719_v60 = vpop.f32.mrf.mxu1  ;;  %v4245_v34 = vpop.f32.mrf.mxu0 }
 0x174   : > { %6116 = vst [vmem:[#allocation14_spill] sm:$0xff] %v5788_v10  ;;  %v5791_v48 = vadd.f32 %v4244_v21, %v1764_v44  ;;  %v1762_v25 = vadd.f32 %v1719_v60, %v5698_v1 }
 0x175   : > { %v4211_v17 = vpop.f32.mrf.mxu1  ;;  %v1950_v59 = vpop.f32.mrf.mxu0 }
 0x176   : > { %v5794_v38 = vadd.f32 %v1947_v57, %v1762_v25  ;;  %v1765_v22 = vadd.f32 %v4211_v17, %v5701_v3 }
 0x177   : > { %v1722_v47 = vpop.f32.mrf.mxu1  ;;  %v4284_v13 = vpop.f32.mrf.mxu0 }
 0x178   : > { %6117 = vst [vmem:[#allocation16_spill] sm:$0xff] %v5794_v38  ;;  %v5797_v45 = vadd.f32 %v4245_v34, %v1765_v22  ;;  %v1763_v40 = vadd.f32 %v1722_v47, %v5704_v8 }
 0x179   : > { %v4250_v28 = vpop.f32.mrf.mxu1  ;;  %v2488_v52 = vpop.f32.mrf.mxu0 }
 0x17a   : > { %6118 = vst [vmem:[#allocation5_spill] sm:$0xff] %v5797_v45  ;;  %v5800_v36 = vadd.f32 %v1950_v59, %v1763_v40  ;;  %v2192_v4 = vadd.f32 %v4250_v28, %v5707_v0 }
 0x17b   : > { %v2063_v56 = vpop.f32.mrf.mxu1  ;;  %v5803_v1 = vpop.f32.mrf.mxu0 }
 0x17c   : > { %6119 = vst [vmem:[#allocation7_spill] sm:$0xff] %v5800_v36  ;;  %v5805_v46 = vadd.f32 %v4284_v13, %v2192_v4  ;;  %v2190_v31 = vadd.f32 %v2063_v56, %v5710_v15 }
 0x17d   : > { %v5808_v3 = vpop.f32.mrf.mxu1  ;;  %v5810_v5 = vpop.f32.mrf.mxu0 }
 0x17e   : > { %v5812_v2 = vadd.f32 %v2488_v52, %v2190_v31 }
 0x17f   : > { %v5814_v8 = vpop.f32.mrf.mxu1  ;;  %v4288_v55 = vpop.f32.mrf.mxu0 }
 0x181   : > { %v4254_v61 = vpop.f32.mrf.mxu1  ;;  %v5816_v24 = vpop.f32.mrf.mxu0 }
 0x182   : > { %v2196_v0 = vadd.f32 %v4254_v61, %v5719_v54 }
 0x183   : > { %v5819_v20 = vpop.f32.mrf.mxu1  ;;  %v5821_v53 = vpop.f32.mrf.mxu0 }
 0x184   : > { %v5823_v43 = vadd.f32 %v4288_v55, %v2196_v0 }
 0x185   : > { %v5825_v15 = vpop.f32.mrf.mxu1  ;;  %v5827_v6 = vpop.f32.mrf.mxu0 }
 0x187   : > { %v5829_v21 = vpop.f32.mrf.mxu1  ;;  %v4292_v26 = vpop.f32.mrf.mxu0 }
 0x189   : > { %v4258_v29 = vpop.f32.mrf.mxu1  ;;  %v5831_v57 = vpop.f32.mrf.mxu0 }
 0x18a   : > { %v2200_v44 = vadd.f32 %v4258_v29, %v5731_v51 }
 0x18b   : > { %v5834_v60 = vpop.f32.mrf.mxu1  ;;  %v5836_v54 = vpop.f32.mrf.mxu0 }
 0x18c   : > { %v5838_v34 = vadd.f32 %v4292_v26, %v2200_v44 }
 0x18d   : > { %v5840_v25 = vpop.f32.mrf.mxu1  ;;  %v5842_v17 = vpop.f32.mrf.mxu0 }
 0x18f   : > { %v5844_v59 = vpop.f32.mrf.mxu1  ;;  %v4296_v22 = vpop.f32.mrf.mxu0 }
 0x191   : > { %v4262_v47 = vpop.f32.mrf.mxu1  ;;  %v5846_v13 = vpop.f32.mrf.mxu0 }
 0x192   : > { %v2204_v40 = vadd.f32 %v4262_v47, %v5743_v19 }
 0x193   : > { %v5849_v28 = vpop.f32.mrf.mxu1  ;;  %v5851_v51 = vpop.f32.mrf.mxu0 }
 0x194   : > { %v5853_v52 = vadd.f32 %v4296_v22, %v2204_v40 }
 0x195   : > { %v5855_v4 = vpop.f32.mrf.mxu1  ;;  %v5857_v56 = vpop.f32.mrf.mxu0 }
 0x197   : > { %v5859_v31 = vpop.f32.mrf.mxu1  ;;  %v4300_v55 = vpop.f32.mrf.mxu0 }
 0x199   : > { %v4266_v61 = vpop.f32.mrf.mxu1  ;;  %v5861_v0 = vpop.f32.mrf.mxu0 }
 0x19a   : > { %v2208_v26 = vadd.f32 %v4266_v61, %v5755_v39 }
 0x19b   : > { %v5864_v29 = vpop.f32.mrf.mxu1  ;;  %v5866_v19 = vpop.f32.mrf.mxu0 }
 0x19c   : > { %v5868_v44 = vadd.f32 %v4300_v55, %v2208_v26 }
 0x19d   : > { %v5870_v22 = vpop.f32.mrf.mxu1  ;;  %v5872_v47 = vpop.f32.mrf.mxu0 }
 0x19e   : > { %6120 = vst [vmem:[#allocation4_spill] sm:$0xff] %v5872_v47 }
 0x19f   : > { %v5874_v40 = vpop.f32.mrf.mxu1  ;;  %v4304_v36 = vpop.f32.mrf.mxu0 }
 0x1a1   : > { %v4270_v45 = vpop.f32.mrf.mxu1  ;;  %v5876_v38 = vpop.f32.mrf.mxu0 }
 0x1a2   : > { %6121 = vst [vmem:[#allocation17_spill] sm:$0xff] %v5876_v38  ;;  %v2212_v10 = vadd.f32 %v4270_v45, %v5767_v11 }
 0x1a3   : > { %v5879_v23 = vpop.f32.mrf.mxu1  ;;  %v5881_v39 = vpop.f32.mrf.mxu0 }
 0x1a4   : > { %6122 = vst [vmem:[#allocation6_spill] sm:$0xff] %v5881_v39  ;;  %v5883_v61 = vadd.f32 %v4304_v36, %v2212_v10 }
 0x1a5   : > { %v5885_v55 = vpop.f32.mrf.mxu1  ;;  %v5887_v26 = vpop.f32.mrf.mxu0 }
 0x1a6   : > { %6123 = vst [vmem:[#allocation15_spill] sm:$0xff] %v5883_v61  ;;  %6124 = vst [vmem:[#allocation9_spill] sm:$0xff] %v5885_v55 }
 0x1a7   : > { %6125 = vst [vmem:[#allocation8_spill] sm:$0xff] %v5887_v26  ;;  %v5889_v16 = vpop.f32.mrf.mxu1  ;;  %v4308_v30 = vpop.f32.mrf.mxu0 }
 0x1a8   : > { %6126 = vst [vmem:[#allocation10_spill] sm:$0xff] %v5889_v16 }
 0x1a9   : > { %v4274_v58 = vpop.f32.mrf.mxu1  ;;  %v5891_v32 = vpop.f32.mrf.mxu0 }
 0x1aa   : > { %6127 = vst [vmem:[#allocation18_spill] sm:$0xff] %v5891_v32  ;;  %v2216_v38 = vadd.f32 %v4274_v58, %v5779_v14 }
 0x1ab   : > { %v5894_v47 = vpop.f32.mrf.mxu1  ;;  %v5896_v11 = vpop.f32.mrf.mxu0 }
 0x1ac   : > { %6128 = vst [vmem:[#allocation19_spill] sm:$0xff] %v5896_v11  ;;  %v5898_v45 = vadd.f32 %v4308_v30, %v2216_v38  ;;  %v2193_v11 = vadd.f32 %v5808_v3, %v5713_v49  ;;  %v2194_v49 = vadd.f32 %v5819_v20, %v5722_v12 }
 0x1ad   : > { %v5900_v10 = vpop.f32.mrf.mxu1  ;;  %v5902_v36 = vpop.f32.mrf.mxu0 }
 0x1ae   : > { %6129 = vst [vmem:[#allocation20_spill] sm:$0xff] %v5898_v45  ;;  %6130 = vst [vmem:[#allocation21_spill] sm:$0xff] %v5900_v10 }
 0x1af   : > { %6131 = vst [vmem:[#allocation22_spill] sm:$0xff] %v5902_v36  ;;  %v5904_v61 = vpop.f32.mrf.mxu1  ;;  %v4312_v26 = vpop.f32.mrf.mxu0 }
 0x1b0   : > { %6132 = vst [vmem:[#allocation23_spill] sm:$0xff] %v5904_v61 }
 0x1b1   : > { %v4278_v39 = vpop.f32.mrf.mxu1  ;;  %v5906_v16 = vpop.f32.mrf.mxu0 }
 0x1b2   : > { %6133 = vst [vmem:[#allocation24_spill] sm:$0xff] %v5906_v16  ;;  %v2220_v32 = vadd.f32 %v4278_v39, %v5791_v48  ;;  %v2191_v48 = vadd.f32 %v5814_v8, %v5716_v62  ;;  %v2197_v62 = vadd.f32 %v5825_v15, %v5725_v42  ;;  %v2619_v42 = vadd.f32 %v5816_v24, %v2194_v49 }
 0x1b3   : > { %v5909_v55 = vpop.f32.mrf.mxu1  ;;  %v5911_v58 = vpop.f32.mrf.mxu0 }
 0x1b4   : > { %6134 = vst [vmem:[#allocation25_spill] sm:$0xff] %v5909_v55  ;;  %6135 = vst [vmem:[#allocation26_spill] sm:$0xff] %v5911_v58  ;;  %v5913_v14 = vadd.f32 %v4312_v26, %v2220_v32  ;;  %v2618_v32 = vadd.f32 %v5803_v1, %v2193_v11  ;;  %v2622_v15 = vadd.f32 %v5821_v53, %v2197_v62 }
 0x1b5   : > { %v5915_v30 = vpop.f32.mrf.mxu1  ;;  %v5917_v38 = vpop.f32.mrf.mxu0 }
 0x1b6   : > { %6136 = vst [vmem:[#allocation27_spill] sm:$0xff] %v5913_v14  ;;  %6137 = vst [vmem:[#allocation28_spill] sm:$0xff] %v5915_v30 }
 0x1b7   : > { %6138 = vst [vmem:[#allocation29_spill] sm:$0xff] %v5917_v38  ;;  %v5919_v36 = vpop.f32.mrf.mxu1  ;;  %v4352_v45 = vpop.f32.mrf.mxu0 }
 0x1b8   : > { %6139 = vst [vmem:[#allocation30_spill] sm:$0xff] %v5919_v36  ;;  %v2616_v36 = vadd.f32 %v5810_v5, %v2191_v48 }
 0x1b9   : > { %v4318_v16 = vpop.f32.mrf.mxu1  ;;  %v2912_v61 = vpop.f32.mrf.mxu0 }
 0x1ba   : > { %v2829_v26 = vadd.f32 %v4318_v16, %v5805_v46  ;;  %v2195_v46 = vadd.f32 %v5829_v21, %v5728_v37 }
 0x1bb   : > { %v2700_v39 = vpop.f32.mrf.mxu1  ;;  %v4353_v58 = vpop.f32.mrf.mxu0 }
 0x1bc   : > { %v2827_v38 = vadd.f32 %v2700_v39, %v5812_v2  ;;  %v3041_v10 = vadd.f32 %v4352_v45, %v2829_v26  ;;  %v2201_v26 = vadd.f32 %v5840_v25, %v5737_v18 }
 0x1bd   : > { %v4319_v14 = vpop.f32.mrf.mxu1  ;;  %v2915_v30 = vpop.f32.mrf.mxu0 }
 0x1be   : > { %v2830_v55 = vadd.f32 %v4319_v14, %v2618_v32  ;;  %v3039_v1 = vadd.f32 %v2912_v61, %v2827_v38  ;;  %v2620_v14 = vadd.f32 %v5827_v6, %v2195_v46  ;;  %v2198_v38 = vadd.f32 %v5834_v60, %v5734_v41 }
 0x1bf   : > { %v2703_v3 = vpop.f32.mrf.mxu1  ;;  %v4356_v8 = vpop.f32.mrf.mxu0  ;;  %v3271_v39 = vmul.f32 %v3041_v10, %v3041_v10 }
 0x1c0   : > { %v3042_v11 = vadd.f32 %v4353_v58, %v2830_v55  ;;  %v2828_v16 = vadd.f32 %v2703_v3, %v2616_v36  ;;  %v3269_v37 = vmul.f32 %v3039_v1, %v3039_v1 }
 0x1c1   : > { %v4322_v5 = vpop.f32.mrf.mxu1  ;;  %v2928_v12 = vpop.f32.mrf.mxu0 }
 0x1c2   : > { %v3836_v2 = vpack.c.bf16 %v3042_v11, %v3041_v10  ;;  %v3040_v20 = vadd.f32 %v2915_v30, %v2828_v16  ;;  %v2833_v61 = vadd.f32 %v4322_v5, %v5823_v43  ;;  %v3272_v49 = vmul.f32 %v3042_v11, %v3042_v11 }
 0x1c3   : > { %v2716_v55 = vpop.f32.mrf.mxu1  ;;  %v4357_v45 = vpop.f32.mrf.mxu0  ;;  %v2623_v5 = vadd.f32 %v5831_v57, %v2198_v38  ;;  %v2205_v38 = vadd.f32 %v5855_v4, %v5749_v63  ;;  %v2203_v63 = vadd.f32 %v5859_v31, %v5752_v33 }
 0x1c4   : > { %3908 = vst [vmem:[%s5939_s30 + $0x8] sm:$0xff] %v3836_v2   ;;  %v3831_v21 = vpack.c.bf16 %v3040_v20, %v3039_v1  ;;  %v3231_v36 = vadd.f32 %v3040_v20, %v3039_v1  ;;  %v3270_v58 = vmul.f32 %v3040_v20, %v3040_v20  ;;  %v2831_v30 = vadd.f32 %v2716_v55, %v2619_v42 }
 0x1c5   : > { %v4323_v48 = vpop.f32.mrf.mxu1  ;;  %v2931_v24 = vpop.f32.mrf.mxu0  ;;  %v3045_v62 = vadd.f32 %v4356_v8, %v2833_v61  ;;  %v2628_v31 = vadd.f32 %v5857_v56, %v2203_v63 }
 0x1c6   : > { %3832 = vst [vmem:[%s5939_s30] sm:$0xff] %v3831_v21   ;;  %v3232_v53 = vadd.f32 %v3231_v36, %v3041_v10  ;;  %v3301_v32 = vadd.f32 %v3270_v58, %v3269_v37  ;;  %v2834_v43 = vadd.f32 %v4323_v48, %v2622_v15  ;;  %v3043_v3 = vadd.f32 %v2928_v12, %v2831_v30 }
 0x1c7   : > { %v2719_v1 = vpop.f32.mrf.mxu1  ;;  %v4360_v16 = vpop.f32.mrf.mxu0  ;;  %v2199_v10 = vadd.f32 %v5844_v59, %v5740_v7 }
 0x1c8   : > { %v3302_v6 = vadd.f32 %v3301_v32, %v3271_v39  ;;  %v3233_v46 = vadd.f32 %v3232_v53, %v3042_v11  ;;  %v3046_v41 = vadd.f32 %v4357_v45, %v2834_v43  ;;  %v2832_v60 = vadd.f32 %v2719_v1, %v2620_v14 }
 0x1c9   : > { %v4326_v2 = vpop.f32.mrf.mxu1  ;;  %v2944_v20 = vpop.f32.mrf.mxu0  ;;  %v3273_v15 = vmul.f32 %v3043_v3, %v3043_v3  ;;  %v2626_v11 = vadd.f32 %v5836_v54, %v2201_v26  ;;  %v2624_v58 = vadd.f32 %v5842_v17, %v2199_v10  ;;  %v2202_v14 = vadd.f32 %v5849_v28, %v5746_v50 }
 0x1ca   : > { %v3234_v42 = vadd.f32 %v3233_v46, %v3043_v3  ;;  %v3303_v18 = vadd.f32 %v3302_v6, %v3272_v49  ;;  %v3846_v25 = vpack.c.bf16 %v3046_v41, %v3045_v62  ;;  %v3044_v8 = vadd.f32 %v2931_v24, %v2832_v60 }
 0x1cb   : > { %v2732_v12 = vpop.f32.mrf.mxu1  ;;  %v4361_v61 = vpop.f32.mrf.mxu0  ;;  %v2837_v45 = vadd.f32 %v4326_v2, %v5838_v34  ;;  %v3275_v54 = vmul.f32 %v3045_v62, %v3045_v62  ;;  %v3276_v49 = vmul.f32 %v3046_v41, %v3046_v41  ;;  %v2627_v28 = vadd.f32 %v5846_v13, %v2202_v14 }
 0x1cc   : > { %v3304_v55 = vadd.f32 %v3303_v18, %v3273_v15  ;;  %3910 = vst [vmem:[%s5939_s30 + $0x18] sm:$0xff] %v3846_v25   ;;  %v2835_v57 = vadd.f32 %v2732_v12, %v2623_v5  ;;  %v3841_v37 = vpack.c.bf16 %v3044_v8, %v3043_v3  ;;  %v3235_v21 = vadd.f32 %v3234_v42, %v3044_v8 }
 0x1cd   : > { %v3274_v7 = vmul.f32 %v3044_v8, %v3044_v8  ;;  %v4327_v59 = vpop.f32.mrf.mxu1  ;;  %v2947_v36 = vpop.f32.mrf.mxu0  ;;  %v3049_v32 = vadd.f32 %v4360_v16, %v2837_v45  ;;  %v2630_v6 = vadd.f32 %v5851_v51, %v2205_v38  ;;  %v2206_v51 = vadd.f32 %v5864_v29, %v5758_v27 }
 0x1ce   : > { %v2838_v30 = vadd.f32 %v4327_v59, %v2626_v11  ;;  %3909 = vst [vmem:[%s5939_s30 + $0x10] sm:$0xff] %v3841_v37   ;;  %v3236_v48 = vadd.f32 %v3235_v21, %v3045_v62  ;;  %v3047_v34 = vadd.f32 %v2944_v20, %v2835_v57  ;;  %v2209_v25 = vadd.f32 %v5870_v22, %v5761_v9 }
 0x1cf   : > { %v3305_v24 = vadd.f32 %v3304_v55, %v3274_v7  ;;  %v2735_v39 = vpop.f32.mrf.mxu1  ;;  %v4364_v53 = vpop.f32.mrf.mxu0  ;;  %v3279_v12 = vmul.f32 %v3049_v32, %v3049_v32  ;;  %v2631_v29 = vadd.f32 %v5861_v0, %v2206_v51  ;;  %v2207_v9 = vadd.f32 %v5874_v40, %v5764_v35  ;;  %v6140_v40 = vld [vmem:[#allocation4_spill] sm:$0xff] }
 0x1d0   : > { %v3050_v43 = vadd.f32 %v4361_v61, %v2838_v30  ;;  %v2836_v26 = vadd.f32 %v2735_v39, %v2624_v58  ;;  %v3237_v3 = vadd.f32 %v3236_v48, %v3046_v41  ;;  %v3277_v60 = vmul.f32 %v3047_v34, %v3047_v34 }
 0x1d1   : > { %v3306_v17 = vadd.f32 %v3305_v24, %v3275_v54  ;;  %v4330_v1 = vpop.f32.mrf.mxu1  ;;  %v2960_v50 = vpop.f32.mrf.mxu0  ;;  %v2634_v14 = vadd.f32 %v5866_v19, %v2209_v25  ;;  %v6147_v25 = vld [vmem:[#allocation6_spill] sm:$0xff] }
 0x1d2   : > { %v3856_v4 = vpack.c.bf16 %v3050_v43, %v3049_v32  ;;  %v3048_v62 = vadd.f32 %v2947_v36, %v2836_v26  ;;  %v3238_v46 = vadd.f32 %v3237_v3, %v3047_v34  ;;  %v2841_v20 = vadd.f32 %v4330_v1, %v5853_v52  ;;  %v6142_v3 = vld [vmem:[#allocation12_spill] sm:$0xff]  ;;  %v6143_v1 = vld [vmem:[#allocation9_spill] sm:$0xff] }
 0x1d3   : > { %v3307_v16 = vadd.f32 %v3306_v17, %v3276_v49  ;;  %v2748_v5 = vpop.f32.mrf.mxu1  ;;  %v4365_v10 = vpop.f32.mrf.mxu0  ;;  %v3280_v7 = vmul.f32 %v3050_v43, %v3050_v43  ;;  %v2632_v49 = vadd.f32 %v6140_v40, %v2207_v9  ;;  %v6141_v17 = vld [vmem:[#allocation11_spill] sm:$0xff] }
 0x1d4   : > { %3912 = vst [vmem:[%s5939_s30 + $0x28] sm:$0xff] %v3856_v4   ;;  %v3851_v2 = vpack.c.bf16 %v3048_v62, %v3047_v34  ;;  %v3278_v41 = vmul.f32 %v3048_v62, %v3048_v62  ;;  %v2839_v42 = vadd.f32 %v2748_v5, %v2627_v28  ;;  %v3239_v15 = vadd.f32 %v3238_v46, %v3048_v62 }
 0x1d5   : > { %v3308_v13 = vadd.f32 %v3307_v16, %v3277_v60  ;;  %v4331_v18 = vpop.f32.mrf.mxu1  ;;  %v2963_v33 = vpop.f32.mrf.mxu0  ;;  %v3053_v57 = vadd.f32 %v4364_v53, %v2841_v20  ;;  %v2210_v19 = vadd.f32 %v5879_v23, %v6141_v17 }
 0x1d6   : > { %3911 = vst [vmem:[%s5939_s30 + $0x20] sm:$0xff] %v3851_v2   ;;  %v2842_v8 = vadd.f32 %v4331_v18, %v2630_v6  ;;  %v3240_v61 = vadd.f32 %v3239_v15, %v3049_v32  ;;  %v3051_v55 = vadd.f32 %v2960_v50, %v2839_v42  ;;  %v2213_v50 = vadd.f32 %v6143_v1, %v6142_v3  ;;  %v6144_v42 = vld [vmem:[#allocation17_spill] sm:$0xff]  ;;  %v6146_v18 = vld [vmem:[#allocation10_spill] sm:$0xff] }
 0x1d7   : > { %v3309_v11 = vadd.f32 %v3308_v13, %v3278_v41  ;;  %v2751_v52 = vpop.f32.mrf.mxu1  ;;  %v4368_v45 = vpop.f32.mrf.mxu0  ;;  %v3283_v63 = vmul.f32 %v3053_v57, %v3053_v57  ;;  %v2635_v13 = vadd.f32 %v6144_v42, %v2210_v19  ;;  %v6145_v15 = vld [vmem:[#allocation13_spill] sm:$0xff]  ;;  %v6153_v19 = vld [vmem:[#allocation18_spill] sm:$0xff] }
 0x1d8   : > { %v3054_v37 = vadd.f32 %v4365_v10, %v2842_v8  ;;  %v2840_v21 = vadd.f32 %v2751_v52, %v2628_v31  ;;  %v3241_v59 = vadd.f32 %v3240_v61, %v3050_v43  ;;  %v3281_v30 = vmul.f32 %v3051_v55, %v3051_v55  ;;  %v6154_v1 = vld [vmem:[#allocation14_spill] sm:$0xff] }
 0x1d9   : > { %v3310_v56 = vadd.f32 %v3309_v11, %v3279_v12  ;;  %v4334_v36 = vpop.f32.mrf.mxu1  ;;  %v2976_v27 = vpop.f32.mrf.mxu0  ;;  %v2638_v8 = vadd.f32 %v6147_v25, %v2213_v50  ;;  %v6155_v50 = vld [vmem:[#allocation23_spill] sm:$0xff]  ;;  %v6160_v25 = vld [vmem:[#allocation25_spill] sm:$0xff] }
 0x1da   : > { %v3866_v22 = vpack.c.bf16 %v3054_v37, %v3053_v57  ;;  %v3052_v58 = vadd.f32 %v2963_v33, %v2840_v21  ;;  %v3242_v38 = vadd.f32 %v3241_v59, %v3051_v55  ;;  %v2845_v53 = vadd.f32 %v4334_v36, %v5868_v44 }
 0x1db   : > { %v3311_v54 = vadd.f32 %v3310_v56, %v3280_v7  ;;  %v2764_v48 = vpop.f32.mrf.mxu1  ;;  %v4369_v24 = vpop.f32.mrf.mxu0  ;;  %v3284_v10 = vmul.f32 %v3054_v37, %v3054_v37  ;;  %v2211_v33 = vadd.f32 %v6146_v18, %v6145_v15 }
 0x1dc   : > { %3914 = vst [vmem:[%s5939_s30 + $0x38] sm:$0xff] %v3866_v22   ;;  %v3861_v34 = vpack.c.bf16 %v3052_v58, %v3051_v55  ;;  %v3282_v39 = vmul.f32 %v3052_v58, %v3052_v58  ;;  %v2843_v32 = vadd.f32 %v2764_v48, %v2631_v29  ;;  %v3243_v43 = vadd.f32 %v3242_v38, %v3052_v58  ;;  %v6149_v29 = vld [vmem:[#allocation8_spill] sm:$0xff]  ;;  %v6150_v22 = vld [vmem:[#allocation3_spill] sm:$0xff]  ;;  %v6152_v38 = vld [vmem:[#allocation21_spill] sm:$0xff] }
 0x1dd   : > { %v3312_v0 = vadd.f32 %v3311_v54, %v3281_v30  ;;  %v4335_v26 = vpop.f32.mrf.mxu1  ;;  %v2979_v35 = vpop.f32.mrf.mxu0  ;;  %v3057_v60 = vadd.f32 %v4368_v45, %v2845_v53  ;;  %v2636_v9 = vadd.f32 %v6149_v29, %v2211_v33  ;;  %v2214_v58 = vadd.f32 %v5894_v47, %v6150_v22  ;;  %v6158_v33 = vld [vmem:[#allocation22_spill] sm:$0xff] }
 0x1de   : > { %3913 = vst [vmem:[%s5939_s30 + $0x30] sm:$0xff] %v3861_v34   ;;  %v2846_v28 = vadd.f32 %v4335_v26, %v2634_v14  ;;  %v3244_v4 = vadd.f32 %v3243_v43, %v3053_v57  ;;  %v3055_v6 = vadd.f32 %v2976_v27, %v2843_v32  ;;  %v6151_v14 = vld [vmem:[#allocation2_spill] sm:$0xff] }
 0x1df   : > { %v3313_v62 = vadd.f32 %v3312_v0, %v3282_v39  ;;  %v2767_v44 = vpop.f32.mrf.mxu1  ;;  %v4372_v46 = vpop.f32.mrf.mxu0  ;;  %v2217_v30 = vadd.f32 %v6152_v38, %v6151_v14  ;;  %v3287_v48 = vmul.f32 %v3057_v60, %v3057_v60  ;;  %v2639_v3 = vadd.f32 %v6153_v19, %v2214_v58  ;;  %v6163_v14 = vld [vmem:[#allocation24_spill] sm:$0xff] }
 0x1e0   : > { %v3058_v16 = vadd.f32 %v4369_v24, %v2846_v28  ;;  %v2844_v5 = vadd.f32 %v2767_v44, %v2632_v49  ;;  %v3245_v41 = vadd.f32 %v3244_v4, %v3054_v37  ;;  %v3285_v61 = vmul.f32 %v3055_v6, %v3055_v6  ;;  %v6148_v37 = vld [vmem:[#allocation15_spill] sm:$0xff] }
 0x1e1   : > { %v3314_v2 = vadd.f32 %v3313_v62, %v3283_v63  ;;  %v4338_v20 = vpop.f32.mrf.mxu1  ;;  %v2992_v23 = vpop.f32.mrf.mxu0  ;;  %v2215_v28 = vadd.f32 %v6155_v50, %v6154_v1  ;;  %v6156_v62 = vld [vmem:[#allocation19_spill] sm:$0xff] }
 0x1e2   : > { %v3876_v31 = vpack.c.bf16 %v3058_v16, %v3057_v60  ;;  %v3056_v51 = vadd.f32 %v2979_v35, %v2844_v5  ;;  %v3246_v12 = vadd.f32 %v3245_v41, %v3055_v6  ;;  %v2849_v21 = vadd.f32 %v4338_v20, %v6148_v37  ;;  %v6157_v41 = vld [vmem:[#allocation20_spill] sm:$0xff] }
 0x1e3   : > { %v3315_v11 = vadd.f32 %v3314_v2, %v3284_v10  ;;  %v2780_v55 = vpop.f32.mrf.mxu1  ;;  %v4373_v52 = vpop.f32.mrf.mxu0  ;;  %v3288_v35 = vmul.f32 %v3058_v16, %v3058_v16 }
 0x1e4   : > { %3916 = vst [vmem:[%s5939_s30 + $0x48] sm:$0xff] %v3876_v31   ;;  %v3871_v45 = vpack.c.bf16 %v3056_v51, %v3055_v6  ;;  %v3286_v57 = vmul.f32 %v3056_v51, %v3056_v51  ;;  %v2847_v7 = vadd.f32 %v2780_v55, %v2635_v13  ;;  %v3247_v59 = vadd.f32 %v3246_v12, %v3056_v51  ;;  %v6159_v51 = vld [vmem:[#allocation16_spill] sm:$0xff]  ;;  %v6161_v12 = vld [vmem:[#allocation5_spill] sm:$0xff] }
 0x1e5   : > { %v3316_v56 = vadd.f32 %v3315_v11, %v3285_v61  ;;  %v4339_v36 = vpop.f32.mrf.mxu1  ;;  %v2995_v27 = vpop.f32.mrf.mxu0  ;;  %v3061_v0 = vadd.f32 %v4372_v46, %v2849_v21  ;;  %v2642_v6 = vadd.f32 %v6156_v62, %v2217_v30  ;;  %v2640_v31 = vadd.f32 %v6158_v33, %v2215_v28  ;;  %v6162_v61 = vld [vmem:[#allocation28_spill] sm:$0xff]  ;;  %v6164_v30 = vld [vmem:[#allocation7_spill] sm:$0xff]  ;;  %v6168_v28 = vld [vmem:[#allocation29_spill] sm:$0xff] }
 0x1e6   : > { %3915 = vst [vmem:[%s5939_s30 + $0x40] sm:$0xff] %v3871_v45   ;;  %v2850_v54 = vadd.f32 %v4339_v36, %v2638_v8  ;;  %v3248_v24 = vadd.f32 %v3247_v59, %v3057_v60  ;;  %v3059_v39 = vadd.f32 %v2992_v23, %v2847_v7  ;;  %v2218_v8 = vadd.f32 %v6160_v25, %v6159_v51 }
 0x1e7   : > { %v3317_v34 = vadd.f32 %v3316_v56, %v3286_v57  ;;  %v2783_v53 = vpop.f32.mrf.mxu1  ;;  %v4376_v32 = vpop.f32.mrf.mxu0  ;;  %v2221_v11 = vadd.f32 %v6162_v61, %v6161_v12 }
 0x1e8   : > { %v3062_v43 = vadd.f32 %v4373_v52, %v2850_v54  ;;  %v2848_v26 = vadd.f32 %v2783_v53, %v2636_v9  ;;  %v3249_v49 = vadd.f32 %v3248_v24, %v3058_v16  ;;  %v3289_v60 = vmul.f32 %v3059_v39, %v3059_v39  ;;  %v6165_v54 = vld [vmem:[#allocation30_spill] sm:$0xff] }
 0x1e9   : > { %v3318_v40 = vadd.f32 %v3317_v34, %v3287_v48  ;;  %v4342_v17 = vpop.f32.mrf.mxu1  ;;  %v3008_v47 = vpop.f32.mrf.mxu0  ;;  %v3291_v52 = vmul.f32 %v3061_v0, %v3061_v0  ;;  %v2643_v38 = vadd.f32 %v6163_v14, %v2218_v8  ;;  %v2219_v48 = vadd.f32 %v6165_v54, %v6164_v30 }
 0x1ea   : > { %v3886_v63 = vpack.c.bf16 %v3062_v43, %v3061_v0  ;;  %v3060_v4 = vadd.f32 %v2995_v27, %v2848_v26  ;;  %v3250_v44 = vadd.f32 %v3249_v49, %v3059_v39  ;;  %v2853_v20 = vadd.f32 %v4342_v17, %v6157_v41 }
 0x1eb   : > { %v3319_v46 = vadd.f32 %v3318_v40, %v3288_v35  ;;  %v2796_v5 = vpop.f32.mrf.mxu1  ;;  %v4377_v10 = vpop.f32.mrf.mxu0  ;;  %v3292_v27 = vmul.f32 %v3062_v43, %v3062_v43 }
 0x1ec   : > { %3918 = vst [vmem:[%s5939_s30 + $0x58] sm:$0xff] %v3886_v63   ;;  %v3881_v2 = vpack.c.bf16 %v3060_v4, %v3059_v39  ;;  %v3290_v16 = vmul.f32 %v3060_v4, %v3060_v4  ;;  %v2851_v23 = vadd.f32 %v2796_v5, %v2639_v3  ;;  %v3251_v13 = vadd.f32 %v3250_v44, %v3060_v4  ;;  %v6166_v39 = vld [vmem:[#allocation26_spill] sm:$0xff] }
 0x1ed   : > { %v3320_v42 = vadd.f32 %v3319_v46, %v3289_v60  ;;  %v4343_v15 = vpop.f32.mrf.mxu1  ;;  %v3011_v18 = vpop.f32.mrf.mxu0  ;;  %v3065_v56 = vadd.f32 %v4376_v32, %v2853_v20  ;;  %v2646_v53 = vadd.f32 %v6166_v39, %v2221_v11  ;;  %v2644_v63 = vadd.f32 %v6168_v28, %v2219_v48 }
 0x1ee   : > { %3917 = vst [vmem:[%s5939_s30 + $0x50] sm:$0xff] %v3881_v2   ;;  %v2854_v55 = vadd.f32 %v4343_v15, %v2642_v6  ;;  %v3252_v45 = vadd.f32 %v3251_v13, %v3061_v0  ;;  %v3063_v37 = vadd.f32 %v3008_v47, %v2851_v23 }
 0x1ef   : > { %v3321_v57 = vadd.f32 %v3320_v42, %v3290_v16  ;;  %v2799_v21 = vpop.f32.mrf.mxu1  ;;  %v4380_v7 = vpop.f32.mrf.mxu0  ;;  %v3295_v62 = vmul.f32 %v3065_v56, %v3065_v56 }
 0x1f0   : > { %v3066_v59 = vadd.f32 %v4377_v10, %v2854_v55  ;;  %v2852_v36 = vadd.f32 %v2799_v21, %v2640_v31  ;;  %v3253_v9 = vadd.f32 %v3252_v45, %v3062_v43  ;;  %v3293_v32 = vmul.f32 %v3063_v37, %v3063_v37  ;;  %v6167_v43 = vld [vmem:[#allocation27_spill] sm:$0xff] }
 0x1f1   : > { %v3322_v29 = vadd.f32 %v3321_v57, %v3291_v52  ;;  %v4346_v22 = vpop.f32.mrf.mxu1  ;;  %v3024_v58 = vpop.f32.mrf.mxu0 }
 0x1f2   : > { %v3896_v24 = vpack.c.bf16 %v3066_v59, %v3065_v56  ;;  %v3064_v34 = vadd.f32 %v3011_v18, %v2852_v36  ;;  %v3254_v0 = vadd.f32 %v3253_v9, %v3063_v37  ;;  %v2857_v17 = vadd.f32 %v4346_v22, %v6167_v43 }
 0x1f3   : > { %v3323_v26 = vadd.f32 %v3322_v29, %v3292_v27  ;;  %v2812_v35 = vpop.f32.mrf.mxu1  ;;  %v4381_v50 = vpop.f32.mrf.mxu0  ;;  %v3296_v16 = vmul.f32 %v3066_v59, %v3066_v59 }
 0x1f4   : > { %3920 = vst [vmem:[%s5939_s30 + $0x68] sm:$0xff] %v3896_v24   ;;  %v3891_v40 = vpack.c.bf16 %v3064_v34, %v3063_v37  ;;  %v3294_v49 = vmul.f32 %v3064_v34, %v3064_v34  ;;  %v2855_v47 = vadd.f32 %v2812_v35, %v2643_v38  ;;  %v3255_v3 = vadd.f32 %v3254_v0, %v3064_v34 }
 0x1f5   : > { %v3324_v19 = vadd.f32 %v3323_v26, %v3293_v32  ;;  %v4347_v1 = vpop.f32.mrf.mxu1  ;;  %v3069_v5 = vadd.f32 %v4380_v7, %v2857_v17  ;;  %v3027_v23 = vpop.f32.mrf.mxu0 }
 0x1f6   : > { %3919 = vst [vmem:[%s5939_s30 + $0x60] sm:$0xff] %v3891_v40   ;;  %v2858_v4 = vadd.f32 %v4347_v1, %v2646_v53  ;;  %v3256_v6 = vadd.f32 %v3255_v3, %v3065_v56  ;;  %v3067_v60 = vadd.f32 %v3024_v58, %v2855_v47 }
 0x1f7   : > { %v3325_v44 = vadd.f32 %v3324_v19, %v3294_v49  ;;  %v2815_v46 = vpop.f32.mrf.mxu1  ;;  %v3299_v12 = vmul.f32 %v3069_v5, %v3069_v5 }
 0x1f8   : > { %v3070_v10 = vadd.f32 %v4381_v50, %v2858_v4  ;;  %v2856_v2 = vadd.f32 %v2815_v46, %v2644_v63  ;;  %v3257_v20 = vadd.f32 %v3256_v6, %v3066_v59  ;;  %v3297_v18 = vmul.f32 %v3067_v60, %v3067_v60 }
 0x1f9   : > { %v3326_v41 = vadd.f32 %v3325_v44, %v3295_v62 }
 0x1fa   : > { %v3906_v42 = vpack.c.bf16 %v3070_v10, %v3069_v5  ;;  %v3068_v13 = vadd.f32 %v3027_v23, %v2856_v2  ;;  %v3258_v15 = vadd.f32 %v3257_v20, %v3067_v60  ;;  %v3300_v55 = vmul.f32 %v3070_v10, %v3070_v10 }
 0x1fb   : > { %v3327_v33 = vadd.f32 %v3326_v41, %v3296_v16 }
 0x1fc   : > { %3922 = vst [vmem:[%s5939_s30 + $0x78] sm:$0xff] %v3906_v42   ;;  %v3901_v31 = vpack.c.bf16 %v3068_v13, %v3067_v60  ;;  %v3298_v51 = vmul.f32 %v3068_v13, %v3068_v13  ;;  %v3259_v8 = vadd.f32 %v3258_v15, %v3068_v13 }
 0x1fd   : > { %v3328_v25 = vadd.f32 %v3327_v33, %v3297_v18 }
 0x1fe   : > { %3921 = vst [vmem:[%s5939_s30 + $0x70] sm:$0xff] %v3901_v31   ;;  %v3260_v61 = vadd.f32 %v3259_v8, %v3069_v5 }
 0x1ff   : > { %v3329_v11 = vadd.f32 %v3328_v25, %v3298_v51 }
 0x200   : > { %v3261_v52 = vadd.f32 %v3260_v61, %v3070_v10 }
 0x201   : > { %v3330_v45 = vadd.f32 %v3329_v11, %v3299_v12 }
 0x202   : > { %v3262_v57 = vrot.slane %v3261_v52, 4 }
 0x203   : > { %v3331_v37 = vadd.f32 %v3330_v45, %v3300_v55 }
 0x204   : > { %v3263_v21 = vadd.f32 %v3262_v57, %v3261_v52 }
 0x205   : > { %v3332_v7 = vrot.slane %v3331_v37, 4 }
 0x206   : > { %v3264_v56 = vrot.slane %v3263_v21, 2 }
 0x207   : > { %v3333_v59 = vadd.f32 %v3332_v7, %v3331_v37 }
 0x208   : > { %v3265_v36 = vadd.f32 %v3264_v56, %v3263_v21 }
 0x209   : > { %v3334_v27 = vrot.slane %v3333_v59, 2 }
 0x20a   : > { %v3266_v29 = vrot.slane %v3265_v36, 1 }
 0x20b   : > { %v3335_v9 = vadd.f32 %v3334_v27, %v3333_v59 }
 0x20c   : > { %v3267_v22 = vadd.f32 %v3266_v29, %v3265_v36 }
 0x20d   : > { %v3336_v58 = vrot.slane %v3335_v9, 1 }
 0x20e   : > { %3268 = vst [vmem:[%s348_s8] sm:$0x1] %v3267_v22 }
 0x20f   : > { %v3337_v14 = vadd.f32 %v3336_v58, %v3335_v9 }
 0x211   : > { %3338 = vst [vmem:[%s354_s11] sm:$0x1] %v3337_v14 }
 0x212 PF: > { %s16_s20 = sadd.s32 1, %s4475_s20   ;;  %s6169_s18 = smov %s4471_s19 }
 0x213   : > { %p13_p5 = scmp.ge.s32.totalorder %s16_s20, 4   ;;  %s6170_s19 = smov %s6172_s21 }
 0x215   :  { %15 = sbr.rel (!%p13_p5) target bundleno = 2 (0x2), region = 97 }

</bundles_post_ra>
